<compile_context>
chip_gen: v7x
topology: tpu7x:2x2x1
jax: 0.10.0
libtpu: 0.0.40
codegen_flags: <defaults>
</compile_context>

<pallas_src>
import functools

import jax
import jax.numpy as jnp
from jax.experimental import pallas as pl
from jax.experimental.pallas import tpu as pltpu

# --------------------------- small, deterministic config ---------------------------
BATCH = 2
N_PER_BATCH = 128          # points per batch element (padded-to-max layout)
TAR_H = 16
TAR_W = 16
FEATURE_DIM = 16
HIDDEN_DIM = 32
SPLAT_SIGMA = 1.5          # pixels
BASE_W = 1e-3              # weight of the learned "default" feature at every pixel
INV_TWO_SIGMA2 = 1.0 / (2.0 * SPLAT_SIGMA ** 2)
PENALTY = 1e9              # added (negatively) to the exponent of invalid points
C_PAD = 128                # lane-dense channel padding for splat / output slabs
EPS = 1e-12

# column layout of the point-side `vals` slab fed to the splat matmul
VAL_ONES, VAL_DEPTH, VAL_POS, VAL_RGB, VAL_FEAT = 0, 1, 2, 5, 8
VAL_USED = VAL_FEAT + FEATURE_DIM                    # 24
# column layout of the per-pixel output slab
OUT_RES, OUT_DEPTH, OUT_FEAT = 0, 3, 4
OUT_DIR = OUT_FEAT + FEATURE_DIM                     # 20
OUT_RGB = OUT_DIR + 3                                # 23
OUT_USED = OUT_RGB + 3                               # 26


# =====================================================================================
# Single fused kernel: PointNet MLP + projection + soft splat + render head
#   grid = (B,), all batches independent -> "parallel".
# =====================================================================================
def _generatic_fused_kernel(pts_ref, rgb_ref, pvalid_ref, camdir_ref, mproj_ref,
                            camc_ref, px_ref, w1_ref, b1_ref, w2_ref, b2_ref,
                            wr_ref, br_ref, def_ref, out_ref, pf_ref):
    f32 = jnp.float32
    p = pts_ref[0]                        # (N, 3)
    rgb = rgb_ref[0]                      # (N, 3)
    pvalid = pvalid_ref[0]                # (N, 1)
    cam_dir = camdir_ref[0]               # (1, 3)  T[:, 0:3, 2] convention of the torch code
    mproj = mproj_ref[0]                  # (4, 4)  [p | 1] @ mproj = [proj_x, proj_y, proj_z, z_cam]
    cam_c = camc_ref[0]                   # (1, 3)  camera center -(R^T t)
    n = p.shape[0]
    n_px = px_ref.shape[0]

    # ---- PointNet (simplified shared per-point MLP), layers 1+2 fused ----
    d = p - cam_dir
    d = d * jax.lax.rsqrt(jnp.sum(d * d, axis=1, keepdims=True) + EPS)
    pd = jnp.concatenate([p, d], axis=1)                                    # (N, 6)
    h = jnp.dot(pd, w1_ref[...], preferred_element_type=f32) + b1_ref[...]  # (N, H)
    h = jnp.maximum(h, 0.0)
    feat = jnp.dot(h, w2_ref[...], preferred_element_type=f32) + b2_ref[...]  # (N, F)

    # ---- camera projection (K@[R|t] folded into mproj) ----
    proj = jnp.dot(p, mproj[0:3, :], preferred_element_type=f32) + mproj[3:4, :]  # (N, 4)
    z = proj[:, 2:3]
    z_cam = proj[:, 3:4]
    valid = pvalid * (z > 1e-6).astype(f32)
    safe_z = jnp.where(z > 1e-6, z, 1.0)
    u = proj[:, 0:1] / safe_z
    v = proj[:, 1:2] / safe_z

    # ---- splat weights via ONE MXU matmul: exponent = -dist^2/(2s^2) - PEN*(1-valid)
    pt_aug = jnp.concatenate(
        [u, v, jnp.ones_like(u),
         (-INV_TWO_SIGMA2) * (u * u + v * v) - PENALTY * (1.0 - valid),
         jnp.zeros((n, 4), f32)], axis=1)                                   # (N, 8)
    arg = jnp.dot(px_ref[...], pt_aug.T, preferred_element_type=f32)        # (P, N)
    w = jnp.exp(arg)                                                        # f32 on the EUP

    # ---- soft splat: the weight-sum rides in column 0 of `vals` ----
    vals = jnp.concatenate(
        [jnp.ones((n, 1), f32),                 # VAL_ONES  -> weight sum
         z_cam,                                  # VAL_DEPTH
         p,                                      # VAL_POS
         rgb,                                    # VAL_RGB
         feat,                                   # VAL_FEAT
         jnp.zeros((n, C_PAD - VAL_USED), f32)], axis=1)                    # (N, C_PAD)
    acc = jnp.dot(w.astype(jnp.bfloat16), vals.astype(jnp.bfloat16),
                  preferred_element_type=f32)                               # (P, C_PAD)

    inv = pl.reciprocal(acc[:, VAL_ONES:VAL_ONES + 1] + BASE_W, approx=True)
    blended = (acc + BASE_W * def_ref[...]) * inv                           # (P, C_PAD)

    depth = blended[:, VAL_DEPTH:VAL_DEPTH + 1]
    pos = blended[:, VAL_POS:VAL_POS + 3]
    rgbm = blended[:, VAL_RGB:VAL_RGB + 3]
    feats_px = blended[:, VAL_FEAT:VAL_FEAT + FEATURE_DIM]

    dvec = pos - cam_c
    dirn = dvec * jax.lax.rsqrt(jnp.sum(dvec * dvec, axis=1, keepdims=True) + EPS)

    # ---- render head: 1x1 conv (= matmul) + sigmoid ----
    res = jax.nn.sigmoid(
        jnp.dot(feats_px, wr_ref[...], preferred_element_type=f32) + br_ref[...])  # (P, 3)

    out = jnp.concatenate(
        [res, depth, feats_px, dirn, rgbm,
         jnp.zeros((n_px, C_PAD - OUT_USED), f32)], axis=1)                 # (P, C_PAD)
    out_ref[0] = out
    pf_ref[0] = feat.T                                                      # (F, N), lane-dense


# =====================================================================================
# Parameters (deterministic, synthetic; shapes follow the module's __init__)
# =====================================================================================
def init_params(key):
    ks = jax.random.split(key, 4)
    s = 0.1
    return {
        # PCPRParameters(feature_dim): learned default per-point feature
        "default_features": s * jax.random.normal(ks[0], (FEATURE_DIM,), jnp.float32),
        # PointNet (simplified shared MLP, input_channels = 3 xyz + 3 view-dir)
        "w1": s * jax.random.normal(ks[1], (6, HIDDEN_DIM), jnp.float32),
        "b1": jnp.zeros((HIDDEN_DIM,), jnp.float32),
        "w2": s * jax.random.normal(ks[2], (HIDDEN_DIM, FEATURE_DIM), jnp.float32),
        "b2": jnp.zeros((FEATURE_DIM,), jnp.float32),
        # PCPRender head (1x1 conv features -> RGB)
        "w_render": s * jax.random.normal(ks[3], (FEATURE_DIM, 3), jnp.float32),
        "b_render": jnp.zeros((3,), jnp.float32),
    }


# =====================================================================================
# Forward pass (mirrors Generatic_Model.forward), fully jitted, one pallas_call
# =====================================================================================
@jax.jit
def generatic_model_forward(params, in_points, K, T, near_far_max_splatting_size,
                            num_points, rgbs, inds=None):
    del near_far_max_splatting_size, inds
    num_points = num_points.astype(jnp.int32)          # num_points.int()
    B = K.shape[0]
    total = in_points.shape[0]
    N = total // B
    P = TAR_H * TAR_W

    # TODO(synk): per-batch counts are treated as a padded-to-max layout (all equal
    # here); truly ragged counts would need per-batch offsets via scalar prefetch.
    pts = in_points.reshape(B, N, 3)
    rgb_pts = rgbs.reshape(B, N, 3)
    pt_valid = (jnp.arange(N)[None, :] < num_points[:, None]).astype(jnp.float32)
    pt_valid = pt_valid.reshape(B, N, 1)

    # per-batch camera / projection constants (tiny, computed once under jit)
    R = T[:, :3, :3]
    t = T[:, :3, 3]
    KR = jnp.einsum('bij,bjk->bik', K, R)                               # (B,3,3)
    Kt = jnp.einsum('bij,bj->bi', K, t)                                 # (B,3)
    top = jnp.concatenate(
        [jnp.swapaxes(KR, 1, 2), jnp.swapaxes(R[:, 2:3, :], 1, 2)], axis=2)   # (B,3,4)
    bot = jnp.concatenate([Kt, t[:, 2:3]], axis=1)[:, None, :]                # (B,1,4)
    mproj = jnp.concatenate([top, bot], axis=1)                               # (B,4,4)

    cam_dir = T[:, 0:3, 2][:, None, :]                                  # (B,1,3)
    cam_center = -jnp.einsum('bji,bj->bi', R, t)[:, None, :]            # (B,1,3)

    # static pixel-side augmented coordinates for the distance matmul
    rows = jnp.arange(TAR_H, dtype=jnp.float32) + 0.5
    cols = jnp.arange(TAR_W, dtype=jnp.float32) + 0.5
    vv, uu = jnp.meshgrid(rows, cols, indexing="ij")
    u = uu.reshape(-1)
    v = vv.reshape(-1)
    zero = jnp.zeros_like(u)
    px_aug = jnp.stack(
        [2.0 * INV_TWO_SIGMA2 * u, 2.0 * INV_TWO_SIGMA2 * v,
         -INV_TWO_SIGMA2 * (u * u + v * v), jnp.ones_like(u),
         zero, zero, zero, zero], axis=1)                               # (P, 8)

    def_row = jnp.zeros((1, C_PAD), jnp.float32)
    def_row = def_row.at[0, VAL_FEAT:VAL_FEAT + FEATURE_DIM].set(params["default_features"])

    b1 = params["b1"].reshape(1, HIDDEN_DIM)
    b2 = params["b2"].reshape(1, FEATURE_DIM)
    br = params["b_render"].reshape(1, 3)

    out_slab, pf = pl.pallas_call(
        _generatic_fused_kernel,
        out_shape=(jax.ShapeDtypeStruct((B, P, C_PAD), jnp.float32),
                   jax.ShapeDtypeStruct((B, FEATURE_DIM, N), jnp.float32)),
        grid_spec=pltpu.PrefetchScalarGridSpec(
            num_scalar_prefetch=0,
            grid=(B,),
            in_specs=[
                pl.BlockSpec((1, N, 3), lambda b: (b, 0, 0)),            # pts
                pl.BlockSpec((1, N, 3), lambda b: (b, 0, 0)),            # rgbs
                pl.BlockSpec((1, N, 1), lambda b: (b, 0, 0)),            # pt_valid
                pl.BlockSpec((1, 1, 3), lambda b: (b, 0, 0)),            # cam_dir
                pl.BlockSpec((1, 4, 4), lambda b: (b, 0, 0)),            # mproj
                pl.BlockSpec((1, 1, 3), lambda b: (b, 0, 0)),            # cam_center
                pl.BlockSpec((P, 8), lambda b: (0, 0)),                  # px_aug
                pl.BlockSpec((6, HIDDEN_DIM), lambda b: (0, 0)),         # w1
                pl.BlockSpec((1, HIDDEN_DIM), lambda b: (0, 0)),         # b1
                pl.BlockSpec((HIDDEN_DIM, FEATURE_DIM), lambda b: (0, 0)),  # w2
                pl.BlockSpec((1, FEATURE_DIM), lambda b: (0, 0)),        # b2
                pl.BlockSpec((FEATURE_DIM, 3), lambda b: (0, 0)),        # w_render
                pl.BlockSpec((1, 3), lambda b: (0, 0)),                  # b_render
                pl.BlockSpec((1, C_PAD), lambda b: (0, 0)),              # default feature row
            ],
            out_specs=[
                pl.BlockSpec((1, P, C_PAD), lambda b: (b, 0, 0)),
                pl.BlockSpec((1, FEATURE_DIM, N), lambda b: (b, 0, 0)),
            ],
        ),
        compiler_params=pltpu.CompilerParams(
            dimension_semantics=("parallel",)),
    )(pts, rgb_pts, pt_valid, cam_dir, mproj, cam_center, px_aug,
      params["w1"], b1, params["w2"], b2, params["w_render"], br, def_row)

    # one batched NHWC -> NCHW, then slice channels from the lane-dense slab
    maps = out_slab.transpose(0, 2, 1).reshape(B, C_PAD, TAR_H, TAR_W)
    res = maps[:, OUT_RES:OUT_RES + 3]
    depth = maps[:, OUT_DEPTH:OUT_DEPTH + 1]
    features = maps[:, OUT_FEAT:OUT_FEAT + FEATURE_DIM]
    dir_in_world = maps[:, OUT_DIR:OUT_DIR + 3]
    rgb = maps[:, OUT_RGB:OUT_RGB + 3]
    point_features = pf.transpose(1, 0, 2).reshape(FEATURE_DIM, total)   # (F, total)
    return res, depth, features, dir_in_world, rgb, point_features


# =====================================================================================
if __name__ == "__main__":
    key = jax.random.PRNGKey(0)
    kp, kx, kz, kr = jax.random.split(key, 4)
    params = init_params(kp)

    total = BATCH * N_PER_BATCH
    xy = jax.random.uniform(kx, (total, 2), jnp.float32, -1.0, 1.0)
    zc = jax.random.uniform(kz, (total, 1), jnp.float32, 2.0, 4.0)
    in_points = jnp.concatenate([xy, zc], axis=1)                        # (total, 3)
    rgbs = jax.random.uniform(kr, (total, 3), jnp.float32)               # (total, 3)

    fx = fy = float(TAR_W)
    cx, cy = TAR_W / 2.0, TAR_H / 2.0
    K = jnp.tile(jnp.array([[fx, 0.0, cx], [0.0, fy, cy], [0.0, 0.0, 1.0]],
                           jnp.float32), (BATCH, 1, 1))                  # (B, 3, 3)
    T = jnp.tile(jnp.eye(4, dtype=jnp.float32), (BATCH, 1, 1))           # (B, 4, 4)
    near_far = jnp.tile(jnp.array([[0.1, 10.0, 2.0]], jnp.float32), (BATCH, 1))
    num_points = jnp.full((BATCH,), N_PER_BATCH, jnp.int32)

    outs = generatic_model_forward(params, in_points, K, T, near_far, num_points, rgbs)
    outs = jax.block_until_ready(outs)

    res, depth, features, dir_in_world, rgb, point_features = outs
    assert res.shape == (BATCH, 3, TAR_H, TAR_W)
    assert depth.shape == (BATCH, 1, TAR_H, TAR_W)
    assert features.shape == (BATCH, FEATURE_DIM, TAR_H, TAR_W)
    assert dir_in_world.shape == (BATCH, 3, TAR_H, TAR_W)
    assert rgb.shape == (BATCH, 3, TAR_H, TAR_W)
    assert point_features.shape == (FEATURE_DIM, total)
    assert all(bool(jnp.all(jnp.isfinite(o))) for o in outs)
    print("KERNEL_OK")
</pallas_src>

<mosaic_0001>
module attributes {stable_mosaic.version = 11 : i64} {
  func.func @_generatic_fused_kernel(%arg0: i32, %arg1: memref<1x128x3xf32, #tpu.memory_space<vmem>>, %arg2: memref<1x128x3xf32, #tpu.memory_space<vmem>>, %arg3: memref<1x128x1xf32, #tpu.memory_space<vmem>>, %arg4: memref<1x1x3xf32, #tpu.memory_space<vmem>>, %arg5: memref<1x4x4xf32, #tpu.memory_space<vmem>>, %arg6: memref<1x1x3xf32, #tpu.memory_space<vmem>>, %arg7: memref<256x8xf32, #tpu.memory_space<vmem>>, %arg8: memref<6x32xf32, #tpu.memory_space<vmem>>, %arg9: memref<1x32xf32, #tpu.memory_space<vmem>>, %arg10: memref<32x16xf32, #tpu.memory_space<vmem>>, %arg11: memref<1x16xf32, #tpu.memory_space<vmem>>, %arg12: memref<16x3xf32, #tpu.memory_space<vmem>>, %arg13: memref<1x3xf32, #tpu.memory_space<vmem>>, %arg14: memref<1x128xf32, #tpu.memory_space<vmem>>, %arg15: memref<1x256x128xf32, #tpu.memory_space<vmem>>, %arg16: memref<1x16x128xf32, #tpu.memory_space<vmem>>) attributes {dimension_semantics = [#tpu.dimension_semantics<parallel>], iteration_bounds = array<i64: 2>, scalar_prefetch = 0 : i64, scratch_operands = 0 : i64, tpu.core_type = #tpu.core_type<tc>, window_params = [{transform_indices = @transform_0, window_bounds = array<i64: 1, 128, 3>}, {transform_indices = @transform_1, window_bounds = array<i64: 1, 128, 3>}, {transform_indices = @transform_2, window_bounds = array<i64: 1, 128, 1>}, {transform_indices = @transform_3, window_bounds = array<i64: 1, 1, 3>}, {transform_indices = @transform_4, window_bounds = array<i64: 1, 4, 4>}, {transform_indices = @transform_5, window_bounds = array<i64: 1, 1, 3>}, {pipeline_mode = #tpu.pipeline_mode<synchronous>, transform_indices = @transform_6, window_bounds = array<i64: 256, 8>}, {pipeline_mode = #tpu.pipeline_mode<synchronous>, transform_indices = @transform_7, window_bounds = array<i64: 6, 32>}, {pipeline_mode = #tpu.pipeline_mode<synchronous>, transform_indices = @transform_8, window_bounds = array<i64: 1, 32>}, {pipeline_mode = #tpu.pipeline_mode<synchronous>, transform_indices = @transform_9, window_bounds = array<i64: 32, 16>}, {pipeline_mode = #tpu.pipeline_mode<synchronous>, transform_indices = @transform_10, window_bounds = array<i64: 1, 16>}, {pipeline_mode = #tpu.pipeline_mode<synchronous>, transform_indices = @transform_11, window_bounds = array<i64: 16, 3>}, {pipeline_mode = #tpu.pipeline_mode<synchronous>, transform_indices = @transform_12, window_bounds = array<i64: 1, 3>}, {pipeline_mode = #tpu.pipeline_mode<synchronous>, transform_indices = @transform_13, window_bounds = array<i64: 1, 128>}, {transform_indices = @transform_14, window_bounds = array<i64: 1, 256, 128>}, {transform_indices = @transform_15, window_bounds = array<i64: 1, 16, 128>}]} {
    %c0 = arith.constant 0 : index
    %c0_0 = arith.constant 0 : index
    %c0_1 = arith.constant 0 : index
    %0 = vector.load %arg1[%c0, %c0_0, %c0_1] : memref<1x128x3xf32, #tpu.memory_space<vmem>>, vector<1x128x3xf32>
    %1 = vector.shape_cast %0 : vector<1x128x3xf32> to vector<128x3xf32>
    %c0_2 = arith.constant 0 : index
    %c0_3 = arith.constant 0 : index
    %c0_4 = arith.constant 0 : index
    %2 = vector.load %arg2[%c0_2, %c0_3, %c0_4] : memref<1x128x3xf32, #tpu.memory_space<vmem>>, vector<1x128x3xf32>
    %3 = vector.shape_cast %2 : vector<1x128x3xf32> to vector<128x3xf32>
    %c0_5 = arith.constant 0 : index
    %c0_6 = arith.constant 0 : index
    %c0_7 = arith.constant 0 : index
    %4 = vector.load %arg3[%c0_5, %c0_6, %c0_7] : memref<1x128x1xf32, #tpu.memory_space<vmem>>, vector<1x128x1xf32>
    %5 = vector.shape_cast %4 : vector<1x128x1xf32> to vector<128x1xf32>
    %c0_8 = arith.constant 0 : index
    %c0_9 = arith.constant 0 : index
    %c0_10 = arith.constant 0 : index
    %6 = vector.load %arg4[%c0_8, %c0_9, %c0_10] : memref<1x1x3xf32, #tpu.memory_space<vmem>>, vector<1x1x3xf32>
    %7 = vector.shape_cast %6 : vector<1x1x3xf32> to vector<1x3xf32>
    %c0_11 = arith.constant 0 : index
    %c0_12 = arith.constant 0 : index
    %c0_13 = arith.constant 0 : index
    %8 = vector.load %arg5[%c0_11, %c0_12, %c0_13] : memref<1x4x4xf32, #tpu.memory_space<vmem>>, vector<1x4x4xf32>
    %9 = vector.shape_cast %8 : vector<1x4x4xf32> to vector<4x4xf32>
    %c0_14 = arith.constant 0 : index
    %c0_15 = arith.constant 0 : index
    %c0_16 = arith.constant 0 : index
    %10 = vector.load %arg6[%c0_14, %c0_15, %c0_16] : memref<1x1x3xf32, #tpu.memory_space<vmem>>, vector<1x1x3xf32>
    %11 = vector.shape_cast %10 : vector<1x1x3xf32> to vector<1x3xf32>
    %12 = vector.broadcast %7 : vector<1x3xf32> to vector<128x3xf32>
    %13 = arith.subf %1, %12 : vector<128x3xf32>
    %14 = arith.mulf %13, %13 : vector<128x3xf32>
    %cst = arith.constant dense<0.000000e+00> : vector<128xf32>
    %15 = vector.multi_reduction <add>, %14, %cst [1] : vector<128x3xf32> to vector<128xf32>
    %16 = vector.shape_cast %15 : vector<128xf32> to vector<128x1xf32>
    %cst_17 = arith.constant 9.99999996E-13 : f32
    %17 = vector.broadcast %cst_17 : f32 to vector<128x1xf32>
    %18 = arith.addf %16, %17 : vector<128x1xf32>
    %19 = math.rsqrt %18 : vector<128x1xf32>
    %20 = vector.broadcast %19 : vector<128x1xf32> to vector<128x3xf32>
    %21 = arith.mulf %13, %20 : vector<128x3xf32>
    %22 = tpu.concatenate %1, %21 in 1 : vector<128x3xf32>, vector<128x3xf32> -> vector<128x6xf32>
    %c0_18 = arith.constant 0 : index
    %c0_19 = arith.constant 0 : index
    %23 = vector.load %arg8[%c0_18, %c0_19] : memref<6x32xf32, #tpu.memory_space<vmem>>, vector<6x32xf32>
    %cst_20 = arith.constant dense<0.000000e+00> : vector<128x32xf32>
    %24 = tpu.matmul %22, %23, %cst_20 {dimension_numbers = #tpu.dot_dimension_numbers<[1], [0], [0], [1], [0, 0, 1, 1], [], []>} : vector<128x6xf32>, vector<6x32xf32>, vector<128x32xf32> -> vector<128x32xf32>
    %c0_21 = arith.constant 0 : index
    %c0_22 = arith.constant 0 : index
    %25 = vector.load %arg9[%c0_21, %c0_22] : memref<1x32xf32, #tpu.memory_space<vmem>>, vector<1x32xf32>
    %26 = vector.broadcast %25 : vector<1x32xf32> to vector<128x32xf32>
    %27 = arith.addf %24, %26 : vector<128x32xf32>
    %cst_23 = arith.constant 0.000000e+00 : f32
    %28 = vector.broadcast %cst_23 : f32 to vector<128x32xf32>
    %29 = arith.maximumf %27, %28 : vector<128x32xf32>
    %c0_24 = arith.constant 0 : index
    %c0_25 = arith.constant 0 : index
    %30 = vector.load %arg10[%c0_24, %c0_25] : memref<32x16xf32, #tpu.memory_space<vmem>>, vector<32x16xf32>
    %cst_26 = arith.constant dense<0.000000e+00> : vector<128x16xf32>
    %31 = tpu.matmul %29, %30, %cst_26 {dimension_numbers = #tpu.dot_dimension_numbers<[1], [0], [0], [1], [0, 0, 1, 1], [], []>} : vector<128x32xf32>, vector<32x16xf32>, vector<128x16xf32> -> vector<128x16xf32>
    %c0_27 = arith.constant 0 : index
    %c0_28 = arith.constant 0 : index
    %32 = vector.load %arg11[%c0_27, %c0_28] : memref<1x16xf32, #tpu.memory_space<vmem>>, vector<1x16xf32>
    %33 = vector.broadcast %32 : vector<1x16xf32> to vector<128x16xf32>
    %34 = arith.addf %31, %33 : vector<128x16xf32>
    %35 = vector.extract_strided_slice %9 {offsets = [0, 0], sizes = [3, 4], strides = [1, 1]} : vector<4x4xf32> to vector<3x4xf32>
    %cst_29 = arith.constant dense<0.000000e+00> : vector<128x4xf32>
    %36 = tpu.matmul %1, %35, %cst_29 {dimension_numbers = #tpu.dot_dimension_numbers<[1], [0], [0], [1], [0, 0, 1, 1], [], []>} : vector<128x3xf32>, vector<3x4xf32>, vector<128x4xf32> -> vector<128x4xf32>
    %37 = vector.extract_strided_slice %9 {offsets = [3, 0], sizes = [1, 4], strides = [1, 1]} : vector<4x4xf32> to vector<1x4xf32>
    %38 = vector.broadcast %37 : vector<1x4xf32> to vector<128x4xf32>
    %39 = arith.addf %36, %38 : vector<128x4xf32>
    %40 = vector.extract_strided_slice %39 {offsets = [0, 2], sizes = [128, 1], strides = [1, 1]} : vector<128x4xf32> to vector<128x1xf32>
    %41 = vector.extract_strided_slice %39 {offsets = [0, 3], sizes = [128, 1], strides = [1, 1]} : vector<128x4xf32> to vector<128x1xf32>
    %cst_30 = arith.constant 9.99999997E-7 : f32
    %42 = vector.broadcast %cst_30 : f32 to vector<128x1xf32>
    %43 = arith.cmpf ogt, %40, %42 : vector<128x1xf32>
    %44 = arith.extui %43 : vector<128x1xi1> to vector<128x1xi32>
    %45 = arith.sitofp %44 : vector<128x1xi32> to vector<128x1xf32>
    %46 = arith.mulf %5, %45 : vector<128x1xf32>
    %cst_31 = arith.constant 9.99999997E-7 : f32
    %47 = vector.broadcast %cst_31 : f32 to vector<128x1xf32>
    %48 = arith.cmpf ogt, %40, %47 : vector<128x1xf32>
    %cst_32 = arith.constant 1.000000e+00 : f32
    %49 = vector.broadcast %cst_32 : f32 to vector<128x1xf32>
    %50 = arith.select %48, %40, %49 : vector<128x1xi1>, vector<128x1xf32>
    %51 = vector.extract_strided_slice %39 {offsets = [0, 0], sizes = [128, 1], strides = [1, 1]} : vector<128x4xf32> to vector<128x1xf32>
    %52 = arith.divf %51, %50 : vector<128x1xf32>
    %53 = vector.extract_strided_slice %39 {offsets = [0, 1], sizes = [128, 1], strides = [1, 1]} : vector<128x4xf32> to vector<128x1xf32>
    %54 = arith.divf %53, %50 : vector<128x1xf32>
    %cst_33 = arith.constant 1.000000e+00 : f32
    %55 = vector.broadcast %cst_33 : f32 to vector<128x1xf32>
    %56 = arith.mulf %52, %52 : vector<128x1xf32>
    %57 = arith.mulf %54, %54 : vector<128x1xf32>
    %58 = arith.addf %56, %57 : vector<128x1xf32>
    %cst_34 = arith.constant -0.222222224 : f32
    %59 = vector.broadcast %cst_34 : f32 to vector<128x1xf32>
    %60 = arith.mulf %59, %58 : vector<128x1xf32>
    %cst_35 = arith.constant 1.000000e+00 : f32
    %61 = vector.broadcast %cst_35 : f32 to vector<128x1xf32>
    %62 = arith.subf %61, %46 : vector<128x1xf32>
    %cst_36 = arith.constant 1.000000e+09 : f32
    %63 = vector.broadcast %cst_36 : f32 to vector<128x1xf32>
    %64 = arith.mulf %63, %62 : vector<128x1xf32>
    %65 = arith.subf %60, %64 : vector<128x1xf32>
    %cst_37 = arith.constant 0.000000e+00 : f32
    %66 = vector.broadcast %cst_37 : f32 to vector<128x4xf32>
    %67 = tpu.concatenate %52, %54, %55, %65, %66 in 1 : vector<128x1xf32>, vector<128x1xf32>, vector<128x1xf32>, vector<128x1xf32>, vector<128x4xf32> -> vector<128x8xf32>
    %c0_38 = arith.constant 0 : index
    %c0_39 = arith.constant 0 : index
    %68 = vector.load %arg7[%c0_38, %c0_39] : memref<256x8xf32, #tpu.memory_space<vmem>>, vector<256x8xf32>
    %69 = tpu.transpose %67, [1, 0] : vector<128x8xf32> -> vector<8x128xf32>
    %cst_40 = arith.constant dense<0.000000e+00> : vector<256x128xf32>
    %70 = tpu.matmul %68, %69, %cst_40 {dimension_numbers = #tpu.dot_dimension_numbers<[1], [0], [0], [1], [0, 0, 1, 1], [], []>} : vector<256x8xf32>, vector<8x128xf32>, vector<256x128xf32> -> vector<256x128xf32>
    %71 = math.exp %70 : vector<256x128xf32>
    %cst_41 = arith.constant 1.000000e+00 : f32
    %72 = vector.broadcast %cst_41 : f32 to vector<128x1xf32>
    %cst_42 = arith.constant 0.000000e+00 : f32
    %73 = vector.broadcast %cst_42 : f32 to vector<128x104xf32>
    %74 = tpu.concatenate %72, %41, %1, %3, %34, %73 in 1 : vector<128x1xf32>, vector<128x1xf32>, vector<128x3xf32>, vector<128x3xf32>, vector<128x16xf32>, vector<128x104xf32> -> vector<128x128xf32>
    %75 = arith.truncf %71 : vector<256x128xf32> to vector<256x128xbf16>
    %76 = arith.truncf %74 : vector<128x128xf32> to vector<128x128xbf16>
    %cst_43 = arith.constant dense<0.000000e+00> : vector<256x128xf32>
    %77 = tpu.matmul %75, %76, %cst_43 {dimension_numbers = #tpu.dot_dimension_numbers<[1], [0], [0], [1], [0, 0, 1, 1], [], []>} : vector<256x128xbf16>, vector<128x128xbf16>, vector<256x128xf32> -> vector<256x128xf32>
    %78 = vector.extract_strided_slice %77 {offsets = [0, 0], sizes = [256, 1], strides = [1, 1]} : vector<256x128xf32> to vector<256x1xf32>
    %cst_44 = arith.constant 1.000000e-03 : f32
    %79 = vector.broadcast %cst_44 : f32 to vector<256x1xf32>
    %80 = arith.addf %78, %79 : vector<256x1xf32>
    %81 = tpu.reciprocal %80 {approx = true} : vector<256x1xf32> -> vector<256x1xf32>
    %c0_45 = arith.constant 0 : index
    %c0_46 = arith.constant 0 : index
    %82 = vector.load %arg14[%c0_45, %c0_46] : memref<1x128xf32, #tpu.memory_space<vmem>>, vector<1x128xf32>
    %cst_47 = arith.constant 1.000000e-03 : f32
    %83 = vector.broadcast %cst_47 : f32 to vector<1x128xf32>
    %84 = arith.mulf %83, %82 : vector<1x128xf32>
    %85 = vector.broadcast %84 : vector<1x128xf32> to vector<256x128xf32>
    %86 = arith.addf %77, %85 : vector<256x128xf32>
    %87 = vector.broadcast %81 : vector<256x1xf32> to vector<256x128xf32>
    %88 = arith.mulf %86, %87 : vector<256x128xf32>
    %89 = vector.extract_strided_slice %88 {offsets = [0, 1], sizes = [256, 1], strides = [1, 1]} : vector<256x128xf32> to vector<256x1xf32>
    %90 = vector.extract_strided_slice %88 {offsets = [0, 2], sizes = [256, 3], strides = [1, 1]} : vector<256x128xf32> to vector<256x3xf32>
    %91 = vector.extract_strided_slice %88 {offsets = [0, 5], sizes = [256, 3], strides = [1, 1]} : vector<256x128xf32> to vector<256x3xf32>
    %92 = vector.extract_strided_slice %88 {offsets = [0, 8], sizes = [256, 16], strides = [1, 1]} : vector<256x128xf32> to vector<256x16xf32>
    %93 = vector.broadcast %11 : vector<1x3xf32> to vector<256x3xf32>
    %94 = arith.subf %90, %93 : vector<256x3xf32>
    %95 = arith.mulf %94, %94 : vector<256x3xf32>
    %cst_48 = arith.constant dense<0.000000e+00> : vector<256xf32>
    %96 = vector.multi_reduction <add>, %95, %cst_48 [1] : vector<256x3xf32> to vector<256xf32>
    %97 = vector.shape_cast %96 : vector<256xf32> to vector<256x1xf32>
    %cst_49 = arith.constant 9.99999996E-13 : f32
    %98 = vector.broadcast %cst_49 : f32 to vector<256x1xf32>
    %99 = arith.addf %97, %98 : vector<256x1xf32>
    %100 = math.rsqrt %99 : vector<256x1xf32>
    %101 = vector.broadcast %100 : vector<256x1xf32> to vector<256x3xf32>
    %102 = arith.mulf %94, %101 : vector<256x3xf32>
    %c0_50 = arith.constant 0 : index
    %c0_51 = arith.constant 0 : index
    %103 = vector.load %arg12[%c0_50, %c0_51] : memref<16x3xf32, #tpu.memory_space<vmem>>, vector<16x3xf32>
    %cst_52 = arith.constant dense<0.000000e+00> : vector<256x3xf32>
    %104 = tpu.matmul %92, %103, %cst_52 {dimension_numbers = #tpu.dot_dimension_numbers<[1], [0], [0], [1], [0, 0, 1, 1], [], []>} : vector<256x16xf32>, vector<16x3xf32>, vector<256x3xf32> -> vector<256x3xf32>
    %c0_53 = arith.constant 0 : index
    %c0_54 = arith.constant 0 : index
    %105 = vector.load %arg13[%c0_53, %c0_54] : memref<1x3xf32, #tpu.memory_space<vmem>>, vector<1x3xf32>
    %106 = vector.broadcast %105 : vector<1x3xf32> to vector<256x3xf32>
    %107 = arith.addf %104, %106 : vector<256x3xf32>
    %108 = arith.negf %107 : vector<256x3xf32>
    %109 = math.exp %108 : vector<256x3xf32>
    %cst_55 = arith.constant 1.000000e+00 : f32
    %110 = vector.broadcast %cst_55 : f32 to vector<256x3xf32>
    %111 = arith.addf %110, %109 : vector<256x3xf32>
    %112 = arith.divf %110, %111 : vector<256x3xf32>
    %cst_56 = arith.constant 0.000000e+00 : f32
    %113 = vector.broadcast %cst_56 : f32 to vector<256x102xf32>
    %114 = tpu.concatenate %112, %89, %92, %102, %91, %113 in 1 : vector<256x3xf32>, vector<256x1xf32>, vector<256x16xf32>, vector<256x3xf32>, vector<256x3xf32>, vector<256x102xf32> -> vector<256x128xf32>
    %c0_57 = arith.constant 0 : index
    %c0_58 = arith.constant 0 : index
    %c0_59 = arith.constant 0 : index
    %115 = vector.load %arg15[%c0_57, %c0_58, %c0_59] : memref<1x256x128xf32, #tpu.memory_space<vmem>>, vector<1x256x128xf32>
    %116 = vector.shape_cast %115 : vector<1x256x128xf32> to vector<256x128xf32>
    %117 = vector.shape_cast %114 : vector<256x128xf32> to vector<1x256x128xf32>
    tpu.vector_store %arg15[%c0_57, %c0_58, %c0_59], %117 {strides = array<i32>} : memref<1x256x128xf32, #tpu.memory_space<vmem>>, vector<1x256x128xf32>,
    %118 = tpu.transpose %34, [1, 0] : vector<128x16xf32> -> vector<16x128xf32>
    %c0_60 = arith.constant 0 : index
    %c0_61 = arith.constant 0 : index
    %c0_62 = arith.constant 0 : index
    %119 = vector.load %arg16[%c0_60, %c0_61, %c0_62] : memref<1x16x128xf32, #tpu.memory_space<vmem>>, vector<1x16x128xf32>
    %120 = vector.shape_cast %119 : vector<1x16x128xf32> to vector<16x128xf32>
    %121 = vector.shape_cast %118 : vector<16x128xf32> to vector<1x16x128xf32>
    tpu.vector_store %arg16[%c0_60, %c0_61, %c0_62], %121 {strides = array<i32>} : memref<1x16x128xf32, #tpu.memory_space<vmem>>, vector<1x16x128xf32>,
    return
  }
  func.func @transform_0(%arg0: i32) -> (i32, i32, i32) {
    %c0_i32 = arith.constant 0 : i32
    %c0_i32_0 = arith.constant 0 : i32
    %c0_i32_1 = arith.constant 0 : i32
    return %arg0, %c0_i32, %c0_i32_0 : i32, i32, i32
  }
  func.func @transform_1(%arg0: i32) -> (i32, i32, i32) {
    %c0_i32 = arith.constant 0 : i32
    %c0_i32_0 = arith.constant 0 : i32
    %c0_i32_1 = arith.constant 0 : i32
    return %arg0, %c0_i32, %c0_i32_0 : i32, i32, i32
  }
  func.func @transform_2(%arg0: i32) -> (i32, i32, i32) {
    %c0_i32 = arith.constant 0 : i32
    %c0_i32_0 = arith.constant 0 : i32
    %c0_i32_1 = arith.constant 0 : i32
    return %arg0, %c0_i32, %c0_i32_0 : i32, i32, i32
  }
  func.func @transform_3(%arg0: i32) -> (i32, i32, i32) {
    %c0_i32 = arith.constant 0 : i32
    %c0_i32_0 = arith.constant 0 : i32
    %c0_i32_1 = arith.constant 0 : i32
    return %arg0, %c0_i32, %c0_i32_0 : i32, i32, i32
  }
  func.func @transform_4(%arg0: i32) -> (i32, i32, i32) {
    %c0_i32 = arith.constant 0 : i32
    %c0_i32_0 = arith.constant 0 : i32
    %c0_i32_1 = arith.constant 0 : i32
    return %arg0, %c0_i32, %c0_i32_0 : i32, i32, i32
  }
  func.func @transform_5(%arg0: i32) -> (i32, i32, i32) {
    %c0_i32 = arith.constant 0 : i32
    %c0_i32_0 = arith.constant 0 : i32
    %c0_i32_1 = arith.constant 0 : i32
    return %arg0, %c0_i32, %c0_i32_0 : i32, i32, i32
  }
  func.func @transform_6(%arg0: i32) -> (i32, i32) {
    %c0_i32 = arith.constant 0 : i32
    %c0_i32_0 = arith.constant 0 : i32
    %c0_i32_1 = arith.constant 0 : i32
    return %c0_i32, %c0_i32_0 : i32, i32
  }
  func.func @transform_7(%arg0: i32) -> (i32, i32) {
    %c0_i32 = arith.constant 0 : i32
    %c0_i32_0 = arith.constant 0 : i32
    %c0_i32_1 = arith.constant 0 : i32
    return %c0_i32, %c0_i32_0 : i32, i32
  }
  func.func @transform_8(%arg0: i32) -> (i32, i32) {
    %c0_i32 = arith.constant 0 : i32
    %c0_i32_0 = arith.constant 0 : i32
    %c0_i32_1 = arith.constant 0 : i32
    return %c0_i32, %c0_i32_0 : i32, i32
  }
  func.func @transform_9(%arg0: i32) -> (i32, i32) {
    %c0_i32 = arith.constant 0 : i32
    %c0_i32_0 = arith.constant 0 : i32
    %c0_i32_1 = arith.constant 0 : i32
    return %c0_i32, %c0_i32_0 : i32, i32
  }
  func.func @transform_10(%arg0: i32) -> (i32, i32) {
    %c0_i32 = arith.constant 0 : i32
    %c0_i32_0 = arith.constant 0 : i32
    %c0_i32_1 = arith.constant 0 : i32
    return %c0_i32, %c0_i32_0 : i32, i32
  }
  func.func @transform_11(%arg0: i32) -> (i32, i32) {
    %c0_i32 = arith.constant 0 : i32
    %c0_i32_0 = arith.constant 0 : i32
    %c0_i32_1 = arith.constant 0 : i32
    return %c0_i32, %c0_i32_0 : i32, i32
  }
  func.func @transform_12(%arg0: i32) -> (i32, i32) {
    %c0_i32 = arith.constant 0 : i32
    %c0_i32_0 = arith.constant 0 : i32
    %c0_i32_1 = arith.constant 0 : i32
    return %c0_i32, %c0_i32_0 : i32, i32
  }
  func.func @transform_13(%arg0: i32) -> (i32, i32) {
    %c0_i32 = arith.constant 0 : i32
    %c0_i32_0 = arith.constant 0 : i32
    %c0_i32_1 = arith.constant 0 : i32
    return %c0_i32, %c0_i32_0 : i32, i32
  }
  func.func @transform_14(%arg0: i32) -> (i32, i32, i32) {
    %c0_i32 = arith.constant 0 : i32
    %c0_i32_0 = arith.constant 0 : i32
    %c0_i32_1 = arith.constant 0 : i32
    return %arg0, %c0_i32, %c0_i32_0 : i32, i32, i32
  }
  func.func @transform_15(%arg0: i32) -> (i32, i32, i32) {
    %c0_i32 = arith.constant 0 : i32
    %c0_i32_0 = arith.constant 0 : i32
    %c0_i32_1 = arith.constant 0 : i32
    return %arg0, %c0_i32, %c0_i32_0 : i32, i32, i32
  }
}

</mosaic_0001>

<bundles_post_ra>
// kernel: neg.9
= control target key start
LH: loop header
LB: loop body
LE: loop exit
PB: predicated region body
PF: predicated region fallthrough
CT: control target
= control target key end

     0   :  { %s24_s0 = inlined_call_operand.vmem [shape: f32[2,3], index: 0, kind: input, shape index: {}]   ;;  %s25_s1 = inlined_call_operand.vmem [shape: f32[2,3], index: 1, kind: output, shape index: {}]  }
   0x1   :  { %v2_v0 = vld [vmem:[%s24_s0] sm:$0x3] }
   0x2   :  { %v5_v1 = vxor.u32 2147483648, %v2_v0 }
   0x4   :  { %7 = vst [vmem:[%s25_s1] sm:$0x3] %v5_v1 }

// kernel: generatic_model_forward.1
= control target key start
LH: loop header
LB: loop body
LE: loop exit
PB: predicated region body
PF: predicated region fallthrough
CT: control target
= control target key end

     0   :  { %s6656_s18 = smov 0   ;;  %s9696_s0 = inlined_call_operand.vmem [shape: f32[2,128,3], index: 0, kind: input, shape index: {}]   ;;  %s9697_s1 = inlined_call_operand.vmem [shape: f32[2,128,3], index: 1, kind: input, shape index: {}]   ;;  %s9698_s2 = inlined_call_operand.vmem [shape: f32[2,128,1], index: 2, kind: input, shape index: {}]   ;;  %s9699_s3 = inlined_call_operand.vmem [shape: f32[2,1,3], index: 3, kind: input, shape index: {}]   ;;  %s9700_s4 = inlined_call_operand.vmem [shape: f32[2,4,4], index: 4, kind: input, shape index: {}]   ;;  %s9701_s5 = inlined_call_operand.vmem [shape: f32[2,1,3], index: 5, kind: input, shape index: {}]   ;;  %s9702_s6 = inlined_call_operand.vmem [shape: f32[256,8], index: 6, kind: input, shape index: {}]   ;;  %s9703_s7 = inlined_call_operand.vmem [shape: f32[6,32], index: 7, kind: input, shape index: {}]   ;;  %s9704_s8 = inlined_call_operand.vmem [shape: f32[1,32], index: 8, kind: input, shape index: {}]   ;;  %s9705_s9 = inlined_call_operand.vmem [shape: f32[32,16], index: 9, kind: input, shape index: {}]   ;;  %s9706_s10 = inlined_call_operand.vmem [shape: f32[1,16], index: 10, kind: input, shape index: {}]   ;;  %s9707_s11 = inlined_call_operand.vmem [shape: f32[16,3], index: 11, kind: input, shape index: {}]   ;;  %s9708_s12 = inlined_call_operand.vmem [shape: f32[1,3], index: 12, kind: input, shape index: {}]   ;;  %s9709_s13 = inlined_call_operand.vmem [shape: f32[1,128], index: 13, kind: input, shape index: {}]   ;;  %s9710_s14 = inlined_call_operand.vmem [shape: f32[2,256,128], index: 14, kind: output, shape index: {0}]   ;;  %s9711_s15 = inlined_call_operand.vmem [shape: f32[2,16,128], index: 15, kind: output, shape index: {1}]  }
   0x1 LB: > { %s5150_s19 = sadd.s32 4294967295, %s6563_s18   ;;  %p5154_p0 = scmp.ge.s32.totalorder %s6563_s18, 1  ;;  %s6563_s18 = sphi %s6656_s18, %s26_s18  }
   0x2   : > { %p485_p1 = scmp.lt.s32.totalorder %s6563_s18, 3 }
   0x4   : > { %p486_p2 = pnand %p5154_p0, %p485_p1 }
   0x6   : > { %489 = sbr.rel (%p486_p2) target bundleno = 2016 (0x7e0), region = 76 }
   0xd   : > { %p558_p3 = scmp.lt.s32.totalorder %s5150_s19, 1  ;;  %vm683_vm0 = vcmask 23552   ;;  %vm1339_vm1 = vcmask 1042432   ;;  %vm917_vm2 = vcmask 1045504   ;;  %s6565_s21 = smov 3  }
   0xe   : > { %s6566_s22 = smov 127   ;;  %s6569_s24 = smov 5  }
   0xf   : > { %s10010_s19 = smov (!%p558_p3, %s5150_s19), 1  ;;  %s6573_s28 = smov 120  }
  0x10   : > { %s6667_s20 = sshll.u32 %s10010_s19, 7  ;;  %s575_s23 = scalar_lea.vmem %s9699_s3, %s10010_s19 }
  0x11   : > { %s6677_s26 = scalar_lea.vmem %s9696_s0, %s6667_s20  ;;  %v6679_v0 = vld [vmem:[%s575_s23] ss:$0 sm:$0xff]  ;;  %s5161_s27 = sshll.u32 %s10010_s19, 2 }
  0x12   : > { %v6683_v1 = vld [vmem:[%s6677_s26] sm:$0xff]  ;;  %v6686_v2 = vld [vmem:[%s6677_s26 + $0x8] sm:$0xff]  ;;  %v6689_v3 = vld [vmem:[%s6677_s26 + $0x10] sm:$0xff]  ;;  %s579_s30 = scalar_lea.vmem %s9700_s4, %s5161_s27  ;;  %s9714_s23 = smov 126  }
  0x13   : > { %5600 = vmatprep.mubr.msk.f32.mxu0 %vm683_vm0, %v6683_v1  ;;  %v6698_v4 = vsub.f32 %v6683_v1, %v6679_v0  ;;  %v6701_v5 = vld [vmem:[%s6677_s26 + $0x18] sm:$0xff]  ;;  %v6705_v6 = vsub.f32 %v6686_v2, %v6679_v0  ;;  %v6709_v7 = vsub.f32 %v6689_v3, %v6679_v0  ;;  %v6711_v8 = vld [vmem:[%s579_s30] sm:$0xf]  ;;  %v6727_v13 = vld [vmem:[%s6677_s26 + $0x28] sm:$0xff]  ;;  %s7421_s27 = scalar_lea.vmem %s9698_s2, %s6667_s20  ;;  %s7547_s16 = scalar_lea.vmem %s9697_s1, %s6667_s20 }
  0x14   : > { %v6714_v9 = vld [vmem:[%s6677_s26 + $0x20] sm:$0xff]  ;;  %v6718_v10 = vsub.f32 %v6701_v5, %v6679_v0  ;;  %5598 = vmatprep.subr.msk.mxu0 %vm1339_vm1, %v6711_v8  ;;  %v6741_v17 = vsub.f32 %v6727_v13, %v6679_v0  ;;  %v6750_v20 = vld [vmem:[%s6677_s26 + $0x30] sm:$0xff]  ;;  %v6754_v22 = vld [vmem:[%s6677_s26 + $0x38] sm:$0xff]  ;;  %s9772_s30 = smov 2   ;;  %s9775_s20 = smov 126  }
  0x15   : > { %v667_v11 = vmul.f32 %v6698_v4, %v6698_v4  ;;  %v668_v12 = vmul.f32 %v6705_v6, %v6705_v6  ;;  %v669_v14 = vmul.f32 %v6709_v7, %v6709_v7  ;;  %v6733_v15 = vsub.f32 %v6714_v9, %v6679_v0  ;;  %5599 = vmatpush3.msk.msra.mxu0 %vm1339_vm1, %v6711_v8  ;;  %v6774_v28 = vld [vmem:[%s6677_s26 + $0x40] sm:$0xff]  ;;  %v6777_v29 = vld [vmem:[%s6677_s26 + $0x48] sm:$0xff]  ;;  %v6798_v36 = vld [vmem:[%s6677_s26 + $0x50] sm:$0xff]  ;;  %s6574_s29 = smov 124  }
  0x16   : > { %v670_v16 = vmul.f32 %v6718_v10, %v6718_v10  ;;  %5601 = vmatmul.mubr.msk.f32.vlgmr.msra.gmra.mrb[0].mxu0 %vm683_vm0, %v6686_v2  ;;  %v6760_v24 = vsub.f32 %v6750_v20, %v6679_v0  ;;  %v672_v26 = vmul.f32 %v6741_v17, %v6741_v17  ;;  %v6767_v27 = vsub.f32 %v6754_v22, %v6679_v0  ;;  %v6801_v37 = vld [vmem:[%s6677_s26 + $0x58] sm:$0xff]  ;;  %v6822_v44 = vld [vmem:[%s6677_s26 + $0x60] sm:$0xff]  ;;  %v6825_v45 = vld [vmem:[%s6677_s26 + $0x68] sm:$0xff] }
  0x17   : > { %v684_v18 = vsel %vm683_vm0, %v667_v11, 0.0  ;;  %v690_v19 = vsel %vm683_vm0, %v669_v14, 0.0  ;;  %5603 = vmatprep.mubr.msk.f32.mxu0 %vm683_vm0, %v6689_v3  ;;  %v687_v21 = vsel %vm683_vm0, %v668_v12, 0.0  ;;  %v671_v23 = vmul.f32 %v6733_v15, %v6733_v15  ;;  %v6846_v52 = vld [vmem:[%s6677_s26 + $0x70] sm:$0xff]  ;;  %v6850_v54 = vld [vmem:[%s6677_s26 + $0x78] sm:$0xff] }
  0x18   : > { %685 = vadd.xlane.f32.xlu0 %v684_v18  ;;  %691 = vadd.xlane.f32.xlu1 %v690_v19  ;;  %v693_v25 = vsel %vm683_vm0, %v670_v16, 0.0  ;;  %v673_v31 = vmul.f32 %v6760_v24, %v6760_v24  ;;  %v6784_v32 = vsub.f32 %v6774_v28, %v6679_v0  ;;  %v699_v33 = vsel %vm683_vm0, %v672_v26, 0.0  ;;  %v860_v19 = vld [vmem:[%s9703_s7] sm:$0x3f] }
  0x19   : > { %v696_v30 = vsel %vm683_vm0, %v671_v23, 0.0  ;;  %v674_v34 = vmul.f32 %v6767_v27, %v6767_v27  ;;  %v6791_v35 = vsub.f32 %v6777_v29, %v6679_v0  ;;  %v6808_v40 = vsub.f32 %v6798_v36, %v6679_v0  ;;  %5540 = vmatprep.subr.msk.mxu1 %vm917_vm2, %v860_v19 }
  0x1a   : > { %5604 = vmatmul.mubr.msk.f32.gmra.mrb[2].mxu0 %vm683_vm0, %v6701_v5  ;;  %v702_v38 = vsel %vm683_vm0, %v673_v31, 0.0  ;;  %v675_v39 = vmul.f32 %v6784_v32, %v6784_v32  ;;  %v6815_v43 = vsub.f32 %v6801_v37, %v6679_v0  ;;  %v6832_v48 = vsub.f32 %v6822_v44, %v6679_v0  ;;  %5541 = vmatpush3.msk.msra.mxu1 %vm917_vm2, %v860_v19 }
  0x1b   : > { %5606 = vmatprep.mubr.msk.f32.mxu0 %vm683_vm0, %v6714_v9  ;;  %v705_v41 = vsel %vm683_vm0, %v674_v34, 0.0  ;;  %v676_v42 = vmul.f32 %v6791_v35, %v6791_v35  ;;  %v677_v47 = vmul.f32 %v6808_v40, %v6808_v40  ;;  %v6839_v51 = vsub.f32 %v6825_v45, %v6679_v0 }
  0x1c   : > { %688 = vadd.xlane.f32.xlu0 %v687_v21  ;;  %694 = vadd.xlane.f32.xlu1 %v693_v25  ;;  %v708_v46 = vsel %vm683_vm0, %v675_v39, 0.0  ;;  %v678_v50 = vmul.f32 %v6815_v43, %v6815_v43  ;;  %v679_v55 = vmul.f32 %v6832_v48, %v6832_v48  ;;  %v6856_v56 = vsub.f32 %v6846_v52, %v6679_v0 }
  0x1d   : > { %v711_v49 = vsel %vm683_vm0, %v676_v42, 0.0  ;;  %v714_v53 = vsel %vm683_vm0, %v677_v47, 0.0  ;;  %v680_v58 = vmul.f32 %v6839_v51, %v6839_v51  ;;  %v6863_v59 = vsub.f32 %v6850_v54, %v6679_v0 }
  0x1e   : > { %5607 = vmatmul.mubr.msk.f32.gmra.mrb[4].mxu0 %vm683_vm0, %v6727_v13  ;;  %v717_v57 = vsel %vm683_vm0, %v678_v50, 0.0  ;;  %v720_v60 = vsel %vm683_vm0, %v679_v55, 0.0  ;;  %v681_v61 = vmul.f32 %v6856_v56, %v6856_v56 }
  0x1f   : > { %5609 = vmatprep.mubr.msk.f32.mxu0 %vm683_vm0, %v6750_v20  ;;  %v723_v62 = vsel %vm683_vm0, %v680_v58, 0.0  ;;  %v682_v63 = vmul.f32 %v6863_v59, %v6863_v59 }
  0x20   : > { %697 = vadd.xlane.f32.xlu0 %v696_v30  ;;  %700 = vadd.xlane.f32.xlu1 %v699_v33  ;;  %v726_v0 = vsel %vm683_vm0, %v681_v61, 0.0 }
  0x21   : > { %v729_v11 = vsel %vm683_vm0, %v682_v63, 0.0 }
  0x22   : > { %5610 = vmatmul.mubr.msk.f32.gmra.mrb[6].mxu0 %vm683_vm0, %v6754_v22 }
  0x23   : > { %5612 = vmatprep.mubr.msk.f32.mxu0 %vm683_vm0, %v6774_v28 }
  0x24   : > { %703 = vadd.xlane.f32.xlu0 %v702_v38  ;;  %706 = vadd.xlane.f32.xlu1 %v705_v41 }
  0x26   : > { %5613 = vmatmul.mubr.msk.f32.gmra.mrb[8].mxu0 %vm683_vm0, %v6777_v29 }
  0x27   : > { %5615 = vmatprep.mubr.msk.f32.mxu0 %vm683_vm0, %v6798_v36 }
  0x28   : > { %709 = vadd.xlane.f32.xlu0 %v708_v46  ;;  %712 = vadd.xlane.f32.xlu1 %v711_v49 }
  0x2a   : > { %5616 = vmatmul.mubr.msk.f32.gmra.mrb[10].mxu0 %vm683_vm0, %v6801_v37 }
  0x2b   : > { %5618 = vmatprep.mubr.msk.f32.mxu0 %vm683_vm0, %v6822_v44 }
  0x2c   : > { %715 = vadd.xlane.f32.xlu0 %v714_v53  ;;  %718 = vadd.xlane.f32.xlu1 %v717_v57 }
  0x2e   : > { %5619 = vmatmul.mubr.msk.f32.gmra.mrb[12].mxu0 %vm683_vm0, %v6825_v45 }
  0x2f   : > { %5621 = vmatprep.mubr.msk.f32.mxu0 %vm683_vm0, %v6846_v52 }
  0x30   : > { %721 = vadd.xlane.f32.xlu0 %v720_v60  ;;  %724 = vadd.xlane.f32.xlu1 %v723_v62 }
  0x32   : > { %5622 = vmatmul.mubr.msk.f32.gmra.mrb[14].mxu0 %vm683_vm0, %v6850_v54 }
  0x34   : > { %727 = vadd.xlane.f32.xlu0 %v726_v0  ;;  %730 = vadd.xlane.f32.xlu1 %v729_v11 }
  0xa5   : > { %v686_v12 = vpop.xlane.xlu0 %685  ;;  %v692_v16 = vpop.xlane.xlu1 %691 }
  0xa6   : > { %v732_v14 = vadd.f32 1e-12, %v686_v12  ;;  %v734_v18 = vadd.f32 1e-12, %v692_v16 }
  0xa8   : > { %6125 = vrsqrt.f32 %v732_v14 }
  0xa9   : > { %v689_v21 = vpop.xlane.xlu0 %688  ;;  %v695_v25 = vpop.xlane.xlu1 %694  ;;  %6127 = vrsqrt.f32 %v734_v18 }
  0xaa   : > { %v733_v23 = vadd.f32 1e-12, %v689_v21  ;;  %v735_v26 = vadd.f32 1e-12, %v695_v25 }
  0xac   : > { %6129 = vrsqrt.f32 %v733_v23 }
  0xad   : > { %v698_v30 = vpop.xlane.xlu0 %697  ;;  %v701_v33 = vpop.xlane.xlu1 %700  ;;  %6131 = vrsqrt.f32 %v735_v26 }
  0xae   : > { %v736_v31 = vadd.f32 1e-12, %v698_v30  ;;  %v737_v34 = vadd.f32 1e-12, %v701_v33 }
  0xb0   : > { %6133 = vrsqrt.f32 %v736_v31 }
  0xb1   : > { %v704_v38 = vpop.xlane.xlu0 %703  ;;  %v707_v42 = vpop.xlane.xlu1 %706  ;;  %6135 = vrsqrt.f32 %v737_v34 }
  0xb2   : > { %v6126_v39 = vpop.eup %6125  ;;  %v738_v41 = vadd.f32 1e-12, %v704_v38  ;;  %v739_v47 = vadd.f32 1e-12, %v707_v42 }
  0xb3   : > { %v764_v46 = vmul.f32 %v6126_v39, %v6698_v4  ;;  %v6128_v49 = vpop.eup %6127 }
  0xb4   : > { %6137 = vrsqrt.f32 %v738_v41  ;;  %v766_v4 = vmul.f32 %v6128_v49, %v6709_v7 }
  0xb5   : > { %796 = vrot.lane.b32.xlu0 %v764_v46, %s6565_s21  ;;  %v710_v50 = vpop.xlane.xlu0 %709  ;;  %v713_v57 = vpop.xlane.xlu1 %712  ;;  %6139 = vrsqrt.f32 %v739_v47 }
  0xb6   : > { %v6130_v53 = vpop.eup %6129  ;;  %v740_v55 = vadd.f32 1e-12, %v710_v50  ;;  %v741_v60 = vadd.f32 1e-12, %v713_v57 }
  0xb7   : > { %v765_v58 = vmul.f32 %v6130_v53, %v6705_v6  ;;  %v6132_v61 = vpop.eup %6131 }
  0xb8   : > { %6141 = vrsqrt.f32 %v740_v55  ;;  %v767_v6 = vmul.f32 %v6132_v61, %v6718_v10  ;;  %v1287_v55 = vlaneseq }
  0xb9   : > { %798 = vrot.lane.b32.xlu1 %v765_v58, %s6565_s21  ;;  %v716_v62 = vpop.xlane.xlu0 %715  ;;  %v719_v11 = vpop.xlane.xlu1 %718  ;;  %6143 = vrsqrt.f32 %v741_v60 }
  0xba   : > { %v6134_v63 = vpop.eup %6133  ;;  %v742_v0 = vadd.f32 1e-12, %v716_v62  ;;  %v743_v14 = vadd.f32 1e-12, %v719_v11 }
  0xbb   : > { %v768_v12 = vmul.f32 %v6134_v63, %v6733_v15  ;;  %v6136_v16 = vpop.eup %6135 }
  0xbc   : > { %6145 = vrsqrt.f32 %v742_v0  ;;  %v769_v15 = vmul.f32 %v6136_v16, %v6741_v17 }
  0xbd   : > { %800 = vrot.lane.b32.xlu1 %v766_v4, %s6565_s21  ;;  %804 = vrot.lane.b32.xlu0 %v768_v12, %s6565_s21  ;;  %v722_v18 = vpop.xlane.xlu0 %721  ;;  %v725_v7 = vpop.xlane.xlu1 %724  ;;  %6147 = vrsqrt.f32 %v743_v14 }
  0xbe   : > { %v6138_v19 = vpop.eup %6137  ;;  %v744_v21 = vadd.f32 1e-12, %v722_v18  ;;  %v745_v25 = vadd.f32 1e-12, %v725_v7 }
  0xbf   : > { %v770_v23 = vmul.f32 %v6138_v19, %v6760_v24  ;;  %v6140_v26 = vpop.eup %6139 }
  0xc0   : > { %6149 = vrsqrt.f32 %v744_v21  ;;  %v771_v24 = vmul.f32 %v6140_v26, %v6767_v27 }
  0xc1   : > { %802 = vrot.lane.b32.xlu1 %v767_v6, %s6565_s21  ;;  %808 = vrot.lane.b32.xlu0 %v770_v23, %s6565_s21  ;;  %v728_v30 = vpop.xlane.xlu0 %727  ;;  %v731_v33 = vpop.xlane.xlu1 %730  ;;  %6151 = vrsqrt.f32 %v745_v25 }
  0xc2   : > { %v6142_v10 = vpop.eup %6141  ;;  %v746_v31 = vadd.f32 1e-12, %v728_v30  ;;  %v747_v38 = vadd.f32 1e-12, %v731_v33  ;;  %v6567_v30 = vmov 0.0  }
  0xc3   : > { %v772_v34 = vmul.f32 %v6142_v10, %v6784_v32  ;;  %v6144_v39 = vpop.eup %6143 }
  0xc4   : > { %6153 = vrsqrt.f32 %v746_v31  ;;  %v773_v46 = vmul.f32 %v6144_v39, %v6791_v35 }
  0xc5   : > { %806 = vrot.lane.b32.xlu1 %v769_v15, %s6565_s21  ;;  %812 = vrot.lane.b32.xlu0 %v772_v34, %s6565_s21  ;;  %6155 = vrsqrt.f32 %v747_v38 }
  0xc6   : > { %v6146_v41 = vpop.eup %6145 }
  0xc7   : > { %v774_v17 = vmul.f32 %v6146_v41, %v6808_v40  ;;  %v6148_v42 = vpop.eup %6147 }
  0xc8   : > { %v775_v27 = vmul.f32 %v6148_v42, %v6815_v43  ;;  %v6918_v43 = vshrl.u32 %v1287_v55, 7 }
  0xc9   : > { %810 = vrot.lane.b32.xlu1 %v771_v24, %s6565_s21  ;;  %816 = vrot.lane.b32.xlu0 %v774_v17, %s6565_s21 }
  0xca   : > { %v6150_v32 = vpop.eup %6149  ;;  %9754 = vst [vmem:[#allocation2_spill] sm:$0xff] %v6918_v43  ;;  %v1289_v57 = vsub.s32 3, %v6918_v43 }
  0xcb   : > { %v776_v47 = vmul.f32 %v6150_v32, %v6832_v48  ;;  %v6152_v49 = vpop.eup %6151 }
  0xcc   : > { %v777_v53 = vmul.f32 %v6152_v49, %v6839_v51 }
  0xcd   : > { %814 = vrot.lane.b32.xlu1 %v773_v46, %s6565_s21  ;;  %820 = vrot.lane.b32.xlu0 %v776_v47, %s6565_s21 }
  0xce   : > { %v6154_v50 = vpop.eup %6153 }
  0xcf   : > { %v778_v40 = vmul.f32 %v6154_v50, %v6856_v56  ;;  %v6156_v35 = vpop.eup %6155  ;;  %v6922_v56 = vrot.slane %v6711_v8, %v1289_v57 }
  0xd0   : > { %v779_v48 = vmul.f32 %v6156_v35, %v6863_v59 }
  0xd1   : > { %818 = vrot.lane.b32.xlu1 %v775_v27, %s6565_s21  ;;  %824 = vrot.lane.b32.xlu0 %v778_v40, %s6565_s21 }
  0xd5   : > { %822 = vrot.lane.b32.xlu1 %v777_v53, %s6565_s21 }
  0xd9   : > { %826 = vrot.lane.b32.xlu1 %v779_v48, %s6565_s21 }
  0xe9   : > { %v5602_v58 = vpop.f32.mrb[0].mxu0 }
  0xea   : > { %v6925_v51 = vadd.f32 %v5602_v58, %v6922_v56  ;;  %v1409_v60 = vpop.f32.mrb[1].mxu0 }
  0xeb   : > { %v6928_v61 = vadd.f32 %v1409_v60, %v6922_v56 }
  0xec   : > { %vm1489_vm3 = vcmp.gt.f32.partialorder %v6925_v51, 1e-06 }
  0xed   : > { %v5605_v59 = vpop.f32.mrb[2].mxu0  ;;  %v6934_v4 = vsel %vm1489_vm3, %v6925_v51, 1.0  ;;  %vm1488_vm4 = vcmp.gt.f32.partialorder %v6928_v61, 1e-06 }
  0xee   : > { %v6938_v8 = vadd.f32 %v5605_v59, %v6922_v56  ;;  %v1419_v62 = vpop.f32.mrb[3].mxu0  ;;  %1730 = vrot.lane.b32.xlu1 %v6934_v4, %s6566_s22  ;;  %v6945_v63 = vsel %vm1488_vm4, %v6928_v61, 1.0 }
  0xef   : > { %v6948_v0 = vadd.f32 %v1419_v62, %v6922_v56  ;;  %1728 = vrot.lane.b32.xlu0 %v6945_v63, %s6566_s22 }
  0xf0   : > { %vm1491_vm5 = vcmp.gt.f32.partialorder %v6938_v8, 1e-06 }
  0xf1   : > { %v5608_v11 = vpop.f32.mrb[4].mxu0  ;;  %v6956_v12 = vsel %vm1491_vm5, %v6938_v8, 1.0  ;;  %vm1490_vm6 = vcmp.gt.f32.partialorder %v6948_v0, 1e-06 }
  0xf2   : > { %v6960_v14 = vadd.f32 %v5608_v11, %v6922_v56  ;;  %v1429_v16 = vpop.f32.mrb[5].mxu0  ;;  %1734 = vrot.lane.b32.xlu1 %v6956_v12, %s6566_s22  ;;  %v6967_v6 = vsel %vm1490_vm6, %v6948_v0, 1.0 }
  0xf3   : > { %v6970_v18 = vadd.f32 %v1429_v16, %v6922_v56  ;;  %1732 = vrot.lane.b32.xlu0 %v6967_v6, %s6566_s22 }
  0xf4   : > { %vm1493_vm7 = vcmp.gt.f32.partialorder %v6960_v14, 1e-06 }
  0xf5   : > { %v5611_v19 = vpop.f32.mrb[6].mxu0  ;;  %v6978_v21 = vsel %vm1493_vm7, %v6960_v14, 1.0  ;;  %vm1492_vm8 = vcmp.gt.f32.partialorder %v6970_v18, 1e-06  ;;  %v5224_v40 = vsel %vm1493_vm7, 1.0, %v6567_v30  ;;  %vm2065_vm7 = vcmask 15360  }
  0xf6   : > { %v6982_v7 = vadd.f32 %v5611_v19, %v6922_v56  ;;  %v1439_v23 = vpop.f32.mrb[7].mxu0  ;;  %1738 = vrot.lane.b32.xlu1 %v6978_v21, %s6566_s22  ;;  %v6989_v25 = vsel %vm1492_vm8, %v6970_v18, 1.0  ;;  %v5223_v41 = vsel %vm1492_vm8, 1.0, %v6567_v30  ;;  %vm2098_vm8 = vcmask 31744  }
  0xf7   : > { %v6992_v26 = vadd.f32 %v1439_v23, %v6922_v56  ;;  %1736 = vrot.lane.b32.xlu0 %v6989_v25, %s6566_s22 }
  0xf8   : > { %vm1495_vm9 = vcmp.gt.f32.partialorder %v6982_v7, 1e-06 }
  0xf9   : > { %v5614_v15 = vpop.f32.mrb[8].mxu0  ;;  %v6998_v10 = vsel %vm1495_vm9, 1.0, %v6567_v30  ;;  %v7001_v31 = vsel %vm1495_vm9, %v6982_v7, 1.0  ;;  %vm1494_vm10 = vcmp.gt.f32.partialorder %v6992_v26, 1e-06 }
  0xfa   : > { %v7005_v33 = vadd.f32 %v5614_v15, %v6922_v56  ;;  %v1449_v34 = vpop.f32.mrb[9].mxu0  ;;  %1742 = vrot.lane.b32.xlu1 %v7001_v31, %s6566_s22  ;;  %v7010_v38 = vsel %vm1494_vm10, 1.0, %v6567_v30  ;;  %v7013_v39 = vsel %vm1494_vm10, %v6992_v26, 1.0 }
  0xfb   : > { %v7016_v24 = vadd.f32 %v1449_v34, %v6922_v56  ;;  %1740 = vrot.lane.b32.xlu0 %v7013_v39, %s6566_s22 }
  0xfc   : > { %vm1497_vm11 = vcmp.gt.f32.partialorder %v7005_v33, 1e-06 }
  0xfd   : > { %v5617_v17 = vpop.f32.mrb[10].mxu0  ;;  %v7024_v42 = vsel %vm1497_vm11, 1.0, %v6567_v30  ;;  %v7027_v46 = vsel %vm1497_vm11, %v7005_v33, 1.0  ;;  %vm1496_vm12 = vcmp.gt.f32.partialorder %v7016_v24, 1e-06  ;;  %vm2853_vm11 = vcmask 39936  }
  0xfe   : > { %v7031_v32 = vadd.f32 %v5617_v17, %v6922_v56  ;;  %v1459_v47 = vpop.f32.mrb[11].mxu0  ;;  %1746 = vrot.lane.b32.xlu1 %v7027_v46, %s6566_s22  ;;  %v7036_v49 = vsel %vm1496_vm12, 1.0, %v6567_v30  ;;  %v7039_v27 = vsel %vm1496_vm12, %v7016_v24, 1.0  ;;  %vm2886_vm12 = vcmask 195584  }
  0xff   : > { %v7042_v50 = vadd.f32 %v1459_v47, %v6922_v56  ;;  %1744 = vrot.lane.b32.xlu0 %v7039_v27, %s6566_s22 }
 0x100   : > { %vm1499_vm13 = vcmp.gt.f32.partialorder %v7031_v32, 1e-06 }
 0x101   : > { %v7050_v53 = vsel %vm1499_vm13, 1.0, %v6567_v30  ;;  %v7053_v35 = vsel %vm1499_vm13, %v7031_v32, 1.0  ;;  %vm1498_vm14 = vcmp.gt.f32.partialorder %v7042_v50, 1e-06  ;;  %v5620_v48 = vpop.f32.mrb[12].mxu0  ;;  %vm7969_vm13 = vmpackc.low %vm2886_vm12, %vm2886_vm12 }
 0x102   : > { %1750 = vrot.lane.b32.xlu1 %v7053_v35, %s6566_s22  ;;  %v7059_v55 = vsel %vm1498_vm14, 1.0, %v6567_v30  ;;  %v7062_v57 = vsel %vm1498_vm14, %v7042_v50, 1.0  ;;  %v7065_v58 = vadd.f32 %v5620_v48, %v6922_v56  ;;  %v1469_v60 = vpop.f32.mrb[13].mxu0  ;;  %vm3881_vm14 = vcmask 130048  }
 0x103   : > { %1748 = vrot.lane.b32.xlu0 %v7062_v57, %s6566_s22  ;;  %v7070_v59 = vadd.f32 %v1469_v60, %v6922_v56 }
 0x104   : > { %vm1501_vm15 = vcmp.gt.f32.partialorder %v7065_v58, 1e-06 }
 0x105   : > { %v7076_v11 = vsel %vm1501_vm15, 1.0, %v6567_v30  ;;  %vm1500_vm1 = vcmp.gt.f32.partialorder %v7070_v59, 1e-06  ;;  %v5623_v16 = vpop.f32.mrb[14].mxu0  ;;  %v7090_v34 = vsel %vm1501_vm15, %v7065_v58, 1.0  ;;  %vm4843_vm15 = vcmask 162816  }
 0x106   : > { %1650 = vrot.lane.b32.xlu1 %v6934_v4, %s9714_s23  ;;  %v7082_v19 = vsel %vm1500_vm1, 1.0, %v6567_v30  ;;  %v7085_v23 = vadd.f32 %v5623_v16, %v6922_v56  ;;  %v1479_v15 = vpop.f32.mrb[15].mxu0  ;;  %v7098_v4 = vsel %vm1500_vm1, %v7070_v59, 1.0  ;;  %vm4876_vm1 = vcmask 187392  }
 0x107   : > { %1648 = vrot.lane.b32.xlu0 %v6945_v63, %s9714_s23  ;;  %v7093_v17 = vadd.f32 %v1479_v15, %v6922_v56  ;;  %v5220_v15 = vsel %vm1489_vm3, 1.0, %v6567_v30  ;;  %v5219_v56 = vsel %vm1488_vm4, 1.0, %v6567_v30  ;;  %vm868_vm3 = vcmask 48128  }
 0x108   : > { %vm1503_vm2 = vcmp.gt.f32.partialorder %v7085_v23, 1e-06  ;;  %v5883_v47 = vpack.i.bf16 %v5220_v15, %v5219_v56  ;;  %vm2048_vm4 = vcmask 7168  }
 0x109   : > { %v7102_v48 = vsel %vm1503_vm2, 1.0, %v6567_v30  ;;  %vm1502_vm9 = vcmp.gt.f32.partialorder %v7093_v17, 1e-06  ;;  %v7119_v60 = vsel %vm1503_vm2, %v7085_v23, 1.0  ;;  %vm4909_vm2 = vcmask 211968  }
 0x10a   : > { %1754 = vrot.lane.b32.xlu1 %v7090_v34, %s6566_s22  ;;  %v7108_v63 = vsel %vm1502_vm9, 1.0, %v6567_v30  ;;  %v7122_v16 = vsel %vm1502_vm9, %v7093_v17, 1.0 }
 0x10b   : > { %1752 = vrot.lane.b32.xlu0 %v7098_v4, %s6566_s22 }
 0x10e   : > { %1654 = vrot.lane.b32.xlu1 %v6956_v12, %s9714_s23  ;;  %v5222_v12 = vsel %vm1491_vm5, 1.0, %v6567_v30  ;;  %vm1093_vm5 = vcmask 261120  }
 0x10f   : > { %1652 = vrot.lane.b32.xlu0 %v6967_v6, %s9714_s23  ;;  %v5221_v6 = vsel %vm1490_vm6, 1.0, %v6567_v30  ;;  %vm2147_vm6 = vcmask 64512  }
 0x110   : > { %v5888_v62 = vpack.i.bf16 %v5222_v12, %v5221_v6  ;;  %vm7615_vm10 = vmpackc.low %vm2147_vm6, %vm2147_vm6 }
 0x112   : > { %1758 = vrot.lane.b32.xlu1 %v7119_v60, %s6566_s22 }
 0x113   : > { %1756 = vrot.lane.b32.xlu0 %v7122_v16, %s6566_s22 }
 0x116   : > { %1656 = vrot.lane.b32.xlu1 %v6989_v25, %s9714_s23  ;;  %v5893_v25 = vpack.i.bf16 %v5224_v40, %v5223_v41 }
 0x117   : > { %5884 = vrot.lane.b32.xlu0 %v5883_v47, %s9714_s23 }
 0x11a   : > { %5889 = vrot.lane.b32.xlu1 %v5888_v62, %s9714_s23 }
 0x11b   : > { %1658 = vrot.lane.b32.xlu0 %v6978_v21, %s9714_s23 }
 0x11e   : > { %1662 = vrot.lane.b32.xlu1 %v7001_v31, %s9714_s23 }
 0x11f   : > { %1660 = vrot.lane.b32.xlu0 %v7013_v39, %s9714_s23 }
 0x123   : > { %5894 = vrot.lane.b32.xlu0 %v5893_v25, %s9714_s23 }
 0x127   : > { %v797_v62 = vpop.permute.xlu0 %796 }
 0x128   : > { %v844_v21 = vsel %vm683_vm0, %v6683_v1, %v797_v62 }
 0x129   : > { %5542 = vmatprep.mubr.msk.f32.mxu1 %vm868_vm3, %v844_v21 }
 0x12b   : > { %v799_v47 = vpop.permute.xlu1 %798 }
 0x12c   : > { %v845_v30 = vsel %vm683_vm0, %v6686_v2, %v799_v47 }
 0x12d   : > { %5543 = vmatmul.mubr.msk.f32.vlgmr.msra.gmra.mrb[0].mxu1 %vm868_vm3, %v845_v30 }
 0x12f   : > { %v801_v31 = vpop.permute.xlu1 %800  ;;  %v805_v56 = vpop.permute.xlu0 %804 }
 0x130   : > { %v846_v39 = vsel %vm683_vm0, %v6689_v3, %v801_v31  ;;  %v848_v40 = vsel %vm683_vm0, %v6714_v9, %v805_v56 }
 0x131   : > { %5545 = vmatprep.mubr.msk.f32.mxu1 %vm868_vm3, %v846_v39 }
 0x133   : > { %v803_v41 = vpop.permute.xlu1 %802  ;;  %v809_v1 = vpop.permute.xlu0 %808 }
 0x134   : > { %v847_v15 = vsel %vm683_vm0, %v6701_v5, %v803_v41  ;;  %v850_v12 = vsel %vm683_vm0, %v6750_v20, %v809_v1 }
 0x135   : > { %5546 = vmatmul.mubr.msk.f32.gmra.mrb[2].mxu1 %vm868_vm3, %v847_v15 }
 0x136   : > { %5548 = vmatprep.mubr.msk.f32.mxu1 %vm868_vm3, %v848_v40 }
 0x137   : > { %v807_v2 = vpop.permute.xlu1 %806  ;;  %v813_v6 = vpop.permute.xlu0 %812 }
 0x138   : > { %v849_v3 = vsel %vm683_vm0, %v6727_v13, %v807_v2  ;;  %v852_v5 = vsel %vm683_vm0, %v6774_v28, %v813_v6 }
 0x139   : > { %5549 = vmatmul.mubr.msk.f32.gmra.mrb[4].mxu1 %vm868_vm3, %v849_v3 }
 0x13a   : > { %5551 = vmatprep.mubr.msk.f32.mxu1 %vm868_vm3, %v850_v12 }
 0x13b   : > { %v811_v9 = vpop.permute.xlu1 %810  ;;  %v817_v25 = vpop.permute.xlu0 %816 }
 0x13c   : > { %v851_v62 = vsel %vm683_vm0, %v6754_v22, %v811_v9  ;;  %v854_v13 = vsel %vm683_vm0, %v6798_v36, %v817_v25 }
 0x13d   : > { %5552 = vmatmul.mubr.msk.f32.gmra.mrb[6].mxu1 %vm868_vm3, %v851_v62 }
 0x13e   : > { %5554 = vmatprep.mubr.msk.f32.mxu1 %vm868_vm3, %v852_v5 }
 0x13f   : > { %v815_v20 = vpop.permute.xlu1 %814  ;;  %v821_v21 = vpop.permute.xlu0 %820 }
 0x140   : > { %v853_v47 = vsel %vm683_vm0, %v6777_v29, %v815_v20  ;;  %v856_v22 = vsel %vm683_vm0, %v6822_v44, %v821_v21 }
 0x141   : > { %5555 = vmatmul.mubr.msk.f32.gmra.mrb[8].mxu1 %vm868_vm3, %v853_v47 }
 0x142   : > { %5557 = vmatprep.mubr.msk.f32.mxu1 %vm868_vm3, %v854_v13 }
 0x143   : > { %v819_v28 = vpop.permute.xlu1 %818  ;;  %v825_v31 = vpop.permute.xlu0 %824 }
 0x144   : > { %v855_v30 = vsel %vm683_vm0, %v6801_v37, %v819_v28  ;;  %v858_v29 = vsel %vm683_vm0, %v6846_v52, %v825_v31 }
 0x145   : > { %5558 = vmatmul.mubr.msk.f32.gmra.mrb[10].mxu1 %vm868_vm3, %v855_v30 }
 0x146   : > { %5560 = vmatprep.mubr.msk.f32.mxu1 %vm868_vm3, %v856_v22 }
 0x147   : > { %v823_v36 = vpop.permute.xlu1 %822 }
 0x148   : > { %v857_v56 = vsel %vm683_vm0, %v6825_v45, %v823_v36 }
 0x149   : > { %5561 = vmatmul.mubr.msk.f32.gmra.mrb[12].mxu1 %vm868_vm3, %v857_v56 }
 0x14a   : > { %5563 = vmatprep.mubr.msk.f32.mxu1 %vm868_vm3, %v858_v29 }
 0x14b   : > { %v827_v44 = vpop.permute.xlu1 %826 }
 0x14c   : > { %v859_v37 = vsel %vm683_vm0, %v6850_v54, %v827_v44 }
 0x14d   : > { %5564 = vmatmul.mubr.msk.f32.gmra.mrb[14].mxu1 %vm868_vm3, %v859_v37  ;;  %v1082_v37 = vld [vmem:[%s9705_s9] sm:$0xff] }
 0x160   : > { %v1731_v39 = vpop.permute.xlu1 %1730 }
 0x161   : > { %6157 = vrcp.f32 %v1731_v39  ;;  %v1729_v41 = vpop.permute.xlu0 %1728  ;;  %v1083_v39 = vld [vmem:[%s9705_s9 + $0x8] sm:$0xff] }
 0x162   : > { %6159 = vrcp.f32 %v1729_v41 }
 0x164   : > { %v1735_v40 = vpop.permute.xlu1 %1734 }
 0x165   : > { %6161 = vrcp.f32 %v1735_v40  ;;  %v1733_v52 = vpop.permute.xlu0 %1732  ;;  %v5804_v40 = vpack.c.bf16 %v1083_v39, %v1082_v37 }
 0x166   : > { %6163 = vrcp.f32 %v1733_v52  ;;  %v9755_v52 = vpack.i.bf16 %v6998_v10, %v7010_v38 }
 0x167   : > { %5805 = vmatprep.subr.bf16.mxu1 %v5804_v40 }
 0x168   : > { %v1739_v1 = vpop.permute.xlu1 %1738  ;;  %5807 = vmatpush3.bf16.msra.mxu1 %v5804_v40 }
 0x169   : > { %v1737_v45 = vpop.permute.xlu0 %1736  ;;  %6165 = vrcp.f32 %v1739_v1 }
 0x16a   : > { %6167 = vrcp.f32 %v1737_v45 }
 0x16b   : > { %v6158_v15 = vpop.eup %6157 }
 0x16c   : > { %v6160_v2 = vpop.eup %6159  ;;  %v1743_v12 = vpop.permute.xlu1 %1742  ;;  %v7206_v6 = vmul.f32 %v6158_v15, %v6925_v51 }
 0x16d   : > { %v1741_v54 = vpop.permute.xlu0 %1740  ;;  %v7209_v3 = vmul.f32 %v6160_v2, %v6928_v61 }
 0x16e   : > { %v1825_v9 = vmul.f32 %v7206_v6, %v7206_v6  ;;  %6169 = vrcp.f32 %v1741_v54 }
 0x16f   : > { %v6162_v5 = vpop.eup %6161  ;;  %v1824_v25 = vmul.f32 %v7209_v3, %v7209_v3  ;;  %6171 = vrcp.f32 %v1743_v12 }
 0x170   : > { %v6164_v62 = vpop.eup %6163  ;;  %v1747_v20 = vpop.permute.xlu1 %1746  ;;  %1858 = vrot.lane.b32.xlu0 %v1825_v9, %s6566_s22  ;;  %v7221_v47 = vmul.f32 %v6162_v5, %v6938_v8  ;;  %v1084_v5 = vld [vmem:[%s9705_s9 + $0x10] sm:$0xff] }
 0x171   : > { %1856 = vrot.lane.b32.xlu1 %v1824_v25, %s6566_s22  ;;  %v1745_v13 = vpop.permute.xlu0 %1744  ;;  %v7218_v21 = vmul.f32 %v6164_v62, %v6948_v0  ;;  %v1085_v25 = vld [vmem:[%s9705_s9 + $0x18] sm:$0xff] }
 0x172   : > { %v1827_v36 = vmul.f32 %v7221_v47, %v7221_v47 }
 0x173   : > { %v1826_v30 = vmul.f32 %v7218_v21, %v7218_v21  ;;  %v6166_v31 = vpop.eup %6165 }
 0x174   : > { %v1751_v28 = vpop.permute.xlu1 %1750  ;;  %1666 = vrot.lane.b32.xlu0 %v7027_v46, %s9714_s23  ;;  %v6168_v29 = vpop.eup %6167 }
 0x175   : > { %1664 = vrot.lane.b32.xlu1 %v7039_v27, %s9714_s23  ;;  %v1749_v22 = vpop.permute.xlu0 %1748  ;;  %v7234_v27 = vmul.f32 %v6166_v31, %v6960_v14  ;;  %v7237_v44 = vmul.f32 %v6168_v29, %v6970_v18  ;;  %v5808_v31 = vpack.c.bf16 %v1085_v25, %v1084_v5 }
 0x177   : > { %v1829_v45 = vmul.f32 %v7234_v27, %v7234_v27  ;;  %v1828_v2 = vmul.f32 %v7237_v44, %v7237_v44  ;;  %5809 = vmatprep.subr.bf16.mxu1 %v5808_v31 }
 0x178   : > { %v1651_v56 = vpop.permute.xlu1 %1650  ;;  %1860 = vrot.lane.b32.xlu0 %v1826_v30, %s6566_s22  ;;  %v6170_v15 = vpop.eup %6169  ;;  %5811 = vmatpush3.bf16.msra.mxu1 %v5808_v31 }
 0x179   : > { %6173 = vrcp.f32 %v1651_v56  ;;  %1862 = vrot.lane.b32.xlu1 %v1827_v36, %s6566_s22  ;;  %v1649_v46 = vpop.permute.xlu0 %1648  ;;  %v6172_v12 = vpop.eup %6171  ;;  %v7258_v38 = vmul.f32 %v6170_v15, %v6992_v26 }
 0x17a   : > { %6175 = vrcp.f32 %v1649_v46  ;;  %v7261_v9 = vmul.f32 %v6172_v12, %v6982_v7 }
 0x17b   : > { %6177 = vrcp.f32 %v1747_v20  ;;  %v1830_v56 = vmul.f32 %v7258_v38, %v7258_v38 }
 0x17c   : > { %v1755_v41 = vpop.permute.xlu1 %1754  ;;  %1668 = vrot.lane.b32.xlu0 %v7062_v57, %s9714_s23  ;;  %6179 = vrcp.f32 %v1745_v13  ;;  %v9756_v13 = vpack.i.bf16 %v7024_v42, %v7036_v49 }
 0x17d   : > { %5899 = vrot.lane.b32.xlu1 %v9755_v52, %s9714_s23  ;;  %v1753_v1 = vpop.permute.xlu0 %1752 }
 0x180   : > { %v1655_v57 = vpop.permute.xlu1 %1654  ;;  %1866 = vrot.lane.b32.xlu0 %v1829_v45, %s6566_s22 }
 0x181   : > { %6181 = vrcp.f32 %v1655_v57  ;;  %1864 = vrot.lane.b32.xlu1 %v1828_v2, %s6566_s22  ;;  %v1653_v10 = vpop.permute.xlu0 %1652 }
 0x182   : > { %6183 = vrcp.f32 %v1653_v10 }
 0x183   : > { %v6174_v54 = vpop.eup %6173  ;;  %6185 = vrcp.f32 %v1749_v22  ;;  %v1831_v22 = vmul.f32 %v7261_v9, %v7261_v9 }
 0x184   : > { %v6176_v62 = vpop.eup %6175  ;;  %v1759_v20 = vpop.permute.xlu1 %1758  ;;  %5904 = vrot.lane.b32.xlu0 %v9756_v13, %s9714_s23  ;;  %v7274_v30 = vmul.f32 %v6174_v54, %v6925_v51  ;;  %6187 = vrcp.f32 %v1751_v28 }
 0x185   : > { %1670 = vrot.lane.b32.xlu1 %v7053_v35, %s9714_s23  ;;  %v1757_v36 = vpop.permute.xlu0 %1756  ;;  %v7279_v29 = vmul.f32 %v6176_v62, %v6928_v61  ;;  %v6178_v49 = vpop.eup %6177 }
 0x186   : > { %v7286_v42 = vsel %vm2048_vm4, %v7274_v30, %v7206_v6  ;;  %v6180_v28 = vpop.eup %6179  ;;  %v7300_v37 = vmul.f32 %v6178_v49, %v7005_v33 }
 0x187   : > { %v7293_v35 = vsel %vm2048_vm4, %v7279_v29, %v7209_v3  ;;  %v7303_v40 = vmul.f32 %v6180_v28, %v7016_v24 }
 0x188   : > { %v1657_v46 = vpop.permute.xlu1 %1656  ;;  %1868 = vrot.lane.b32.xlu0 %v1830_v56, %s6566_s22 }
 0x189   : > { %6189 = vrcp.f32 %v1657_v46  ;;  %1870 = vrot.lane.b32.xlu1 %v1831_v22, %s6566_s22  ;;  %v7297_v6 = vpop.permute.xlu0 %5884  ;;  %v1832_v57 = vmul.f32 %v7303_v40, %v7303_v40 }
 0x18a   : > { %6191 = vrcp.f32 %v1755_v41  ;;  %v1833_v41 = vmul.f32 %v7300_v37, %v7300_v37 }
 0x18b   : > { %v6182_v39 = vpop.eup %6181  ;;  %6193 = vrcp.f32 %v1753_v1 }
 0x18c   : > { %v6184_v52 = vpop.eup %6183  ;;  %v7305_v3 = vpop.permute.xlu1 %5889  ;;  %1674 = vrot.lane.b32.xlu0 %v7090_v34, %s9714_s23  ;;  %v7310_v45 = vmul.f32 %v6182_v39, %v6938_v8  ;;  %v9758_v39 = vpack.i.bf16 %v7076_v11, %v7082_v19 }
 0x18d   : > { %1672 = vrot.lane.b32.xlu1 %v7098_v4, %s9714_s23  ;;  %v1659_v15 = vpop.permute.xlu0 %1658  ;;  %v7315_v2 = vmul.f32 %v6184_v52, %v6948_v0  ;;  %v6186_v12 = vpop.eup %6185 }
 0x18e   : > { %6195 = vrcp.f32 %v1659_v15  ;;  %v6188_v1 = vpop.eup %6187  ;;  %v7330_v10 = vsel %vm2048_vm4, %v7310_v45, %v7221_v47  ;;  %v7334_v5 = vmul.f32 %v6186_v12, %v7042_v50  ;;  %v9757_v47 = vpack.i.bf16 %v7050_v53, %v7059_v55 }
 0x18f   : > { %v7324_v34 = vsel %vm2048_vm4, %v7315_v2, %v7218_v21  ;;  %6197 = vrcp.f32 %v1757_v36  ;;  %v7337_v25 = vmul.f32 %v6188_v1, %v7031_v32 }
 0x190   : > { %v1663_v4 = vpop.permute.xlu1 %1662  ;;  %1874 = vrot.lane.b32.xlu0 %v1833_v41, %s6566_s22  ;;  %v1834_v31 = vmul.f32 %v7334_v5, %v7334_v5 }
 0x191   : > { %6199 = vrcp.f32 %v1663_v4  ;;  %1872 = vrot.lane.b32.xlu1 %v1832_v57, %s6566_s22  ;;  %v1661_v54 = vpop.permute.xlu0 %1660  ;;  %v5887_v4 = vunpack.i.h.bf16 %v7297_v6 }
 0x192   : > { %6201 = vrcp.f32 %v1661_v54  ;;  %v627_v54 = vld [vmem:[%s7421_s27 + $0x8] sm:$0xff] }
 0x193   : > { %v6190_v21 = vpop.eup %6189  ;;  %6203 = vrcp.f32 %v1759_v20 }
 0x194   : > { %1676 = vrot.lane.b32.xlu0 %v7122_v16, %s9714_s23  ;;  %v7342_v62 = vmul.f32 %v6190_v21, %v6970_v18  ;;  %v6192_v13 = vpop.eup %6191  ;;  %v1835_v16 = vmul.f32 %v7337_v25, %v7337_v25  ;;  %v1601_v21 = vmul.f32 %v5887_v4, %v627_v54 }
 0x195   : > { %5909 = vrot.lane.b32.xlu1 %v9757_v47, %s9714_s23  ;;  %v6194_v56 = vpop.eup %6193  ;;  %v7363_v20 = vmul.f32 %v6192_v13, %v7065_v58  ;;  %v5895_v13 = vpop.permute.xlu0 %5894 }
 0x196   : > { %v7353_v36 = vsel %vm2048_vm4, %v7342_v62, %v7237_v44  ;;  %v7366_v44 = vmul.f32 %v6194_v56, %v7070_v59  ;;  %v5891_v56 = vunpack.i.l.bf16 %v7305_v3  ;;  %v5897_v43 = vunpack.i.h.bf16 %v5895_v13 }
 0x198   : > { %v6196_v49 = vpop.eup %6195  ;;  %1876 = vrot.lane.b32.xlu0 %v1834_v31, %s6566_s22  ;;  %v1836_v19 = vmul.f32 %v7366_v44, %v7366_v44  ;;  %v1937_v31 = vsub.f32 1.0, %v1601_v21 }
 0x199   : > { %1878 = vrot.lane.b32.xlu1 %v1835_v16, %s6566_s22  ;;  %v7360_v53 = vmul.f32 %v6196_v49, %v6960_v14  ;;  %v6198_v55 = vpop.eup %6197  ;;  %v1809_v16 = vmul.f32 %v7274_v30, %v7274_v30 }
 0x19a   : > { %v7388_v41 = vmul.f32 %v6198_v55, %v7093_v17  ;;  %v628_v55 = vld [vmem:[%s7421_s27 + $0x10] sm:$0xff] }
 0x19b   : > { %v6200_v22 = vpop.eup %6199  ;;  %v7371_v28 = vsel %vm2048_vm4, %v7360_v53, %v7234_v27  ;;  %v1837_v27 = vmul.f32 %v7363_v20, %v7363_v20 }
 0x19c   : > { %v6202_v46 = vpop.eup %6201  ;;  %5914 = vrot.lane.b32.xlu0 %v9758_v39, %s9714_s23  ;;  %v7378_v52 = vmul.f32 %v6200_v22, %v6982_v7  ;;  %v1838_v57 = vmul.f32 %v7388_v41, %v7388_v41  ;;  %v5892_v22 = vunpack.i.h.bf16 %v7305_v3  ;;  %v1808_v39 = vmul.f32 %v7279_v29, %v7279_v29 }
 0x19d   : > { %1678 = vrot.lane.b32.xlu1 %v7119_v60, %s9714_s23  ;;  %v7383_v15 = vmul.f32 %v6202_v46, %v6992_v26  ;;  %v6204_v12 = vpop.eup %6203  ;;  %v1810_v29 = vmul.f32 %v7315_v2, %v7315_v2 }
 0x19e   : > { %v7393_v11 = vsel %vm2048_vm4, %v7378_v52, %v7261_v9  ;;  %v7407_v1 = vmul.f32 %v6204_v12, %v7085_v23  ;;  %v9760_v9 = vpack.i.bf16 %v7102_v48, %v7108_v63  ;;  %v5886_v48 = vunpack.i.l.bf16 %v7297_v6  ;;  %v626_v63 = vld [vmem:[%s7421_s27] sm:$0xff] }
 0x19f   : > { %v7400_v60 = vsel %vm2048_vm4, %v7383_v15, %v7258_v38 }
 0x1a0   : > { %1882 = vrot.lane.b32.xlu0 %v1837_v27, %s6566_s22  ;;  %9759 = vst [vmem:[#allocation3_spill] sm:$0xff] %v7407_v1  ;;  %v1839_v38 = vmul.f32 %v7407_v1, %v7407_v1  ;;  %v1600_v47 = vmul.f32 %v5886_v48, %v626_v63  ;;  %v629_v27 = vld [vmem:[%s7421_s27 + $0x18] sm:$0xff]  ;;  %v5896_v1 = vunpack.i.l.bf16 %v5895_v13 }
 0x1a1   : > { %1880 = vrot.lane.b32.xlu1 %v1836_v19, %s6566_s22  ;;  %v1603_v4 = vmul.f32 %v5892_v22, %v629_v27 }
 0x1a2   : > { %v1936_v49 = vsub.f32 1.0, %v1600_v47 }
 0x1a4   : > { %1884 = vrot.lane.b32.xlu0 %v1838_v57, %s6566_s22  ;;  %v1602_v57 = vmul.f32 %v5891_v56, %v628_v55  ;;  %v1952_v30 = vmul.f32 1e+09, %v1936_v49  ;;  %v630_v55 = vld [vmem:[%s7421_s27 + $0x20] sm:$0xff] }
 0x1a5   : > { %5919 = vrot.lane.b32.xlu1 %v9760_v9, %s9714_s23 }
 0x1a6   : > { %v1938_v47 = vsub.f32 1.0, %v1602_v57  ;;  %v1604_v57 = vmul.f32 %v5896_v1, %v630_v55  ;;  %v1812_v1 = vmul.f32 %v7342_v62, %v7342_v62 }
 0x1a9   : > { %1886 = vrot.lane.b32.xlu1 %v1839_v38, %s6566_s22  ;;  %v1953_v38 = vmul.f32 1e+09, %v1937_v31  ;;  %v1811_v31 = vmul.f32 %v7310_v45, %v7310_v45  ;;  %s6571_s22 = smov 8  }
 0x1e2   : > { %v1859_v46 = vpop.permute.xlu0 %1858 }
 0x1e3   : > { %v1905_v6 = vadd.f32 %v1859_v46, %v1809_v16  ;;  %v1857_v19 = vpop.permute.xlu1 %1856  ;;  %v1939_v16 = vsub.f32 1.0, %v1603_v4  ;;  %v631_v46 = vld [vmem:[%s7421_s27 + $0x28] sm:$0xff] }
 0x1e4   : > { %v1904_v12 = vadd.f32 %v1857_v19, %v1808_v39  ;;  %v1954_v19 = vmul.f32 1e+09, %v1938_v47 }
 0x1e5   : > { %v1921_v9 = vmul.f32 -0.22222222, %v1905_v6  ;;  %v1605_v6 = vmul.f32 %v5897_v43, %v631_v46  ;;  %v1955_v2 = vmul.f32 1e+09, %v1939_v16  ;;  %v632_v43 = vld [vmem:[%s7421_s27 + $0x30] sm:$0xff]  ;;  %v633_v46 = vld [vmem:[%s7421_s27 + $0x38] sm:$0xff] }
 0x1e6   : > { %v1920_v54 = vmul.f32 -0.22222222, %v1904_v12  ;;  %v1667_v48 = vpop.permute.xlu0 %1666 }
 0x1e7   : > { %v1969_v63 = vsub.f32 %v1921_v9, %v1953_v38  ;;  %v1665_v21 = vpop.permute.xlu1 %1664  ;;  %6205 = vrcp.f32 %v1667_v48 }
 0x1e8   : > { %v1968_v3 = vsub.f32 %v1920_v54, %v1952_v30  ;;  %v1941_v54 = vsub.f32 1.0, %v1605_v6  ;;  %6207 = vrcp.f32 %v1665_v21 }
 0x1ea   : > { %v1861_v39 = vpop.permute.xlu0 %1860  ;;  %v5923_v56 = vpack.i.bf16 %v1969_v63, %v1968_v3  ;;  %v1813_v63 = vmul.f32 %v7360_v53, %v7360_v53  ;;  %v1940_v3 = vsub.f32 1.0, %v1604_v57  ;;  %v1957_v55 = vmul.f32 1e+09, %v1941_v54 }
 0x1eb   : > { %v1906_v22 = vadd.f32 %v1861_v39, %v1810_v29  ;;  %v1863_v49 = vpop.permute.xlu1 %1862 }
 0x1ec   : > { %v1907_v27 = vadd.f32 %v1863_v49, %v1811_v31  ;;  %5924 = vrot.lane.b32.xlu0 %v5923_v56, %s6565_s21  ;;  %v1956_v49 = vmul.f32 1e+09, %v1940_v3  ;;  %v634_v3 = vld [vmem:[%s7421_s27 + $0x40] sm:$0xff] }
 0x1ed   : > { %v1922_v12 = vmul.f32 -0.22222222, %v1906_v22 }
 0x1ee   : > { %v1923_v9 = vmul.f32 -0.22222222, %v1907_v27  ;;  %v1669_v13 = vpop.permute.xlu0 %1668 }
 0x1ef   : > { %v1970_v38 = vsub.f32 %v1922_v12, %v1954_v19  ;;  %v5900_v4 = vpop.permute.xlu1 %5899  ;;  %6209 = vrcp.f32 %v1669_v13 }
 0x1f0   : > { %v1971_v45 = vsub.f32 %v1923_v9, %v1955_v2  ;;  %v5901_v30 = vunpack.i.l.bf16 %v5900_v4  ;;  %v5902_v29 = vunpack.i.h.bf16 %v5900_v4  ;;  %v1814_v2 = vmul.f32 %v7383_v15, %v7383_v15  ;;  %v635_v4 = vld [vmem:[%s7421_s27 + $0x48] sm:$0xff]  ;;  %v7459_v15 = vld [vmem:[%s9704_s8] ss:$0 sm:$0xff] }
 0x1f1   : > { %v6206_v9 = vpop.eup %6205 }
 0x1f2   : > { %v1867_v47 = vpop.permute.xlu0 %1866  ;;  %v5928_v16 = vpack.i.bf16 %v1971_v45, %v1970_v38  ;;  %v1606_v48 = vmul.f32 %v5901_v30, %v632_v43  ;;  %v1607_v22 = vmul.f32 %v5902_v29, %v633_v46  ;;  %v1815_v30 = vmul.f32 %v7378_v52, %v7378_v52  ;;  %v6208_v13 = vpop.eup %6207 }
 0x1f3   : > { %v1909_v39 = vadd.f32 %v1867_v47, %v1813_v63  ;;  %v1865_v31 = vpop.permute.xlu1 %1864 }
 0x1f4   : > { %v1908_v56 = vadd.f32 %v1865_v31, %v1812_v1  ;;  %5929 = vrot.lane.b32.xlu1 %v5928_v16, %s6565_s21  ;;  %v1942_v12 = vsub.f32 1.0, %v1606_v48  ;;  %v1943_v38 = vsub.f32 1.0, %v1607_v22 }
 0x1f5   : > { %v1925_v21 = vmul.f32 -0.22222222, %v1909_v39  ;;  %v7462_v39 = vmul.f32 %v6206_v9, %v7005_v33 }
 0x1f6   : > { %v1924_v53 = vmul.f32 -0.22222222, %v1908_v56  ;;  %v5905_v27 = vpop.permute.xlu0 %5904  ;;  %v1958_v16 = vmul.f32 1e+09, %v1942_v12  ;;  %v1959_v31 = vmul.f32 1e+09, %v1943_v38 }
 0x1f7   : > { %v1973_v6 = vsub.f32 %v1925_v21, %v1957_v55  ;;  %v1671_v19 = vpop.permute.xlu1 %1670  ;;  %v5907_v57 = vunpack.i.h.bf16 %v5905_v27  ;;  %v5906_v45 = vunpack.i.l.bf16 %v5905_v27  ;;  %v7465_v21 = vmul.f32 %v6208_v13, %v7016_v24 }
 0x1f8   : > { %v1972_v62 = vsub.f32 %v1924_v53, %v1956_v49  ;;  %6211 = vrcp.f32 %v1671_v19 }
 0x1f9   : > { %v1609_v1 = vmul.f32 %v5907_v57, %v635_v4  ;;  %v1608_v52 = vmul.f32 %v5906_v45, %v634_v3  ;;  %v6210_v19 = vpop.eup %6209  ;;  %v1817_v57 = vmul.f32 %v7462_v39, %v7462_v39  ;;  %v1816_v45 = vmul.f32 %v7465_v21, %v7465_v21 }
 0x1fa   : > { %v1869_v54 = vpop.permute.xlu0 %1868  ;;  %v5933_v63 = vpack.i.bf16 %v1973_v6, %v1972_v62 }
 0x1fb   : > { %v1910_v43 = vadd.f32 %v1869_v54, %v1814_v2  ;;  %v1871_v29 = vpop.permute.xlu1 %1870  ;;  %v1945_v62 = vsub.f32 1.0, %v1609_v1  ;;  %v1944_v9 = vsub.f32 1.0, %v1608_v52 }
 0x1fc   : > { %v1911_v47 = vadd.f32 %v1871_v29, %v1815_v30  ;;  %5934 = vrot.lane.b32.xlu0 %v5933_v63, %s6565_s21 }
 0x1fd   : > { %v1926_v46 = vmul.f32 -0.22222222, %v1910_v43  ;;  %v1961_v29 = vmul.f32 1e+09, %v1945_v62 }
 0x1fe   : > { %v1927_v56 = vmul.f32 -0.22222222, %v1911_v47  ;;  %v1675_v48 = vpop.permute.xlu0 %1674  ;;  %v7476_v47 = vmul.f32 %v6210_v19, %v7042_v50 }
 0x1ff   : > { %v1974_v55 = vsub.f32 %v1926_v46, %v1958_v16  ;;  %v1673_v22 = vpop.permute.xlu1 %1672  ;;  %6213 = vrcp.f32 %v1675_v48  ;;  %v1960_v46 = vmul.f32 1e+09, %v1944_v9  ;;  %v637_v48 = vld [vmem:[%s7421_s27 + $0x58] sm:$0xff] }
 0x200   : > { %v5544_v53 = vpop.f32.mrb[0].mxu1  ;;  %v1975_v49 = vsub.f32 %v1927_v56, %v1959_v31  ;;  %6215 = vrcp.f32 %v1673_v22  ;;  %v636_v56 = vld [vmem:[%s7421_s27 + $0x50] sm:$0xff] }
 0x201   : > { %v993_v27 = vadd.f32 %v5544_v53, %v7459_v15  ;;  %v987_v6 = vpop.f32.mrb[1].mxu1 }
 0x202   : > { %v988_v12 = vadd.f32 %v7459_v15, %v987_v6  ;;  %v6212_v2 = vpop.eup %6211  ;;  %v1875_v4 = vpop.permute.xlu0 %1874  ;;  %v5938_v54 = vpack.i.bf16 %v1975_v49, %v1974_v55 }
 0x203   : > { %v1067_v38 = vmax.f32 %v993_v27, 0.0  ;;  %v1913_v63 = vadd.f32 %v1875_v4, %v1817_v57  ;;  %v1873_v13 = vpop.permute.xlu1 %1872  ;;  %v7479_v1 = vmul.f32 %v6212_v2, %v7031_v32 }
 0x204   : > { %v1066_v30 = vmax.f32 %v988_v12, 0.0  ;;  %v1912_v3 = vadd.f32 %v1873_v13, %v1816_v45  ;;  %5939 = vrot.lane.b32.xlu1 %v5938_v54, %s6565_s21  ;;  %v1818_v12 = vmul.f32 %v7476_v47, %v7476_v47 }
 0x205   : > { %v1929_v43 = vmul.f32 -0.22222222, %v1913_v63  ;;  %v1819_v57 = vmul.f32 %v7479_v1, %v7479_v1 }
 0x206   : > { %5574 = vmatprep.mubr.msk.f32.mxu1 %vm1093_vm5, %v1066_v30  ;;  %v1928_v16 = vmul.f32 -0.22222222, %v1912_v3  ;;  %v1677_v52 = vpop.permute.xlu0 %1676 }
 0x207   : > { %5575 = vmatmul.mubr.msk.f32.vlgmr.msra.gmra.mrb[16].mxu1 %vm1093_vm5, %v1067_v38  ;;  %v1977_v31 = vsub.f32 %v1929_v43, %v1961_v29  ;;  %6217 = vrcp.f32 %v1677_v52  ;;  %v5910_v55 = vpop.permute.xlu1 %5909 }
 0x208   : > { %v5547_v22 = vpop.f32.mrb[2].mxu1  ;;  %v1976_v53 = vsub.f32 %v1928_v16, %v1960_v46  ;;  %v5912_v49 = vunpack.i.h.bf16 %v5910_v55  ;;  %v5911_v27 = vunpack.i.l.bf16 %v5910_v55 }
 0x209   : > { %v1003_v6 = vadd.f32 %v5547_v22, %v7459_v15  ;;  %v997_v19 = vpop.f32.mrb[3].mxu1  ;;  %v6214_v2 = vpop.eup %6213  ;;  %v638_v22 = vld [vmem:[%s7421_s27 + $0x60] sm:$0xff] }
 0x20a   : > { %v998_v62 = vadd.f32 %v7459_v15, %v997_v19  ;;  %v1611_v9 = vmul.f32 %v5912_v49, %v637_v48  ;;  %v1610_v38 = vmul.f32 %v5911_v27, %v636_v56  ;;  %v1877_v45 = vpop.permute.xlu0 %1876  ;;  %v5943_v54 = vpack.i.bf16 %v1977_v31, %v1976_v53  ;;  %v6216_v30 = vpop.eup %6215  ;;  %v639_v49 = vld [vmem:[%s7421_s27 + $0x68] sm:$0xff] }
 0x20b   : > { %v1069_v4 = vmax.f32 %v1003_v6, 0.0  ;;  %v1914_v13 = vadd.f32 %v1877_v45, %v1818_v12  ;;  %v1879_v3 = vpop.permute.xlu1 %1878  ;;  %v7497_v31 = vmul.f32 %v6214_v2, %v7065_v58 }
 0x20c   : > { %v1068_v63 = vmax.f32 %v998_v62, 0.0  ;;  %v5550_v43 = vpop.f32.mrb[4].mxu1  ;;  %v1947_v29 = vsub.f32 1.0, %v1611_v9  ;;  %v1946_v16 = vsub.f32 1.0, %v1610_v38  ;;  %v1915_v46 = vadd.f32 %v1879_v3, %v1819_v57  ;;  %5944 = vrot.lane.b32.xlu0 %v5943_v54, %s6565_s21 }
 0x20d   : > { %v1013_v52 = vadd.f32 %v5550_v43, %v7459_v15  ;;  %v1007_v55 = vpop.f32.mrb[5].mxu1  ;;  %v1930_v48 = vmul.f32 -0.22222222, %v1914_v13  ;;  %v7501_v62 = vmul.f32 %v6216_v30, %v7070_v59  ;;  %v1821_v30 = vmul.f32 %v7497_v31, %v7497_v31 }
 0x20e   : > { %v1008_v56 = vadd.f32 %v7459_v15, %v1007_v55  ;;  %5577 = vmatprep.mubr.msk.f32.mxu1 %vm1093_vm5, %v1068_v63  ;;  %v1962_v53 = vmul.f32 1e+09, %v1946_v16  ;;  %v1931_v27 = vmul.f32 -0.22222222, %v1915_v46  ;;  %v1963_v6 = vmul.f32 1e+09, %v1947_v29  ;;  %v5915_v19 = vpop.permute.xlu0 %5914 }
 0x20f   : > { %5578 = vmatmul.mubr.msk.f32.gmra.mrb[18].mxu1 %vm1093_vm5, %v1069_v4  ;;  %v1071_v12 = vmax.f32 %v1013_v52, 0.0  ;;  %v5917_v9 = vunpack.i.h.bf16 %v5915_v19  ;;  %v5916_v38 = vunpack.i.l.bf16 %v5915_v19  ;;  %v1679_v45 = vpop.permute.xlu1 %1678  ;;  %v1820_v55 = vmul.f32 %v7501_v62, %v7501_v62 }
 0x210   : > { %v1070_v57 = vmax.f32 %v1008_v56, 0.0  ;;  %v5553_v54 = vpop.f32.mrb[6].mxu1  ;;  %v1978_v13 = vsub.f32 %v1930_v48, %v1962_v53  ;;  %v1979_v63 = vsub.f32 %v1931_v27, %v1963_v6  ;;  %6219 = vrcp.f32 %v1679_v45 }
 0x211   : > { %v1023_v2 = vadd.f32 %v5553_v54, %v7459_v15  ;;  %v1017_v3 = vpop.f32.mrb[7].mxu1  ;;  %v6218_v43 = vpop.eup %6217  ;;  %v1613_v29 = vmul.f32 %v5917_v9, %v639_v49  ;;  %v1612_v16 = vmul.f32 %v5916_v38, %v638_v22 }
 0x212   : > { %v1018_v4 = vadd.f32 %v7459_v15, %v1017_v3  ;;  %5580 = vmatprep.mubr.msk.f32.mxu1 %vm1093_vm5, %v1070_v57  ;;  %v1883_v52 = vpop.permute.xlu0 %1882  ;;  %v5948_v48 = vpack.i.bf16 %v1979_v63, %v1978_v13  ;;  %v7513_v57 = vmul.f32 %v6218_v43, %v7093_v17 }
 0x213   : > { %v1073_v46 = vmax.f32 %v1023_v2, 0.0  ;;  %5581 = vmatmul.mubr.msk.f32.gmra.mrb[20].mxu1 %vm1093_vm5, %v1071_v12  ;;  %v1949_v56 = vsub.f32 1.0, %v1613_v29  ;;  %v1948_v53 = vsub.f32 1.0, %v1612_v16  ;;  %v1917_v49 = vadd.f32 %v1883_v52, %v1821_v30  ;;  %v1881_v22 = vpop.permute.xlu1 %1880  ;;  %v640_v29 = vld [vmem:[%s7421_s27 + $0x70] sm:$0xff]  ;;  %v641_v16 = vld [vmem:[%s7421_s27 + $0x78] sm:$0xff] }
 0x214   : > { %v1072_v27 = vmax.f32 %v1018_v4, 0.0  ;;  %v5556_v6 = vpop.f32.mrb[8].mxu1  ;;  %v1916_v19 = vadd.f32 %v1881_v22, %v1820_v55  ;;  %5949 = vrot.lane.b32.xlu1 %v5948_v48, %s6565_s21 }
 0x215   : > { %v1033_v9 = vadd.f32 %v5556_v6, %v7459_v15  ;;  %v1027_v38 = vpop.f32.mrb[9].mxu1  ;;  %v1933_v45 = vmul.f32 -0.22222222, %v1917_v49  ;;  %v1965_v12 = vmul.f32 1e+09, %v1949_v56 }
 0x216   : > { %v1964_v54 = vmul.f32 1e+09, %v1948_v53  ;;  %5583 = vmatprep.mubr.msk.f32.mxu1 %vm1093_vm5, %v1072_v27  ;;  %v1028_v13 = vadd.f32 %v7459_v15, %v1027_v38  ;;  %v1932_v63 = vmul.f32 -0.22222222, %v1916_v19  ;;  %v1822_v27 = vmul.f32 %v7513_v57, %v7513_v57  ;;  %v1885_v22 = vpop.permute.xlu0 %1884 }
 0x217   : > { %5584 = vmatmul.mubr.msk.f32.gmra.mrb[22].mxu1 %vm1093_vm5, %v1073_v46  ;;  %v1075_v2 = vmax.f32 %v1033_v9, 0.0  ;;  %v1981_v3 = vsub.f32 %v1933_v45, %v1965_v12  ;;  %v5920_v4 = vpop.permute.xlu1 %5919 }
 0x218   : > { %v1074_v43 = vmax.f32 %v1028_v13, 0.0  ;;  %v5559_v30 = vpop.f32.mrb[10].mxu1  ;;  %v1980_v52 = vsub.f32 %v1932_v63, %v1964_v54  ;;  %v5922_v55 = vunpack.i.h.bf16 %v5920_v4  ;;  %v5921_v48 = vunpack.i.l.bf16 %v5920_v4 }
 0x219   : > { %v1043_v56 = vadd.f32 %v5559_v30, %v7459_v15  ;;  %v1037_v53 = vpop.f32.mrb[11].mxu1 }
 0x21a   : > { %v1038_v49 = vadd.f32 %v7459_v15, %v1037_v53  ;;  %5586 = vmatprep.mubr.msk.f32.mxu1 %vm1093_vm5, %v1074_v43  ;;  %v6220_v46 = vpop.eup %6219  ;;  %v1615_v6 = vmul.f32 %v5922_v55, %v641_v16  ;;  %v1614_v19 = vmul.f32 %v5921_v48, %v640_v29  ;;  %v5953_v9 = vpack.i.bf16 %v1981_v3, %v1980_v52 }
 0x21b   : > { %v1077_v38 = vmax.f32 %v1043_v56, 0.0  ;;  %5587 = vmatmul.mubr.msk.f32.gmra.mrb[24].mxu1 %vm1093_vm5, %v1075_v2  ;;  %v7528_v45 = vmul.f32 %v6220_v46, %v7085_v23  ;;  %v1918_v43 = vadd.f32 %v1885_v22, %v1822_v27  ;;  %v1887_v2 = vpop.permute.xlu1 %1886  ;;  %v5963_v16 = vpack.i.bf16 %v6925_v51, %v6928_v61 }
 0x21c   : > { %v1076_v12 = vmax.f32 %v1038_v49, 0.0  ;;  %v5562_v54 = vpop.f32.mrb[12].mxu1  ;;  %v1950_v13 = vsub.f32 1.0, %v1614_v19  ;;  %5954 = vrot.lane.b32.xlu0 %v5953_v9, %s6565_s21  ;;  %v1951_v30 = vsub.f32 1.0, %v1615_v6  ;;  %v5973_v51 = vpack.i.bf16 %v6960_v14, %v6970_v18  ;;  %v2115_v18 = vld [vmem:[%s9702_s6] sm:$0xff] }
 0x21d   : > { %v1053_v63 = vadd.f32 %v5562_v54, %v7459_v15  ;;  %v1047_v4 = vpop.f32.mrb[13].mxu1  ;;  %v1823_v29 = vmul.f32 %v7528_v45, %v7528_v45  ;;  %v1934_v46 = vmul.f32 -0.22222222, %v1918_v43  ;;  %v610_v54 = vld [vmem:[%s7547_s16] sm:$0xff] }
 0x21e   : > { %v1048_v3 = vadd.f32 %v7459_v15, %v1047_v4  ;;  %5589 = vmatprep.mubr.msk.f32.mxu1 %vm1093_vm5, %v1076_v12  ;;  %v1966_v55 = vmul.f32 1e+09, %v1950_v13  ;;  %v1967_v6 = vmul.f32 1e+09, %v1951_v30  ;;  %v611_v13 = vld [vmem:[%s7547_s16 + $0x8] sm:$0xff]  ;;  %v5968_v4 = vpack.i.bf16 %v6938_v8, %v6948_v0  ;;  %v6543_v8 = vld [vmem:[%s6677_s26] sm:$0xff] }
 0x21f   : > { %v1079_v52 = vmax.f32 %v1053_v63, 0.0  ;;  %5590 = vmatmul.mubr.msk.f32.gmra.mrb[26].mxu1 %vm1093_vm5, %v1077_v38  ;;  %v1919_v48 = vadd.f32 %v1887_v2, %v1823_v29  ;;  %v5983_v63 = vpack.i.bf16 %v7005_v33, %v7016_v24  ;;  %v5993_v14 = vpack.i.bf16 %v611_v13, %v610_v54  ;;  %v6541_v33 = vld [vmem:[%s6677_s26 + $0x10] sm:$0xff]  ;;  %v6542_v24 = vld [vmem:[%s6677_s26 + $0x18] sm:$0xff]  ;;  %v614_v29 = vld [vmem:[%s7547_s16 + $0x20] sm:$0xff] }
 0x220   : > { %v1078_v56 = vmax.f32 %v1048_v3, 0.0  ;;  %v5565_v53 = vpop.f32.mrb[14].mxu1  ;;  %5964 = vrot.lane.b32.xlu0 %v5963_v16, %s9714_s23  ;;  %v1982_v12 = vsub.f32 %v1934_v46, %v1966_v55  ;;  %v5998_v43 = vpack.i.bf16 %v6542_v24, %v6541_v33  ;;  %v5978_v30 = vpack.i.bf16 %v6982_v7, %v6992_v26  ;;  %v615_v3 = vld [vmem:[%s7547_s16 + $0x28] sm:$0xff]  ;;  %v613_v55 = vld [vmem:[%s7547_s16 + $0x18] sm:$0xff]  ;;  %v6545_v26 = vld [vmem:[%s6677_s26 + $0x30] sm:$0xff] }
 0x221   : > { %v1063_v27 = vadd.f32 %v5565_v53, %v7459_v15  ;;  %v1057_v49 = vpop.f32.mrb[15].mxu1  ;;  %v1935_v22 = vmul.f32 -0.22222222, %v1919_v48  ;;  %v6544_v0 = vld [vmem:[%s6677_s26 + $0x8] sm:$0xff]  ;;  %v6013_v16 = vpack.i.bf16 %v615_v3, %v614_v29  ;;  %v6546_v48 = vld [vmem:[%s6677_s26 + $0x38] sm:$0xff]  ;;  %v618_v53 = vld [vmem:[%s7547_s16 + $0x40] sm:$0xff] }
 0x222   : > { %v1058_v19 = vadd.f32 %v7459_v15, %v1057_v49  ;;  %5592 = vmatprep.mubr.msk.f32.mxu1 %vm1093_vm5, %v1078_v56  ;;  %v5988_v2 = vpack.i.bf16 %v6544_v0, %v6543_v8  ;;  %v6018_v56 = vpack.i.bf16 %v6546_v48, %v6545_v26  ;;  %v6547_v49 = vld [vmem:[%s6677_s26 + $0x20] sm:$0xff]  ;;  %v6548_v46 = vld [vmem:[%s6677_s26 + $0x28] sm:$0xff]  ;;  %v6551_v54 = vld [vmem:[%s6677_s26 + $0x50] sm:$0xff]  ;;  %v2068_v0 = vsel %vm2065_vm7, %v7324_v34, 1.0 }
 0x223   : > { %v1081_v61 = vmax.f32 %v1063_v27, 0.0  ;;  %5593 = vmatmul.mubr.msk.f32.gmra.mrb[28].mxu1 %vm1093_vm5, %v1079_v52  ;;  %v1983_v9 = vsub.f32 %v1935_v22, %v1967_v6  ;;  %v612_v52 = vld [vmem:[%s7547_s16 + $0x10] sm:$0xff]  ;;  %v619_v27 = vld [vmem:[%s7547_s16 + $0x48] sm:$0xff]  ;;  %v6008_v22 = vpack.i.bf16 %v6548_v46, %v6547_v49  ;;  %v6552_v13 = vld [vmem:[%s6677_s26 + $0x58] sm:$0xff] }
 0x224   : > { %v1080_v38 = vmax.f32 %v1058_v19, 0.0  ;;  %5974 = vrot.lane.b32.xlu0 %v5973_v51, %s9714_s23  ;;  %v6003_v7 = vpack.i.bf16 %v613_v55, %v612_v52  ;;  %v6033_v6 = vpack.i.bf16 %v619_v27, %v618_v53  ;;  %v616_v19 = vld [vmem:[%s7547_s16 + $0x30] sm:$0xff]  ;;  %v617_v51 = vld [vmem:[%s7547_s16 + $0x38] sm:$0xff]  ;;  %v2071_v53 = vsel %vm2065_vm7, %v7371_v28, 1.0  ;;  %v2119_v29 = vld [vmem:[%s9702_s6 + $0x20] sm:$0xff] }
 0x225   : > { %v5958_v15 = vpack.i.bf16 %v1983_v9, %v1982_v12  ;;  %v6038_v9 = vpack.i.bf16 %v7031_v32, %v7042_v50  ;;  %v6550_v12 = vld [vmem:[%s6677_s26 + $0x48] sm:$0xff]  ;;  %v2066_v32 = vsel %vm2065_vm7, %v7293_v35, 1.0  ;;  %v2067_v50 = vsel %vm2065_vm7, %v7286_v42, 1.0 }
 0x226   : > { %5595 = vmatprep.mubr.msk.f32.mxu1 %vm1093_vm5, %v1080_v38  ;;  %v6549_v38 = vld [vmem:[%s6677_s26 + $0x40] sm:$0xff]  ;;  %v2072_v28 = vsel %vm2065_vm7, %v7400_v60, 1.0  ;;  %v2057_v60 = vsel %vm2048_vm4, %v7465_v21, %v7303_v40 }
 0x227   : > { %5596 = vmatmul.mubr.msk.f32.gmra.mrb[30].mxu1 %vm1093_vm5, %v1081_v61  ;;  %5959 = vrot.lane.b32.xlu1 %v5958_v15, %s6565_s21  ;;  %s9716_s21 = smov 2   ;;  %v6023_v61 = vpack.i.bf16 %v617_v51, %v616_v19  ;;  %v6028_v15 = vpack.i.bf16 %v6550_v12, %v6549_v38 }
 0x228   : > { %5984 = vrot.lane.b32.xlu0 %v5983_v63, %s9714_s23  ;;  %5656 = vmatprep.mubr.msk.f32.mxu1 %vm2147_vm6, %v2115_v18  ;;  %v6043_v63 = vpack.i.bf16 %v6552_v13, %v6551_v54  ;;  %v2058_v13 = vsel %vm2048_vm4, %v7462_v39, %v7300_v37 }
 0x22b   : > { %5969 = vrot.lane.b32.xlu1 %v5968_v4, %s9714_s23 }
 0x22c   : > { %5994 = vrot.lane.b32.xlu0 %v5993_v14, %s6569_s24 }
 0x22f   : > { %5979 = vrot.lane.b32.xlu1 %v5978_v30, %s9714_s23 }
 0x230   : > { %5999 = vrot.lane.b32.xlu0 %v5998_v43, %s9716_s21 }
 0x233   : > { %5989 = vrot.lane.b32.xlu1 %v5988_v2, %s9716_s21  ;;  %v2069_v2 = vsel %vm2065_vm7, %v7330_v10, 1.0  ;;  %v2070_v10 = vsel %vm2065_vm7, %v7353_v36, 1.0 }
 0x234   : > { %6014 = vrot.lane.b32.xlu0 %v6013_v16, %s6569_s24 }
 0x237   : > { %6004 = vrot.lane.b32.xlu1 %v6003_v7, %s6569_s24 }
 0x238   : > { %6019 = vrot.lane.b32.xlu0 %v6018_v56, %s9716_s21 }
 0x23b   : > { %6009 = vrot.lane.b32.xlu1 %v6008_v22, %s9716_s21 }
 0x23c   : > { %6034 = vrot.lane.b32.xlu0 %v6033_v6, %s6569_s24 }
 0x23f   : > { %6024 = vrot.lane.b32.xlu1 %v6023_v61, %s6569_s24  ;;  %v2073_v61 = vsel %vm2065_vm7, %v7393_v11, 1.0 }
 0x240   : > { %6039 = vrot.lane.b32.xlu0 %v6038_v9, %s9714_s23 }
 0x243   : > { %6029 = vrot.lane.b32.xlu1 %v6028_v15, %s9716_s21 }
 0x247   : > { %6044 = vrot.lane.b32.xlu1 %v6043_v63, %s9716_s21  ;;  %s5379_s21 = sshll.u32 %s10010_s19, 4 }
 0x25e   : > { %v5925_v14 = vpop.permute.xlu0 %5924 }
 0x25f   : > { %v5927_v18 = vunpack.i.h.bf16 %v5925_v14  ;;  %v5926_v4 = vunpack.i.l.bf16 %v5925_v14 }
 0x261   : > { %v2083_v33 = vsel %vm683_vm0, %v2067_v50, %v5927_v18  ;;  %v2082_v24 = vsel %vm683_vm0, %v2066_v32, %v5926_v4  ;;  %v2074_v18 = vsel %vm2065_vm7, %v2057_v60, 1.0  ;;  %v2075_v4 = vsel %vm2065_vm7, %v2058_v13, 1.0  ;;  %v2127_v13 = vld [vmem:[%s9702_s6 + $0x60] sm:$0xff]  ;;  %v2128_v60 = vld [vmem:[%s9702_s6 + $0x68] sm:$0xff] }
 0x262   : > { %v2099_v43 = vsel %vm2098_vm8, %v2082_v24, 0.0  ;;  %v2100_v30 = vsel %vm2098_vm8, %v2083_v33, 0.0  ;;  %v2059_v50 = vsel %vm2048_vm4, %v7476_v47, %v7334_v5  ;;  %v2060_v33 = vsel %vm2048_vm4, %v7479_v1, %v7337_v25 }
 0x263   : > { %v5812_v3 = vpack.c.bf16 %v2100_v30, %v2099_v43 }
 0x265   : > { %5814 = vmatprep.subr.msk.bf16.mxu1 %vm7615_vm10, %v5812_v3 }
 0x266   : > { %v5930_v35 = vpop.permute.xlu1 %5929  ;;  %5817 = vmatpush3.bf16.xpose.msk.msra.mxu1 %vm7615_vm10, %v5812_v3  ;;  %v2076_v3 = vsel %vm2065_vm7, %v2059_v50, 1.0  ;;  %v2139_v50 = vld [vmem:[%s9702_s6 + $0xc0] sm:$0xff] }
 0x267   : > { %v5932_v42 = vunpack.i.h.bf16 %v5930_v35  ;;  %v5931_v8 = vunpack.i.l.bf16 %v5930_v35  ;;  %v2077_v35 = vsel %vm2065_vm7, %v2060_v33, 1.0  ;;  %v2140_v33 = vld [vmem:[%s9702_s6 + $0xc8] sm:$0xff] }
 0x269   : > { %v2085_v16 = vsel %vm683_vm0, %v2069_v2, %v5932_v42  ;;  %v2084_v52 = vsel %vm683_vm0, %v2068_v0, %v5931_v8  ;;  %v2062_v8 = vsel %vm2048_vm4, %v7497_v31, %v7363_v20  ;;  %v2061_v0 = vsel %vm2048_vm4, %v7501_v62, %v7366_v44 }
 0x26a   : > { %v2101_v55 = vsel %vm2098_vm8, %v2084_v52, 0.0  ;;  %v2102_v7 = vsel %vm2098_vm8, %v2085_v16, 0.0 }
 0x26b   : > { %v5818_v26 = vpack.c.bf16 %v2102_v7, %v2101_v55  ;;  %v2078_v55 = vsel %vm2065_vm7, %v2061_v0, 1.0  ;;  %v2079_v7 = vsel %vm2065_vm7, %v2062_v8, 1.0  ;;  %v2145_v8 = vld [vmem:[%s9702_s6 + $0xf0] sm:$0xff] }
 0x26d   : > { %5820 = vmatprep.subr.msk.bf16.mxu1 %vm7615_vm10, %v5818_v26 }
 0x26e   : > { %v5935_v48 = vpop.permute.xlu0 %5934  ;;  %5823 = vmatpush3.bf16.xpose.msk.msra.mxu1 %vm7615_vm10, %v5818_v26 }
 0x26f   : > { %v5937_v34 = vunpack.i.h.bf16 %v5935_v48  ;;  %v5936_v56 = vunpack.i.l.bf16 %v5935_v48  ;;  %v2063_v48 = vsel %vm2048_vm4, %v7513_v57, %v7388_v41  ;;  %v2116_v57 = vld [vmem:[%s9702_s6 + $0x8] sm:$0xff] }
 0x271   : > { %v2087_v27 = vsel %vm683_vm0, %v2071_v53, %v5937_v34  ;;  %v2086_v49 = vsel %vm683_vm0, %v2070_v10, %v5936_v56  ;;  %v9763_v34 = vld [vmem:[#allocation3_spill] sm:$0xff] }
 0x272   : > { %v2103_v46 = vsel %vm2098_vm8, %v2086_v49, 0.0  ;;  %v2104_v22 = vsel %vm2098_vm8, %v2087_v27, 0.0  ;;  %v2064_v56 = vsel %vm2048_vm4, %v7528_v45, %v9763_v34  ;;  %v2080_v49 = vsel %vm2065_vm7, %v2063_v48, 1.0  ;;  %v2117_v45 = vld [vmem:[%s9702_s6 + $0x10] sm:$0xff] }
 0x273   : > { %v5824_v6 = vpack.c.bf16 %v2104_v22, %v2103_v46  ;;  %v2081_v46 = vsel %vm2065_vm7, %v2064_v56, 1.0 }
 0x275   : > { %5826 = vmatprep.subr.msk.bf16.mxu1 %vm7615_vm10, %v5824_v6 }
 0x276   : > { %v5940_v19 = vpop.permute.xlu1 %5939  ;;  %5829 = vmatpush3.bf16.xpose.msk.msra.mxu1 %vm7615_vm10, %v5824_v6 }
 0x277   : > { %v5942_v36 = vunpack.i.h.bf16 %v5940_v19  ;;  %v5941_v51 = vunpack.i.l.bf16 %v5940_v19 }
 0x279   : > { %v2089_v9 = vsel %vm683_vm0, %v2073_v61, %v5942_v36  ;;  %v2088_v38 = vsel %vm683_vm0, %v2072_v28, %v5941_v51  ;;  %v2118_v51 = vld [vmem:[%s9702_s6 + $0x18] sm:$0xff]  ;;  %v2120_v28 = vld [vmem:[%s9702_s6 + $0x28] sm:$0xff]  ;;  %v2121_v61 = vld [vmem:[%s9702_s6 + $0x30] sm:$0xff] }
 0x27a   : > { %v2105_v12 = vsel %vm2098_vm8, %v2088_v38, 0.0  ;;  %v2106_v15 = vsel %vm2098_vm8, %v2089_v9, 0.0  ;;  %v2122_v9 = vld [vmem:[%s9702_s6 + $0x38] sm:$0xff]  ;;  %v2123_v38 = vld [vmem:[%s9702_s6 + $0x40] sm:$0xff] }
 0x27b   : > { %v5830_v54 = vpack.c.bf16 %v2106_v15, %v2105_v12  ;;  %v2124_v12 = vld [vmem:[%s9702_s6 + $0x48] sm:$0xff]  ;;  %v2125_v15 = vld [vmem:[%s9702_s6 + $0x50] sm:$0xff] }
 0x27d   : > { %5832 = vmatprep.subr.msk.bf16.mxu1 %vm7615_vm10, %v5830_v54 }
 0x27e   : > { %v5945_v11 = vpop.permute.xlu0 %5944  ;;  %5835 = vmatpush3.bf16.xpose.msk.msra.mxu1 %vm7615_vm10, %v5830_v54  ;;  %v2126_v54 = vld [vmem:[%s9702_s6 + $0x58] sm:$0xff] }
 0x27f   : > { %v5947_v63 = vunpack.i.h.bf16 %v5945_v11  ;;  %v5946_v14 = vunpack.i.l.bf16 %v5945_v11  ;;  %v2129_v11 = vld [vmem:[%s9702_s6 + $0x70] sm:$0xff] }
 0x281   : > { %v2091_v32 = vsel %vm683_vm0, %v2075_v4, %v5947_v63  ;;  %v2090_v37 = vsel %vm683_vm0, %v2074_v18, %v5946_v14  ;;  %v2130_v63 = vld [vmem:[%s9702_s6 + $0x78] sm:$0xff]  ;;  %v2131_v14 = vld [vmem:[%s9702_s6 + $0x80] sm:$0xff]  ;;  %v2132_v18 = vld [vmem:[%s9702_s6 + $0x88] sm:$0xff] }
 0x282   : > { %v2107_v39 = vsel %vm2098_vm8, %v2090_v37, 0.0  ;;  %v2108_v40 = vsel %vm2098_vm8, %v2091_v32, 0.0  ;;  %v2133_v4 = vld [vmem:[%s9702_s6 + $0x90] sm:$0xff]  ;;  %v2134_v32 = vld [vmem:[%s9702_s6 + $0x98] sm:$0xff]  ;;  %v2135_v37 = vld [vmem:[%s9702_s6 + $0xa0] sm:$0xff] }
 0x283   : > { %v5836_v21 = vpack.c.bf16 %v2108_v40, %v2107_v39  ;;  %v2136_v39 = vld [vmem:[%s9702_s6 + $0xa8] sm:$0xff]  ;;  %v2137_v40 = vld [vmem:[%s9702_s6 + $0xb0] sm:$0xff] }
 0x285   : > { %5838 = vmatprep.subr.msk.bf16.mxu1 %vm7615_vm10, %v5836_v21 }
 0x286   : > { %v5950_v24 = vpop.permute.xlu1 %5949  ;;  %5841 = vmatpush3.bf16.xpose.msk.msra.mxu1 %vm7615_vm10, %v5836_v21  ;;  %v2138_v21 = vld [vmem:[%s9702_s6 + $0xb8] sm:$0xff] }
 0x287   : > { %v5952_v43 = vunpack.i.h.bf16 %v5950_v24  ;;  %v5951_v30 = vunpack.i.l.bf16 %v5950_v24  ;;  %v2141_v24 = vld [vmem:[%s9702_s6 + $0xd0] sm:$0xff] }
 0x289   : > { %v2093_v42 = vsel %vm683_vm0, %v2077_v35, %v5952_v43  ;;  %v2092_v5 = vsel %vm683_vm0, %v2076_v3, %v5951_v30  ;;  %v7828_v43 = vld [vmem:[%s9706_s10] ss:$0 sm:$0xff]  ;;  %v2142_v3 = vld [vmem:[%s9702_s6 + $0xd8] sm:$0xff] }
 0x28a   : > { %v2109_v47 = vsel %vm2098_vm8, %v2092_v5, 0.0  ;;  %v2110_v25 = vsel %vm2098_vm8, %v2093_v42, 0.0  ;;  %v2143_v5 = vld [vmem:[%s9702_s6 + $0xe0] sm:$0xff] }
 0x28b   : > { %v5842_v1 = vpack.c.bf16 %v2110_v25, %v2109_v47 }
 0x28d   : > { %5844 = vmatprep.subr.msk.bf16.mxu1 %vm7615_vm10, %v5842_v1 }
 0x28e   : > { %v5955_v2 = vpop.permute.xlu0 %5954  ;;  %5847 = vmatpush3.bf16.xpose.msk.msra.mxu1 %vm7615_vm10, %v5842_v1  ;;  %v2144_v1 = vld [vmem:[%s9702_s6 + $0xe8] sm:$0xff] }
 0x28f   : > { %v5957_v16 = vunpack.i.h.bf16 %v5955_v2  ;;  %v5956_v52 = vunpack.i.l.bf16 %v5955_v2  ;;  %v2146_v2 = vld [vmem:[%s9702_s6 + $0xf8] sm:$0xff] }
 0x291   : > { %v2095_v26 = vsel %vm683_vm0, %v2079_v7, %v5957_v16  ;;  %v2094_v20 = vsel %vm683_vm0, %v2078_v55, %v5956_v52  ;;  %v620_v7 = vld [vmem:[%s7547_s16 + $0x50] sm:$0xff] }
 0x292   : > { %v2111_v31 = vsel %vm2098_vm8, %v2094_v20, 0.0  ;;  %v2112_v44 = vsel %vm2098_vm8, %v2095_v26, 0.0  ;;  %v621_v26 = vld [vmem:[%s7547_s16 + $0x58] sm:$0xff] }
 0x293   : > { %v5848_v62 = vpack.c.bf16 %v2112_v44, %v2111_v31  ;;  %v6058_v34 = vpack.i.bf16 %v621_v26, %v620_v7 }
 0x295   : > { %5850 = vmatprep.subr.msk.bf16.mxu1 %vm7615_vm10, %v5848_v62 }
 0x296   : > { %5853 = vmatpush3.bf16.xpose.msk.msra.mxu1 %vm7615_vm10, %v5848_v62 }
 0x299   : > { %v5960_v10 = vpop.permute.xlu1 %5959 }
 0x29a   : > { %v5962_v53 = vunpack.i.h.bf16 %v5960_v10  ;;  %v5961_v27 = vunpack.i.l.bf16 %v5960_v10 }
 0x29c   : > { %v2097_v22 = vsel %vm683_vm0, %v2081_v46, %v5962_v53  ;;  %v2096_v6 = vsel %vm683_vm0, %v2080_v49, %v5961_v27  ;;  %v6553_v46 = vld [vmem:[%s6677_s26 + $0x60] sm:$0xff] }
 0x29d   : > { %v2113_v19 = vsel %vm2098_vm8, %v2096_v6, 0.0  ;;  %v2114_v36 = vsel %vm2098_vm8, %v2097_v22, 0.0  ;;  %v6554_v22 = vld [vmem:[%s6677_s26 + $0x68] sm:$0xff] }
 0x29e   : > { %v5854_v41 = vpack.c.bf16 %v2114_v36, %v2113_v19  ;;  %v6078_v6 = vpack.i.bf16 %v6554_v22, %v6553_v46 }
 0x2a0   : > { %5856 = vmatprep.subr.msk.bf16.mxu1 %vm7615_vm10, %v5854_v41 }
 0x2a1   : > { %5859 = vmatpush3.bf16.xpose.msk.msra.mxu1 %vm7615_vm10, %v5854_v41 }
 0x2a8   : > { %5657 = vmatmul.mubr.msk.f32.vlgmr.msra.gmra.mrb[32].mxu1 %vm2147_vm6, %v2116_v57 }
 0x2a9   : > { %5659 = vmatprep.mubr.msk.f32.mxu1 %vm2147_vm6, %v2117_v45 }
 0x2ac   : > { %5660 = vmatmul.mubr.msk.f32.gmra.mrb[34].mxu1 %vm2147_vm6, %v2118_v51  ;;  %v6555_v51 = vld [vmem:[%s6677_s26 + $0x70] sm:$0xff] }
 0x2ad   : > { %5662 = vmatprep.mubr.msk.f32.mxu1 %vm2147_vm6, %v2119_v29  ;;  %v6556_v29 = vld [vmem:[%s6677_s26 + $0x78] sm:$0xff]  ;;  %s6575_s26 = smov 18  }
 0x2b0   : > { %5663 = vmatmul.mubr.msk.f32.gmra.mrb[36].mxu1 %vm2147_vm6, %v2120_v28  ;;  %v6093_v28 = vpack.i.bf16 %v6556_v29, %v6555_v51 }
 0x2b1   : > { %5665 = vmatprep.mubr.msk.f32.mxu1 %vm2147_vm6, %v2121_v61  ;;  %v622_v61 = vld [vmem:[%s7547_s16 + $0x60] sm:$0xff] }
 0x2b4   : > { %5666 = vmatmul.mubr.msk.f32.gmra.mrb[38].mxu1 %vm2147_vm6, %v2122_v9  ;;  %v623_v9 = vld [vmem:[%s7547_s16 + $0x68] sm:$0xff] }
 0x2b5   : > { %5668 = vmatprep.mubr.msk.f32.mxu1 %vm2147_vm6, %v2123_v38  ;;  %v6073_v38 = vpack.i.bf16 %v7065_v58, %v7070_v59 }
 0x2b8   : > { %5669 = vmatmul.mubr.msk.f32.gmra.mrb[40].mxu1 %vm2147_vm6, %v2124_v12 }
 0x2b9   : > { %5671 = vmatprep.mubr.msk.f32.mxu1 %vm2147_vm6, %v2125_v15 }
 0x2bc   : > { %5672 = vmatmul.mubr.msk.f32.gmra.mrb[42].mxu1 %vm2147_vm6, %v2126_v54  ;;  %v6083_v54 = vpack.i.bf16 %v623_v9, %v622_v61 }
 0x2bd   : > { %5674 = vmatprep.mubr.msk.f32.mxu1 %vm2147_vm6, %v2127_v13 }
 0x2c0   : > { %5675 = vmatmul.mubr.msk.f32.gmra.mrb[44].mxu1 %vm2147_vm6, %v2128_v60 }
 0x2c1   : > { %5677 = vmatprep.mubr.msk.f32.mxu1 %vm2147_vm6, %v2129_v11 }
 0x2c4   : > { %5678 = vmatmul.mubr.msk.f32.gmra.mrb[46].mxu1 %vm2147_vm6, %v2130_v63 }
 0x2c5   : > { %5680 = vmatprep.mubr.msk.f32.mxu1 %vm2147_vm6, %v2131_v14 }
 0x2c8   : > { %5681 = vmatmul.mubr.msk.f32.gmra.mrb[48].mxu1 %vm2147_vm6, %v2132_v18 }
 0x2c9   : > { %5683 = vmatprep.mubr.msk.f32.mxu1 %vm2147_vm6, %v2133_v4  ;;  %v624_v4 = vld [vmem:[%s7547_s16 + $0x70] sm:$0xff] }
 0x2cc   : > { %5684 = vmatmul.mubr.msk.f32.gmra.mrb[50].mxu1 %vm2147_vm6, %v2134_v32  ;;  %v625_v32 = vld [vmem:[%s7547_s16 + $0x78] sm:$0xff]  ;;  %s5378_s16 = sshll.u32 %s10010_s19, 8 }
 0x2cd   : > { %5686 = vmatprep.mubr.msk.f32.mxu1 %vm2147_vm6, %v2135_v37  ;;  %v6088_v37 = vpack.i.bf16 %v7085_v23, %v7093_v17  ;;  %v5970_v23 = vpop.permute.xlu1 %5969  ;;  %v5965_v17 = vpop.permute.xlu0 %5964  ;;  %s9354_s23 = scalar_lea.vmem %s9710_s14, %s5378_s16 }
 0x2d0   : > { %5687 = vmatmul.mubr.msk.f32.gmra.mrb[52].mxu1 %vm2147_vm6, %v2136_v39 }
 0x2d1   : > { %5689 = vmatprep.mubr.msk.f32.mxu1 %vm2147_vm6, %v2137_v40 }
 0x2d4   : > { %5690 = vmatmul.mubr.msk.f32.gmra.mrb[54].mxu1 %vm2147_vm6, %v2138_v21  ;;  %v6098_v21 = vpack.i.bf16 %v625_v32, %v624_v4 }
 0x2d5   : > { %5692 = vmatprep.mubr.msk.f32.mxu1 %vm2147_vm6, %v2139_v50 }
 0x2d8   : > { %5693 = vmatmul.mubr.msk.f32.gmra.mrb[56].mxu1 %vm2147_vm6, %v2140_v33 }
 0x2d9   : > { %5695 = vmatprep.mubr.msk.f32.mxu1 %vm2147_vm6, %v2141_v24 }
 0x2da   : > { %v5576_v30 = vpop.f32.mrb[16].mxu1 }
 0x2db   : > { %v7836_v35 = vadd.f32 %v5576_v30, %v7828_v43  ;;  %v1208_v42 = vpop.f32.mrb[17].mxu1 }
 0x2dc   : > { %v7842_v47 = vadd.f32 %v7828_v43, %v1208_v42  ;;  %5696 = vmatmul.mubr.msk.f32.gmra.mrb[58].mxu1 %vm2147_vm6, %v2142_v3  ;;  %v7945_v3 = vpop.permute.xlu1 %5979  ;;  %v5975_v42 = vpop.permute.xlu0 %5974 }
 0x2dd   : > { %9764 = vst [vmem:[#allocation3_spill] sm:$0xff] %v7836_v35  ;;  %5698 = vmatprep.mubr.msk.f32.mxu1 %vm2147_vm6, %v2143_v5  ;;  %v5977_v9 = vunpack.i.h.bf16 %v5975_v42 }
 0x2de   : > { %9765 = vst [vmem:[#allocation4_spill] sm:$0xff] %v7842_v47  ;;  %v6048_v25 = vpack.i.bf16 %v7836_v35, %v7842_v47 }
 0x2e0   : > { %6049 = vrot.lane.b32.xlu1 %v6048_v25, %s6571_s22  ;;  %5699 = vmatmul.mubr.msk.f32.gmra.mrb[60].mxu1 %vm2147_vm6, %v2144_v1  ;;  %v5990_v5 = vpop.permute.xlu1 %5989  ;;  %v7947_v25 = vpop.permute.xlu0 %5984 }
 0x2e1   : > { %5701 = vmatprep.mubr.msk.f32.mxu1 %vm2147_vm6, %v2145_v8 }
 0x2e2   : > { %v5579_v0 = vpop.f32.mrb[18].mxu1 }
 0x2e3   : > { %v7861_v16 = vadd.f32 %v5579_v0, %v7828_v43  ;;  %v1218_v52 = vpop.f32.mrb[19].mxu1 }
 0x2e4   : > { %v7864_v55 = vadd.f32 %v7828_v43, %v1218_v52  ;;  %5702 = vmatmul.mubr.msk.f32.gmra.mrb[62].mxu1 %vm2147_vm6, %v2146_v2  ;;  %v6005_v1 = vpop.permute.xlu1 %6004 }
 0x2e5   : > { %9766 = vst [vmem:[#allocation5_spill] sm:$0xff] %v7861_v16 }
 0x2e6   : > { %9767 = vst [vmem:[#allocation6_spill] sm:$0xff] %v7864_v55  ;;  %v6053_v20 = vpack.i.bf16 %v7861_v16, %v7864_v55  ;;  %v5582_v31 = vpop.f32.mrb[20].mxu1 }
 0x2e7   : > { %v7872_v44 = vadd.f32 %v5582_v31, %v7828_v43  ;;  %v1228_v62 = vpop.f32.mrb[21].mxu1  ;;  %v5966_v31 = vunpack.i.l.bf16 %v5965_v17 }
 0x2e8   : > { %v7875_v48 = vadd.f32 %v7828_v43, %v1228_v62  ;;  %6054 = vrot.lane.b32.xlu0 %v6053_v20, %s6571_s22  ;;  %v6010_v8 = vpop.permute.xlu1 %6009  ;;  %v5967_v20 = vunpack.i.h.bf16 %v5965_v17  ;;  %v5992_v62 = vunpack.i.h.bf16 %v5990_v5 }
 0x2e9   : > { %9768 = vst [vmem:[#allocation7_spill] sm:$0xff] %v7872_v44 }
 0x2ea   : > { %9769 = vst [vmem:[#allocation8_spill] sm:$0xff] %v7875_v48  ;;  %v6063_v56 = vpack.i.bf16 %v7872_v44, %v7875_v48  ;;  %v5585_v10 = vpop.f32.mrb[22].mxu1 }
 0x2eb   : > { %v7881_v53 = vadd.f32 %v5585_v10, %v7828_v43  ;;  %v1238_v27 = vpop.f32.mrb[23].mxu1  ;;  %v2822_v10 = vsel %vm2048_vm4, 1.0, %v5967_v20 }
 0x2ec   : > { %v7884_v49 = vadd.f32 %v7828_v43, %v1238_v27  ;;  %6064 = vrot.lane.b32.xlu1 %v6063_v56, %s6571_s22  ;;  %6059 = vrot.lane.b32.xlu0 %v6058_v34, %s6569_s24  ;;  %v7949_v2 = vpop.permute.xlu1 %6024  ;;  %v5991_v34 = vunpack.i.l.bf16 %v5990_v5  ;;  %v2821_v27 = vsel %vm2048_vm4, 1.0, %v5966_v31 }
 0x2ed   : > { %9770 = vst [vmem:[#allocation9_spill] sm:$0xff] %v7881_v53 }
 0x2ee   : > { %9771 = vst [vmem:[#allocation10_spill] sm:$0xff] %v7884_v49  ;;  %v6068_v19 = vpack.i.bf16 %v7881_v53, %v7884_v49  ;;  %v5588_v36 = vpop.f32.mrb[24].mxu1 }
 0x2ef   : > { %v1248_v41 = vpop.f32.mrb[25].mxu1  ;;  %v7895_v57 = vadd.f32 %v5588_v36, %v7828_v43  ;;  %v2838_v36 = vsel %vm2065_vm7, %v2822_v10, %v5992_v62 }
 0x2f0   : > { %6079 = vrot.lane.b32.xlu1 %v6078_v6, %s9772_s30  ;;  %6069 = vrot.lane.b32.xlu0 %v6068_v19, %s6571_s22  ;;  %v7898_v45 = vadd.f32 %v7828_v43, %v1248_v41  ;;  %v7953_v7 = vpop.permute.xlu1 %6029  ;;  %v2837_v19 = vsel %vm2065_vm7, %v2821_v27, %v5991_v34 }
 0x2f1   : > { %9773 = vst [vmem:[#allocation11_spill] sm:$0xff] %v7895_v57 }
 0x2f2   : > { %9774 = vst [vmem:[#allocation12_spill] sm:$0xff] %v7898_v45  ;;  %v5591_v12 = vpop.f32.mrb[26].mxu1  ;;  %v6103_v13 = vpack.i.bf16 %v7895_v57, %v7898_v45 }
 0x2f3   : > { %v1258_v15 = vpop.f32.mrb[27].mxu1  ;;  %v7911_v60 = vadd.f32 %v5591_v12, %v7828_v43 }
 0x2f4   : > { %6094 = vrot.lane.b32.xlu1 %v6093_v28, %s9772_s30  ;;  %6074 = vrot.lane.b32.xlu0 %v6073_v38, %s9775_s20  ;;  %v7914_v11 = vadd.f32 %v7828_v43, %v1258_v15  ;;  %v7957_v56 = vpop.permute.xlu1 %6044 }
 0x2f5   : > { %9776 = vst [vmem:[#allocation13_spill] sm:$0xff] %v7911_v60 }
 0x2f6   : > { %9777 = vst [vmem:[#allocation14_spill] sm:$0xff] %v7914_v11  ;;  %v5594_v63 = vpop.f32.mrb[28].mxu1  ;;  %v6108_v59 = vpack.i.bf16 %v7911_v60, %v7914_v11 }
 0x2f7   : > { %v1268_v58 = vpop.f32.mrb[29].mxu1  ;;  %v7921_v14 = vadd.f32 %v5594_v63, %v7828_v43  ;;  %v5971_v63 = vunpack.i.l.bf16 %v5970_v23 }
 0x2f8   : > { %6104 = vrot.lane.b32.xlu1 %v6103_v13, %s6571_s22  ;;  %6084 = vrot.lane.b32.xlu0 %v6083_v54, %s6569_s24  ;;  %v7924_v18 = vadd.f32 %v7828_v43, %v1268_v58  ;;  %v5976_v54 = vunpack.i.l.bf16 %v5975_v42  ;;  %v5972_v13 = vunpack.i.h.bf16 %v5970_v23 }
 0x2f9   : > { %9778 = vst [vmem:[#allocation15_spill] sm:$0xff] %v7921_v14  ;;  %v2823_v17 = vsel %vm2048_vm4, 1.0, %v5971_v63 }
 0x2fa   : > { %9779 = vst [vmem:[#allocation16_spill] sm:$0xff] %v7924_v18  ;;  %v5597_v39 = vpop.f32.mrb[30].mxu1  ;;  %v6113_v50 = vpack.i.bf16 %v7921_v14, %v7924_v18  ;;  %v2824_v23 = vsel %vm2048_vm4, 1.0, %v5972_v13 }
 0x2fb   : > { %v1278_v40 = vpop.f32.mrb[31].mxu1  ;;  %v7935_v33 = vadd.f32 %v5597_v39, %v7828_v43  ;;  %v6006_v39 = vunpack.i.l.bf16 %v6005_v1 }
 0x2fc   : > { %6109 = vrot.lane.b32.xlu1 %v6108_v59, %s6571_s22  ;;  %6089 = vrot.lane.b32.xlu0 %v6088_v37, %s9775_s20  ;;  %v7938_v24 = vadd.f32 %v7828_v43, %v1278_v40  ;;  %v5995_v43 = vpop.permute.xlu0 %5994  ;;  %v6007_v37 = vunpack.i.h.bf16 %v6005_v1  ;;  %v6012_v40 = vunpack.i.h.bf16 %v6010_v8 }
 0x2fd   : > { %9780 = vst [vmem:[#allocation17_spill] sm:$0xff] %v7935_v33  ;;  %v5997_v46 = vunpack.i.h.bf16 %v5995_v43  ;;  %v5996_v22 = vunpack.i.l.bf16 %v5995_v43 }
 0x2fe   : > { %9781 = vst [vmem:[#allocation18_spill] sm:$0xff] %v7938_v24  ;;  %v6118_v30 = vpack.i.bf16 %v7935_v33, %v7938_v24 }
 0x2ff   : > { %v2854_v28 = vsel %vm2853_vm11, %v2837_v19, %v5996_v22  ;;  %v2855_v61 = vsel %vm2853_vm11, %v2838_v36, %v5997_v46  ;;  %v5982_v22 = vunpack.i.h.bf16 %v7945_v3  ;;  %v5981_v19 = vunpack.i.l.bf16 %v7945_v3 }
 0x300   : > { %6114 = vrot.lane.b32.xlu1 %v6113_v50, %s6571_s22  ;;  %6099 = vrot.lane.b32.xlu0 %v6098_v21, %s6569_s24  ;;  %v6000_v0 = vpop.permute.xlu0 %5999  ;;  %v6011_v21 = vunpack.i.l.bf16 %v6010_v8  ;;  %v2826_v50 = vsel %vm2048_vm4, 1.0, %v5977_v9  ;;  %v6027_v9 = vunpack.i.h.bf16 %v7949_v2  ;;  %s582_s24 = scalar_lea.vmem %s9701_s5, %s10010_s19 }
 0x301   : > { %v6002_v4 = vunpack.i.h.bf16 %v6000_v0  ;;  %v6001_v32 = vunpack.i.l.bf16 %v6000_v0  ;;  %v2842_v10 = vsel %vm2065_vm7, %v2826_v50, %v6012_v40  ;;  %v2828_v63 = vsel %vm2048_vm4, 1.0, %v5982_v22 }
 0x302   : > { %v5987_v50 = vunpack.i.h.bf16 %v7947_v25  ;;  %v6047_v22 = vunpack.i.h.bf16 %v7957_v56 }
 0x303   : > { %v2840_v5 = vsel %vm2065_vm7, %v2824_v23, %v6002_v4  ;;  %v2839_v1 = vsel %vm2065_vm7, %v2823_v17, %v6001_v32  ;;  %v6031_v17 = vunpack.i.l.bf16 %v7953_v7 }
 0x304   : > { %6119 = vrot.lane.b32.xlu1 %v6118_v30, %s6571_s22  ;;  %v7951_v52 = vpop.permute.xlu0 %6014  ;;  %v2825_v30 = vsel %vm2048_vm4, 1.0, %v5976_v54  ;;  %v2856_v31 = vsel %vm2853_vm11, %v2839_v1, %v6006_v39  ;;  %v2857_v62 = vsel %vm2853_vm11, %v2840_v5, %v6007_v37  ;;  %s592_s22 = scalar_lea.vmem %s9711_s15, %s5379_s21 }
 0x305   : > { %v6017_v8 = vunpack.i.h.bf16 %v7951_v52  ;;  %v6016_v20 = vunpack.i.l.bf16 %v7951_v52  ;;  %v2841_v34 = vsel %vm2065_vm7, %v2825_v30, %v6011_v21 }
 0x307   : > { %v2859_v54 = vsel %vm2853_vm11, %v2842_v10, %v6017_v8 }
 0x308   : > { %v7955_v26 = vpop.permute.xlu0 %6019 }
 0x30c   : > { %v7961_v6 = vpop.permute.xlu0 %6034 }
 0x310   : > { %v7973_v58 = vpop.permute.xlu0 %6039 }
 0x352   : > { %v6050_v41 = vpop.permute.xlu1 %6049 }
 0x353   : > { %v6052_v51 = vunpack.i.h.bf16 %v6050_v41  ;;  %v6051_v29 = vunpack.i.l.bf16 %v6050_v41 }
 0x355   : > { %v2870_v38 = vsel %vm2147_vm6, %v2854_v28, %v6051_v29  ;;  %v2871_v12 = vsel %vm2147_vm6, %v2855_v61, %v6052_v51  ;;  %v6022_v51 = vunpack.i.h.bf16 %v7955_v26  ;;  %v6021_v29 = vunpack.i.l.bf16 %v7955_v26 }
 0x356   : > { %v5284_v59 = vpack.c.bf16 %v2871_v12, %v2870_v38  ;;  %v6026_v38 = vunpack.i.l.bf16 %v7949_v2  ;;  %v2858_v12 = vsel %vm2853_vm11, %v2841_v34, %v6016_v20  ;;  %v5986_v26 = vunpack.i.l.bf16 %v7947_v25 }
 0x357   : > { %v2827_v2 = vsel %vm2048_vm4, 1.0, %v5981_v19  ;;  %v2844_v37 = vsel %vm2065_vm7, %v2828_v63, %v6022_v51  ;;  %v6042_v25 = vunpack.i.h.bf16 %v7973_v58  ;;  %v6037_v34 = vunpack.i.h.bf16 %v7961_v6 }
 0x358   : > { %5704 = vmatprep.subr.msk.bf16.mxu0 %vm7969_vm13, %v5284_v59  ;;  %v2843_v39 = vsel %vm2065_vm7, %v2827_v2, %v6021_v29  ;;  %v2861_v23 = vsel %vm2853_vm11, %v2844_v37, %v6027_v9  ;;  %v2829_v20 = vsel %vm2048_vm4, 1.0, %v5986_v26 }
 0x359   : > { %5705 = vmatpush3.bf16.msk.msra.mxu0 %vm7969_vm13, %v5284_v59  ;;  %v2860_v30 = vsel %vm2853_vm11, %v2843_v39, %v6026_v38  ;;  %v2845_v10 = vsel %vm2065_vm7, %v2829_v20, %v6031_v17 }
 0x35a   : > { %v6055_v42 = vpop.permute.xlu0 %6054 }
 0x35b   : > { %v6057_v43 = vunpack.i.h.bf16 %v6055_v42  ;;  %v6056_v0 = vunpack.i.l.bf16 %v6055_v42  ;;  %v6032_v42 = vunpack.i.h.bf16 %v7953_v7  ;;  %v2830_v7 = vsel %vm2048_vm4, 1.0, %v5987_v50 }
 0x35d   : > { %v2872_v27 = vsel %vm2147_vm6, %v2856_v31, %v6056_v0  ;;  %v2873_v46 = vsel %vm2147_vm6, %v2857_v62, %v6057_v43  ;;  %v6036_v31 = vunpack.i.l.bf16 %v7961_v6  ;;  %v6041_v62 = vunpack.i.l.bf16 %v7973_v58 }
 0x35e   : > { %v6065_v36 = vpop.permute.xlu1 %6064  ;;  %v7995_v41 = vpop.permute.xlu0 %6059  ;;  %v5287_v52 = vpack.c.bf16 %v2873_v46, %v2872_v27  ;;  %v6046_v27 = vunpack.i.l.bf16 %v7957_v56  ;;  %v2846_v46 = vsel %vm2065_vm7, %v2830_v7, %v6032_v42  ;;  %v2832_v58 = vsel %vm2048_vm4, 1.0, %v6042_v25 }
 0x35f   : > { %v6067_v28 = vunpack.i.h.bf16 %v6065_v36  ;;  %v6066_v61 = vunpack.i.l.bf16 %v6065_v36  ;;  %v2831_v51 = vsel %vm2048_vm4, 1.0, %v6041_v62  ;;  %v6062_v38 = vunpack.i.h.bf16 %v7995_v41 }
 0x360   : > { %5706 = vmatprep.subr.msk.bf16.mxu0 %vm7969_vm13, %v5287_v52  ;;  %v2847_v9 = vsel %vm2065_vm7, %v2831_v51, %v6046_v27  ;;  %v6061_v56 = vunpack.i.l.bf16 %v7995_v41 }
 0x361   : > { %v2874_v3 = vsel %vm2147_vm6, %v2858_v12, %v6066_v61  ;;  %v2875_v13 = vsel %vm2147_vm6, %v2859_v54, %v6067_v28  ;;  %5707 = vmatpush3.bf16.msk.msra.mxu0 %vm7969_vm13, %v5287_v52  ;;  %v2862_v61 = vsel %vm2853_vm11, %v2845_v10, %v6036_v31  ;;  %v2863_v12 = vsel %vm2853_vm11, %v2846_v46, %v6037_v34 }
 0x362   : > { %v8012_v59 = vpop.permute.xlu1 %6079  ;;  %v6070_v4 = vpop.permute.xlu0 %6069  ;;  %v5290_v32 = vpack.c.bf16 %v2875_v13, %v2874_v3  ;;  %v2848_v54 = vsel %vm2065_vm7, %v2832_v58, %v6047_v22 }
 0x363   : > { %v6072_v40 = vunpack.i.h.bf16 %v6070_v4  ;;  %v6071_v21 = vunpack.i.l.bf16 %v6070_v4  ;;  %v6082_v3 = vunpack.i.h.bf16 %v8012_v59  ;;  %v6081_v63 = vunpack.i.l.bf16 %v8012_v59 }
 0x364   : > { %5708 = vmatprep.subr.msk.bf16.mxu0 %vm7969_vm13, %v5290_v32 }
 0x365   : > { %v2876_v5 = vsel %vm2147_vm6, %v2860_v30, %v6071_v21  ;;  %v2877_v1 = vsel %vm2147_vm6, %v2861_v23, %v6072_v40  ;;  %5709 = vmatpush3.bf16.msk.msra.mxu0 %vm7969_vm13, %v5290_v32  ;;  %v2864_v30 = vsel %vm2853_vm11, %v2847_v9, %v6061_v56  ;;  %v2865_v23 = vsel %vm2853_vm11, %v2848_v54, %v6062_v38 }
 0x366   : > { %v8028_v43 = vpop.permute.xlu1 %6094  ;;  %v6075_v0 = vpop.permute.xlu0 %6074  ;;  %v5293_v8 = vpack.c.bf16 %v2877_v1, %v2876_v5 }
 0x367   : > { %v6077_v19 = vunpack.i.h.bf16 %v6075_v0  ;;  %v6076_v36 = vunpack.i.l.bf16 %v6075_v0  ;;  %v6097_v59 = vunpack.i.h.bf16 %v8028_v43  ;;  %v6096_v25 = vunpack.i.l.bf16 %v8028_v43 }
 0x368   : > { %5710 = vmatprep.subr.msk.bf16.mxu0 %vm7969_vm13, %v5293_v8 }
 0x369   : > { %5711 = vmatpush3.bf16.msk.msra.mxu0 %vm7969_vm13, %v5293_v8  ;;  %v2834_v2 = vsel %vm2048_vm4, 1.0, %v6077_v19  ;;  %v2833_v4 = vsel %vm2048_vm4, 1.0, %v6076_v36 }
 0x36a   : > { %v6105_v52 = vpop.permute.xlu1 %6104  ;;  %v6085_v6 = vpop.permute.xlu0 %6084  ;;  %v2850_v0 = vsel %vm2065_vm7, %v2834_v2, %v6082_v3  ;;  %v2849_v8 = vsel %vm2065_vm7, %v2833_v4, %v6081_v63 }
 0x36b   : > { %v6107_v29 = vunpack.i.h.bf16 %v6105_v52  ;;  %v6106_v28 = vunpack.i.l.bf16 %v6105_v52  ;;  %v6087_v41 = vunpack.i.h.bf16 %v6085_v6  ;;  %v6086_v40 = vunpack.i.l.bf16 %v6085_v6 }
 0x36d   : > { %v2878_v13 = vsel %vm2147_vm6, %v2862_v61, %v6106_v28  ;;  %v2879_v26 = vsel %vm2147_vm6, %v2863_v12, %v6107_v29  ;;  %v2866_v7 = vsel %vm2853_vm11, %v2849_v8, %v6086_v40  ;;  %v2867_v34 = vsel %vm2853_vm11, %v2850_v0, %v6087_v41 }
 0x36e   : > { %v6110_v32 = vpop.permute.xlu1 %6109  ;;  %v6090_v37 = vpop.permute.xlu0 %6089  ;;  %v5296_v39 = vpack.c.bf16 %v2879_v26, %v2878_v13 }
 0x36f   : > { %v6112_v21 = vunpack.i.h.bf16 %v6110_v32  ;;  %v6111_v50 = vunpack.i.l.bf16 %v6110_v32  ;;  %v6092_v17 = vunpack.i.h.bf16 %v6090_v37  ;;  %v6091_v42 = vunpack.i.l.bf16 %v6090_v37 }
 0x370   : > { %5712 = vmatprep.subr.msk.bf16.mxu0 %vm7969_vm13, %v5296_v39 }
 0x371   : > { %v2880_v5 = vsel %vm2147_vm6, %v2864_v30, %v6111_v50  ;;  %v2881_v1 = vsel %vm2147_vm6, %v2865_v23, %v6112_v21  ;;  %5713 = vmatpush3.bf16.msk.msra.mxu0 %vm7969_vm13, %v5296_v39  ;;  %v2836_v46 = vsel %vm2048_vm4, 1.0, %v6092_v17  ;;  %v2835_v22 = vsel %vm2048_vm4, 1.0, %v6091_v42 }
 0x372   : > { %v6115_v20 = vpop.permute.xlu1 %6114  ;;  %v6100_v31 = vpop.permute.xlu0 %6099  ;;  %v5299_v62 = vpack.c.bf16 %v2881_v1, %v2880_v5  ;;  %v2852_v51 = vsel %vm2065_vm7, %v2836_v46, %v6097_v59  ;;  %v2851_v29 = vsel %vm2065_vm7, %v2835_v22, %v6096_v25 }
 0x373   : > { %v6117_v10 = vunpack.i.h.bf16 %v6115_v20  ;;  %v6116_v27 = vunpack.i.l.bf16 %v6115_v20  ;;  %v6102_v58 = vunpack.i.h.bf16 %v6100_v31  ;;  %v6101_v19 = vunpack.i.l.bf16 %v6100_v31 }
 0x374   : > { %5714 = vmatprep.subr.msk.bf16.mxu0 %vm7969_vm13, %v5299_v62 }
 0x375   : > { %v2882_v43 = vsel %vm2147_vm6, %v2866_v7, %v6116_v27  ;;  %v2883_v36 = vsel %vm2147_vm6, %v2867_v34, %v6117_v10  ;;  %5715 = vmatpush3.bf16.msk.msra.mxu0 %vm7969_vm13, %v5299_v62  ;;  %v2868_v9 = vsel %vm2853_vm11, %v2851_v29, %v6101_v19  ;;  %v2869_v38 = vsel %vm2853_vm11, %v2852_v51, %v6102_v58 }
 0x376   : > { %v6120_v52 = vpop.permute.xlu1 %6119  ;;  %v5302_v6 = vpack.c.bf16 %v2883_v36, %v2882_v43 }
 0x377   : > { %v6122_v28 = vunpack.i.h.bf16 %v6120_v52  ;;  %v6121_v61 = vunpack.i.l.bf16 %v6120_v52 }
 0x378   : > { %5716 = vmatprep.subr.msk.bf16.mxu0 %vm7969_vm13, %v5302_v6 }
 0x379   : > { %v2884_v56 = vsel %vm2147_vm6, %v2868_v9, %v6121_v61  ;;  %v2885_v12 = vsel %vm2147_vm6, %v2869_v38, %v6122_v28  ;;  %5717 = vmatpush3.bf16.msk.msra.mxu0 %vm7969_vm13, %v5302_v6 }
 0x37a   : > { %v5305_v54 = vpack.c.bf16 %v2885_v12, %v2884_v56 }
 0x37b   : > { %v5658_v3 = vpop.f32.mrb[32].mxu1 }
 0x37c   : > { %5718 = vmatprep.subr.msk.bf16.mxu0 %vm7969_vm13, %v5305_v54  ;;  %v2519_v13 = vmul.f32 1.442695, %v5658_v3  ;;  %v2358_v26 = vpop.f32.mrb[33].mxu1 }
 0x37d   : > { %5719 = vmatpush3.bf16.msk.msra.mxu0 %vm7969_vm13, %v5305_v54  ;;  %v2517_v63 = vmul.f32 1.442695, %v2358_v26 }
 0x37e   : > { %6221 = vpow2.f32 %v2519_v13 }
 0x37f   : > { %6223 = vpow2.f32 %v2517_v63  ;;  %v5661_v2 = vpop.f32.mrb[34].mxu1 }
 0x380   : > { %v2523_v4 = vmul.f32 1.442695, %v5661_v2  ;;  %v2368_v32 = vpop.f32.mrb[35].mxu1 }
 0x381   : > { %v2521_v37 = vmul.f32 1.442695, %v2368_v32 }
 0x382   : > { %6225 = vpow2.f32 %v2523_v4 }
 0x383   : > { %6227 = vpow2.f32 %v2521_v37  ;;  %v5664_v39 = vpop.f32.mrb[36].mxu1 }
 0x384   : > { %v2527_v41 = vmul.f32 1.442695, %v5664_v39  ;;  %v2378_v40 = vpop.f32.mrb[37].mxu1 }
 0x385   : > { %v2525_v21 = vmul.f32 1.442695, %v2378_v40 }
 0x386   : > { %6229 = vpow2.f32 %v2527_v41 }
 0x387   : > { %6231 = vpow2.f32 %v2525_v21  ;;  %v5667_v50 = vpop.f32.mrb[38].mxu1 }
 0x388   : > { %v6222_v30 = vpop.eup %6221  ;;  %v2531_v23 = vmul.f32 1.442695, %v5667_v50  ;;  %v2388_v15 = vpop.f32.mrb[39].mxu1 }
 0x389   : > { %v6224_v17 = vpop.eup %6223  ;;  %v2529_v42 = vmul.f32 1.442695, %v2388_v15 }
 0x38a   : > { %6233 = vpow2.f32 %v2531_v23  ;;  %v2903_v59 = vpack.c.bf16 %v6222_v30, %v6224_v17 }
 0x38b   : > { %6235 = vpow2.f32 %v2529_v42  ;;  %v5670_v5 = vpop.f32.mrb[40].mxu1 }
 0x38c   : > { %v6226_v1 = vpop.eup %6225  ;;  %5720 = vmatprep.mubr.bf16.mxu0 %v2903_v59  ;;  %v2535_v25 = vmul.f32 1.442695, %v5670_v5  ;;  %v2398_v0 = vpop.f32.mrb[41].mxu1 }
 0x38d   : > { %v6228_v8 = vpop.eup %6227  ;;  %v2533_v20 = vmul.f32 1.442695, %v2398_v0 }
 0x38e   : > { %6237 = vpow2.f32 %v2535_v25  ;;  %v2904_v31 = vpack.c.bf16 %v6226_v1, %v6228_v8 }
 0x38f   : > { %6239 = vpow2.f32 %v2533_v20  ;;  %v5673_v62 = vpop.f32.mrb[42].mxu1 }
 0x390   : > { %v6230_v7 = vpop.eup %6229  ;;  %v2539_v34 = vmul.f32 1.442695, %v5673_v62  ;;  %v2408_v10 = vpop.f32.mrb[43].mxu1  ;;  %5721 = vmatmul.mubr.bf16.vlgmr.msra.gmra.mrb[16].mxu0 %v2904_v31 }
 0x391   : > { %v6232_v27 = vpop.eup %6231  ;;  %v2537_v46 = vmul.f32 1.442695, %v2408_v10 }
 0x392   : > { %6241 = vpow2.f32 %v2539_v34  ;;  %v2905_v22 = vpack.c.bf16 %v6230_v7, %v6232_v27 }
 0x393   : > { %6243 = vpow2.f32 %v2537_v46  ;;  %v5676_v58 = vpop.f32.mrb[44].mxu1 }
 0x394   : > { %v6234_v19 = vpop.eup %6233  ;;  %v2543_v43 = vmul.f32 1.442695, %v5676_v58  ;;  %v2418_v36 = vpop.f32.mrb[45].mxu1  ;;  %5724 = vmatprep.mubr.bf16.mxu0 %v2905_v22 }
 0x395   : > { %v6236_v52 = vpop.eup %6235  ;;  %v2541_v6 = vmul.f32 1.442695, %v2418_v36 }
 0x396   : > { %6245 = vpow2.f32 %v2543_v43  ;;  %v2906_v51 = vpack.c.bf16 %v6234_v19, %v6236_v52 }
 0x397   : > { %6247 = vpow2.f32 %v2541_v6  ;;  %v5679_v29 = vpop.f32.mrb[46].mxu1 }
 0x398   : > { %v6238_v28 = vpop.eup %6237  ;;  %v2547_v61 = vmul.f32 1.442695, %v5679_v29  ;;  %v2428_v9 = vpop.f32.mrb[47].mxu1  ;;  %5725 = vmatmul.mubr.bf16.gmra.mrb[20].mxu0 %v2906_v51 }
 0x399   : > { %v6240_v38 = vpop.eup %6239  ;;  %v2545_v56 = vmul.f32 1.442695, %v2428_v9 }
 0x39a   : > { %6249 = vpow2.f32 %v2547_v61  ;;  %v2907_v12 = vpack.c.bf16 %v6238_v28, %v6240_v38 }
 0x39b   : > { %6251 = vpow2.f32 %v2545_v56  ;;  %v5682_v54 = vpop.f32.mrb[48].mxu1 }
 0x39c   : > { %v6242_v3 = vpop.eup %6241  ;;  %v2551_v13 = vmul.f32 1.442695, %v5682_v54  ;;  %v2438_v26 = vpop.f32.mrb[49].mxu1  ;;  %5728 = vmatprep.mubr.bf16.mxu0 %v2907_v12 }
 0x39d   : > { %v6244_v63 = vpop.eup %6243  ;;  %v2549_v2 = vmul.f32 1.442695, %v2438_v26 }
 0x39e   : > { %6253 = vpow2.f32 %v2551_v13  ;;  %v2908_v4 = vpack.c.bf16 %v6242_v3, %v6244_v63 }
 0x39f   : > { %6255 = vpow2.f32 %v2549_v2  ;;  %v5685_v32 = vpop.f32.mrb[50].mxu1 }
 0x3a0   : > { %v6246_v37 = vpop.eup %6245  ;;  %v2555_v39 = vmul.f32 1.442695, %v5685_v32  ;;  %v2448_v41 = vpop.f32.mrb[51].mxu1  ;;  %5729 = vmatmul.mubr.bf16.gmra.mrb[24].mxu0 %v2908_v4 }
 0x3a1   : > { %v6248_v40 = vpop.eup %6247  ;;  %v2553_v21 = vmul.f32 1.442695, %v2448_v41 }
 0x3a2   : > { %6257 = vpow2.f32 %v2555_v39  ;;  %v2909_v50 = vpack.c.bf16 %v6246_v37, %v6248_v40 }
 0x3a3   : > { %6259 = vpow2.f32 %v2553_v21  ;;  %v5688_v30 = vpop.f32.mrb[52].mxu1 }
 0x3a4   : > { %v6250_v23 = vpop.eup %6249  ;;  %v2559_v15 = vmul.f32 1.442695, %v5688_v30  ;;  %v2458_v17 = vpop.f32.mrb[53].mxu1  ;;  %5732 = vmatprep.mubr.bf16.mxu0 %v2909_v50 }
 0x3a5   : > { %v6252_v42 = vpop.eup %6251  ;;  %v2557_v59 = vmul.f32 1.442695, %v2458_v17  ;;  %v5307_v17 = vld [vmem:[%s582_s24] ss:$0 sm:$0xff] }
 0x3a6   : > { %6261 = vpow2.f32 %v2559_v15  ;;  %v2910_v5 = vpack.c.bf16 %v6250_v23, %v6252_v42  ;;  %3389 = vrot.lane.b32.xlu1 %v5307_v17, %s9772_s30  ;;  %v6572_v42 = vmov 0  }
 0x3a7   : > { %6263 = vpow2.f32 %v2557_v59  ;;  %v5691_v1 = vpop.f32.mrb[54].mxu1  ;;  %6124 = vset.pattern.permute.xlu0 %v6572_v42  ;;  %6123 = vset.pattern.permute.xlu1 %v6572_v42 }
 0x3a8   : > { %v6254_v25 = vpop.eup %6253  ;;  %v2563_v0 = vmul.f32 1.442695, %v5691_v1  ;;  %v2468_v8 = vpop.f32.mrb[55].mxu1  ;;  %5733 = vmatmul.mubr.bf16.gmra.mrb[28].mxu0 %v2910_v5 }
 0x3a9   : > { %v6256_v20 = vpop.eup %6255  ;;  %v2561_v31 = vmul.f32 1.442695, %v2468_v8 }
 0x3aa   : > { %6265 = vpow2.f32 %v2563_v0  ;;  %v2911_v62 = vpack.c.bf16 %v6254_v25, %v6256_v20 }
 0x3ab   : > { %6267 = vpow2.f32 %v2561_v31  ;;  %v5694_v7 = vpop.f32.mrb[56].mxu1 }
 0x3ac   : > { %v6258_v34 = vpop.eup %6257  ;;  %v2567_v10 = vmul.f32 1.442695, %v5694_v7  ;;  %v2478_v27 = vpop.f32.mrb[57].mxu1  ;;  %5736 = vmatprep.mubr.bf16.mxu0 %v2911_v62  ;;  %v3152_v62 = vld [vmem:[%s9709_s13] sm:$0x1] }
 0x3ad   : > { %v6260_v46 = vpop.eup %6259  ;;  %v2565_v22 = vmul.f32 1.442695, %v2478_v27 }
 0x3ae   : > { %6269 = vpow2.f32 %v2567_v10  ;;  %v2912_v58 = vpack.c.bf16 %v6258_v34, %v6260_v46 }
 0x3af   : > { %6271 = vpow2.f32 %v2565_v22  ;;  %v5697_v19 = vpop.f32.mrb[58].mxu1  ;;  %v3153_v22 = vmul.f32 0.001, %v3152_v62 }
 0x3b0   : > { %v6262_v43 = vpop.eup %6261  ;;  %v2571_v36 = vmul.f32 1.442695, %v5697_v19  ;;  %v2488_v52 = vpop.f32.mrb[59].mxu1  ;;  %5737 = vmatmul.mubr.bf16.gmra.mrb[32].mxu0 %v2912_v58  ;;  %v9784_v58 = vld [vmem:[#allocation2_spill] sm:$0xff] }
 0x3b1   : > { %v6264_v6 = vpop.eup %6263  ;;  %v2569_v51 = vmul.f32 1.442695, %v2488_v52  ;;  %v3157_v19 = vsub.s32 0, %v9784_v58 }
 0x3b2   : > { %6273 = vpow2.f32 %v2571_v36  ;;  %v2913_v29 = vpack.c.bf16 %v6262_v43, %v6264_v6 }
 0x3b3   : > { %6275 = vpow2.f32 %v2569_v51  ;;  %v5700_v28 = vpop.f32.mrb[60].mxu1 }
 0x3b4   : > { %v6266_v61 = vpop.eup %6265  ;;  %v2575_v9 = vmul.f32 1.442695, %v5700_v28  ;;  %v2498_v38 = vpop.f32.mrb[61].mxu1  ;;  %5740 = vmatprep.mubr.bf16.mxu0 %v2913_v29  ;;  %v8126_v29 = vrot.slane %v3153_v22, %v3157_v19 }
 0x3b5   : > { %v6268_v56 = vpop.eup %6267  ;;  %v2573_v12 = vmul.f32 1.442695, %v2498_v38 }
 0x3b6   : > { %6277 = vpow2.f32 %v2575_v9  ;;  %v2914_v54 = vpack.c.bf16 %v6266_v61, %v6268_v56 }
 0x3b7   : > { %6279 = vpow2.f32 %v2573_v12  ;;  %v5703_v3 = vpop.f32.mrb[62].mxu1 }
 0x3b8   : > { %v6270_v13 = vpop.eup %6269  ;;  %v2579_v26 = vmul.f32 1.442695, %v5703_v3  ;;  %v2508_v63 = vpop.f32.mrb[63].mxu1  ;;  %5741 = vmatmul.mubr.bf16.gmra.mrb[36].mxu0 %v2914_v54 }
 0x3b9   : > { %v6272_v2 = vpop.eup %6271  ;;  %v2577_v4 = vmul.f32 1.442695, %v2508_v63 }
 0x3ba   : > { %6281 = vpow2.f32 %v2579_v26  ;;  %v2915_v32 = vpack.c.bf16 %v6270_v13, %v6272_v2 }
 0x3bb   : > { %6283 = vpow2.f32 %v2577_v4 }
 0x3bc   : > { %v6274_v37 = vpop.eup %6273  ;;  %5744 = vmatprep.mubr.bf16.mxu0 %v2915_v32 }
 0x3bd   : > { %v6276_v39 = vpop.eup %6275 }
 0x3be   : > { %v2916_v41 = vpack.c.bf16 %v6274_v37, %v6276_v39 }
 0x3c0   : > { %v6278_v40 = vpop.eup %6277  ;;  %5745 = vmatmul.mubr.bf16.gmra.mrb[40].mxu0 %v2916_v41 }
 0x3c1   : > { %v6280_v21 = vpop.eup %6279 }
 0x3c2   : > { %v2917_v50 = vpack.c.bf16 %v6278_v40, %v6280_v21 }
 0x3c4   : > { %v6282_v30 = vpop.eup %6281  ;;  %5748 = vmatprep.mubr.bf16.mxu0 %v2917_v50 }
 0x3c5   : > { %v6284_v23 = vpop.eup %6283 }
 0x3c6   : > { %v2918_v15 = vpack.c.bf16 %v6282_v30, %v6284_v23 }
 0x3c8   : > { %5749 = vmatmul.mubr.bf16.gmra.mrb[44].mxu0 %v2918_v15 }
 0x463   : > { %v8098_v59 = vpop.f32.mrb[16].mxu0 }
 0x464   : > { %v3090_v5 = vadd.f32 0.001, %v8098_v59  ;;  %v8101_v1 = vpop.f32.mrb[17].mxu0 }
 0x465   : > { %v3088_v25 = vadd.f32 0.001, %v8101_v1  ;;  %v8104_v0 = vpop.f32.mrb[18].mxu0 }
 0x466   : > { %6285 = vrcp.f32 %v3090_v5  ;;  %v8106_v8 = vpop.f32.mrb[19].mxu0  ;;  %v3091_v20 = vadd.f32 0.001, %v8104_v0 }
 0x467   : > { %6287 = vrcp.f32 %v3088_v25  ;;  %v3089_v31 = vadd.f32 0.001, %v8106_v8 }
 0x469   : > { %6289 = vrcp.f32 %v3089_v31 }
 0x46a   : > { %6291 = vrcp.f32 %v3091_v20 }
 0x46b   : > { %v8113_v7 = vpop.f32.mrb[20].mxu0 }
 0x46c   : > { %v3094_v34 = vadd.f32 0.001, %v8113_v7  ;;  %v8116_v10 = vpop.f32.mrb[21].mxu0 }
 0x46d   : > { %v3092_v27 = vadd.f32 0.001, %v8116_v10  ;;  %v8119_v46 = vpop.f32.mrb[22].mxu0 }
 0x46e   : > { %6293 = vrcp.f32 %v3094_v34  ;;  %v3095_v43 = vadd.f32 0.001, %v8119_v46  ;;  %v8123_v36 = vpop.f32.mrb[23].mxu0 }
 0x46f   : > { %6295 = vrcp.f32 %v3092_v27  ;;  %v3093_v52 = vadd.f32 0.001, %v8123_v36 }
 0x470   : > { %v6286_v6 = vpop.eup %6285  ;;  %6297 = vrcp.f32 %v3095_v43 }
 0x471   : > { %v6288_v51 = vpop.eup %6287  ;;  %3204 = vperm.xlu1 %6123, %v6286_v6   ;;  %6299 = vrcp.f32 %v3093_v52 }
 0x472   : > { %3194 = vperm.xlu0 %6124, %v6288_v51  }
 0x473   : > { %v6290_v28 = vpop.eup %6289  ;;  %v5730_v61 = vpop.f32.mrb[24].mxu0 }
 0x474   : > { %v3098_v9 = vadd.f32 0.001, %v5730_v61  ;;  %v8129_v38 = vadd.f32 %v5730_v61, %v8126_v29  ;;  %v2993_v56 = vpop.f32.mrb[25].mxu0  ;;  %v6292_v12 = vpop.eup %6291 }
 0x475   : > { %v3096_v54 = vadd.f32 0.001, %v2993_v56  ;;  %v8132_v3 = vadd.f32 %v8126_v29, %v2993_v56  ;;  %3199 = vperm.xlu1 %6123, %v6290_v28   ;;  %v5731_v13 = vpop.f32.mrb[26].mxu0 }
 0x476   : > { %6301 = vrcp.f32 %v3098_v9  ;;  %v3099_v26 = vadd.f32 0.001, %v5731_v13  ;;  %v8135_v63 = vadd.f32 %v5731_v13, %v8126_v29  ;;  %3209 = vperm.xlu0 %6124, %v6292_v12   ;;  %v2996_v2 = vpop.f32.mrb[27].mxu0 }
 0x477   : > { %6303 = vrcp.f32 %v3096_v54  ;;  %v3097_v4 = vadd.f32 0.001, %v2996_v2  ;;  %v8138_v32 = vadd.f32 %v8126_v29, %v2996_v2 }
 0x478   : > { %v6294_v37 = vpop.eup %6293  ;;  %6305 = vrcp.f32 %v3099_v26 }
 0x479   : > { %v6296_v39 = vpop.eup %6295  ;;  %3224 = vperm.xlu1 %6123, %v6294_v37   ;;  %6307 = vrcp.f32 %v3097_v4 }
 0x47a   : > { %v6298_v41 = vpop.eup %6297 }
 0x47b   : > { %3229 = vperm.xlu0 %6124, %v6298_v41   ;;  %v5734_v40 = vpop.f32.mrb[28].mxu0  ;;  %v6300_v21 = vpop.eup %6299 }
 0x47c   : > { %v3102_v50 = vadd.f32 0.001, %v5734_v40  ;;  %v8141_v30 = vadd.f32 %v5734_v40, %v8126_v29  ;;  %v3009_v23 = vpop.f32.mrb[29].mxu0 }
 0x47d   : > { %v3100_v15 = vadd.f32 0.001, %v3009_v23  ;;  %v8144_v17 = vadd.f32 %v8126_v29, %v3009_v23  ;;  %3214 = vperm.xlu1 %6123, %v6296_v39   ;;  %v5735_v42 = vpop.f32.mrb[30].mxu0 }
 0x47e   : > { %6309 = vrcp.f32 %v3102_v50  ;;  %v3103_v5 = vadd.f32 0.001, %v5735_v42  ;;  %v8147_v25 = vadd.f32 %v5735_v42, %v8126_v29  ;;  %v3012_v20 = vpop.f32.mrb[31].mxu0 }
 0x47f   : > { %6311 = vrcp.f32 %v3100_v15  ;;  %3219 = vperm.xlu0 %6124, %v6300_v21   ;;  %v3101_v31 = vadd.f32 0.001, %v3012_v20  ;;  %v8150_v62 = vadd.f32 %v8126_v29, %v3012_v20 }
 0x480   : > { %v6302_v34 = vpop.eup %6301  ;;  %6313 = vrcp.f32 %v3103_v5 }
 0x481   : > { %v6304_v27 = vpop.eup %6303  ;;  %3244 = vperm.xlu1 %6123, %v6302_v34   ;;  %6315 = vrcp.f32 %v3101_v31 }
 0x482   : > { %v6306_v22 = vpop.eup %6305 }
 0x483   : > { %3249 = vperm.xlu0 %6124, %v6306_v22   ;;  %v5738_v58 = vpop.f32.mrb[32].mxu0  ;;  %v6308_v19 = vpop.eup %6307 }
 0x484   : > { %v3106_v43 = vadd.f32 0.001, %v5738_v58  ;;  %v8153_v52 = vadd.f32 %v5738_v58, %v8126_v29  ;;  %v3025_v6 = vpop.f32.mrb[33].mxu0 }
 0x485   : > { %v3104_v51 = vadd.f32 0.001, %v3025_v6  ;;  %v8156_v28 = vadd.f32 %v8126_v29, %v3025_v6  ;;  %3234 = vperm.xlu1 %6123, %v6304_v27   ;;  %v5739_v61 = vpop.f32.mrb[34].mxu0 }
 0x486   : > { %6317 = vrcp.f32 %v3106_v43  ;;  %v3107_v9 = vadd.f32 0.001, %v5739_v61  ;;  %v8159_v56 = vadd.f32 %v5739_v61, %v8126_v29  ;;  %v3028_v12 = vpop.f32.mrb[35].mxu0 }
 0x487   : > { %6319 = vrcp.f32 %v3104_v51  ;;  %3239 = vperm.xlu0 %6124, %v6308_v19   ;;  %v3105_v54 = vadd.f32 0.001, %v3028_v12  ;;  %v8162_v13 = vadd.f32 %v8126_v29, %v3028_v12 }
 0x488   : > { %v6310_v26 = vpop.eup %6309  ;;  %6321 = vrcp.f32 %v3107_v9 }
 0x489   : > { %v6312_v2 = vpop.eup %6311  ;;  %3264 = vperm.xlu1 %6123, %v6310_v26   ;;  %6323 = vrcp.f32 %v3105_v54 }
 0x48a   : > { %v6314_v4 = vpop.eup %6313 }
 0x48b   : > { %3269 = vperm.xlu0 %6124, %v6314_v4   ;;  %v5742_v37 = vpop.f32.mrb[36].mxu0  ;;  %v6316_v39 = vpop.eup %6315 }
 0x48c   : > { %v3110_v41 = vadd.f32 0.001, %v5742_v37  ;;  %v8165_v40 = vadd.f32 %v5742_v37, %v8126_v29  ;;  %v3041_v21 = vpop.f32.mrb[37].mxu0 }
 0x48d   : > { %v3108_v50 = vadd.f32 0.001, %v3041_v21  ;;  %v8168_v23 = vadd.f32 %v8126_v29, %v3041_v21  ;;  %3254 = vperm.xlu1 %6123, %v6312_v2   ;;  %v5743_v15 = vpop.f32.mrb[38].mxu0 }
 0x48e   : > { %6325 = vrcp.f32 %v3110_v41  ;;  %v3111_v42 = vadd.f32 0.001, %v5743_v15  ;;  %v8171_v5 = vadd.f32 %v5743_v15, %v8126_v29  ;;  %v3044_v20 = vpop.f32.mrb[39].mxu0 }
 0x48f   : > { %6327 = vrcp.f32 %v3108_v50  ;;  %3259 = vperm.xlu0 %6124, %v6316_v39   ;;  %v3109_v31 = vadd.f32 0.001, %v3044_v20  ;;  %v8174_v34 = vadd.f32 %v8126_v29, %v3044_v20 }
 0x490   : > { %v6318_v27 = vpop.eup %6317  ;;  %6329 = vrcp.f32 %v3111_v42 }
 0x491   : > { %v6320_v22 = vpop.eup %6319  ;;  %3284 = vperm.xlu1 %6123, %v6318_v27   ;;  %6331 = vrcp.f32 %v3109_v31 }
 0x492   : > { %v6322_v58 = vpop.eup %6321 }
 0x493   : > { %3289 = vperm.xlu0 %6124, %v6322_v58   ;;  %v5746_v19 = vpop.f32.mrb[40].mxu0  ;;  %v6324_v43 = vpop.eup %6323 }
 0x494   : > { %v3114_v6 = vadd.f32 0.001, %v5746_v19  ;;  %v8177_v51 = vadd.f32 %v5746_v19, %v8126_v29  ;;  %v3057_v61 = vpop.f32.mrb[41].mxu0 }
 0x495   : > { %v3112_v9 = vadd.f32 0.001, %v3057_v61  ;;  %v8180_v12 = vadd.f32 %v8126_v29, %v3057_v61  ;;  %3274 = vperm.xlu1 %6123, %v6320_v22   ;;  %v5747_v54 = vpop.f32.mrb[42].mxu0 }
 0x496   : > { %6333 = vrcp.f32 %v3114_v6  ;;  %v3115_v26 = vadd.f32 0.001, %v5747_v54  ;;  %v8183_v2 = vadd.f32 %v5747_v54, %v8126_v29  ;;  %v3060_v4 = vpop.f32.mrb[43].mxu0 }
 0x497   : > { %6335 = vrcp.f32 %v3112_v9  ;;  %3279 = vperm.xlu0 %6124, %v6324_v43   ;;  %v3113_v37 = vadd.f32 0.001, %v3060_v4  ;;  %v8186_v39 = vadd.f32 %v8126_v29, %v3060_v4 }
 0x498   : > { %v6326_v41 = vpop.eup %6325  ;;  %6337 = vrcp.f32 %v3115_v26 }
 0x499   : > { %v6328_v21 = vpop.eup %6327  ;;  %3304 = vperm.xlu1 %6123, %v6326_v41   ;;  %6339 = vrcp.f32 %v3113_v37 }
 0x49a   : > { %v6330_v50 = vpop.eup %6329 }
 0x49b   : > { %3309 = vperm.xlu0 %6124, %v6330_v50   ;;  %v5750_v15 = vpop.f32.mrb[44].mxu0  ;;  %v6332_v42 = vpop.eup %6331 }
 0x49c   : > { %v3118_v20 = vadd.f32 0.001, %v5750_v15  ;;  %v8189_v31 = vadd.f32 %v5750_v15, %v8126_v29  ;;  %v3073_v27 = vpop.f32.mrb[45].mxu0 }
 0x49d   : > { %v3116_v22 = vadd.f32 0.001, %v3073_v27  ;;  %v8192_v58 = vadd.f32 %v8126_v29, %v3073_v27  ;;  %3294 = vperm.xlu1 %6123, %v6328_v21   ;;  %v5751_v19 = vpop.f32.mrb[46].mxu0  ;;  %v3162_v27 = vadd.f32 %v8098_v59, %v8126_v29 }
 0x49e   : > { %6341 = vrcp.f32 %v3118_v20  ;;  %v3119_v43 = vadd.f32 0.001, %v5751_v19  ;;  %v8195_v6 = vadd.f32 %v5751_v19, %v8126_v29  ;;  %v3076_v61 = vpop.f32.mrb[47].mxu0  ;;  %v8200_v20 = vpop.permute.xlu1 %3389 }
 0x49f   : > { %6343 = vrcp.f32 %v3116_v22  ;;  %3299 = vperm.xlu0 %6124, %v6332_v42   ;;  %v3117_v9 = vadd.f32 0.001, %v3076_v61  ;;  %v8198_v54 = vadd.f32 %v8126_v29, %v3076_v61  ;;  %v3776_v61 = vld [vmem:[%s9707_s11] sm:$0xff] }
 0x4a0   : > { %v6334_v26 = vpop.eup %6333  ;;  %6345 = vrcp.f32 %v3119_v43 }
 0x4a1   : > { %v6336_v4 = vpop.eup %6335  ;;  %3324 = vperm.xlu1 %6123, %v6334_v26   ;;  %6347 = vrcp.f32 %v3117_v9  ;;  %v3777_v9 = vld [vmem:[%s9707_s11 + $0x8] sm:$0xff]  ;;  %v3163_v26 = vadd.f32 %v8104_v0, %v8126_v29 }
 0x4a2   : > { %v6338_v37 = vpop.eup %6337  ;;  %v5860_v59 = vpack.c.bf16 %v3777_v9, %v3776_v61 }
 0x4a3   : > { %3329 = vperm.xlu0 %6124, %v6338_v37   ;;  %v6340_v41 = vpop.eup %6339 }
 0x4a4   : > { %5861 = vmatprep.subr.bf16.mxu0 %v5860_v59 }
 0x4a5   : > { %3314 = vperm.xlu1 %6123, %v6336_v4   ;;  %5863 = vmatpush3.bf16.msra.mxu0 %v5860_v59  ;;  %v3166_v59 = vadd.f32 %v8113_v7, %v8126_v29 }
 0x4a7   : > { %3319 = vperm.xlu0 %6124, %v6340_v41   ;;  %v3160_v41 = vadd.f32 %v8126_v29, %v8101_v1 }
 0x4a8   : > { %v6342_v21 = vpop.eup %6341 }
 0x4a9   : > { %v6344_v50 = vpop.eup %6343  ;;  %3344 = vperm.xlu1 %6123, %v6342_v21  }
 0x4aa   : > { %v6346_v15 = vpop.eup %6345 }
 0x4ab   : > { %3349 = vperm.xlu0 %6124, %v6346_v15   ;;  %v6348_v42 = vpop.eup %6347 }
 0x4ad   : > { %3334 = vperm.xlu1 %6123, %v6344_v50   ;;  %v3161_v50 = vadd.f32 %v8126_v29, %v8106_v8 }
 0x4af   : > { %3339 = vperm.xlu0 %6124, %v6348_v42  }
 0x4f0   : > { %v3205_v22 = vpop.permute.xlu1 %3204 }
 0x4f1   : > { %v8204_v19 = vmul.f32 %v3205_v22, %v3162_v27  ;;  %v3195_v43 = vpop.permute.xlu0 %3194 }
 0x4f2   : > { %v3352_v21 = vmul.f32 %v3195_v43, %v3160_v41 }
 0x4f3   : > { %3821 = vrot.lane.b32.xlu1 %v8204_v19, %s6573_s28  ;;  %4367 = vrot.lane.b32.xlu0 %v8204_v19, %s9772_s30  ;;  %v8241_v15 = vsub.f32 %v8204_v19, %v8200_v20 }
 0x4f4   : > { %v3200_v0 = vpop.permute.xlu1 %3199  ;;  %v8249_v42 = vsub.f32 %v3352_v21, %v8200_v20 }
 0x4f5   : > { %v3210_v4 = vpop.permute.xlu0 %3209  ;;  %v8234_v1 = vmul.f32 %v3200_v0, %v3161_v50  ;;  %v3426_v8 = vmul.f32 %v8241_v15, %v8241_v15 }
 0x4f6   : > { %v8218_v37 = vmul.f32 %v3210_v4, %v3163_v26  ;;  %v3424_v22 = vmul.f32 %v8249_v42, %v8249_v42 }
 0x4f7   : > { %4463 = vrot.lane.b32.xlu0 %v8204_v19, %s6574_s29  ;;  %v8264_v9 = vsub.f32 %v8234_v1, %v8200_v20 }
 0x4f8   : > { %3823 = vrot.lane.b32.xlu1 %v8218_v37, %s6573_s28  ;;  %v8253_v27 = vsub.f32 %v8218_v37, %v8200_v20  ;;  %v3225_v43 = vpop.permute.xlu1 %3224 }
 0x4f9   : > { %v8270_v26 = vmul.f32 %v3225_v43, %v3166_v59  ;;  %v3425_v4 = vmul.f32 %v8264_v9, %v8264_v9 }
 0x4fa   : > { %v3427_v61 = vmul.f32 %v8253_v27, %v8253_v27  ;;  %v3230_v41 = vpop.permute.xlu0 %3229 }
 0x4fb   : > { %3817 = vrot.lane.b32.xlu0 %v3352_v21, %s6573_s28 }
 0x4fc   : > { %4369 = vrot.lane.b32.xlu1 %v8218_v37, %s9772_s30  ;;  %v3215_v7 = vpop.permute.xlu1 %3214 }
 0x4fe   : > { %v3220_v50 = vpop.permute.xlu0 %3219 }
 0x4ff   : > { %4363 = vrot.lane.b32.xlu0 %v3352_v21, %s9772_s30 }
 0x500   : > { %4465 = vrot.lane.b32.xlu1 %v8218_v37, %s6574_s29 }
 0x502   : > { %v3250_v43 = vpop.permute.xlu0 %3249 }
 0x503   : > { %4459 = vrot.lane.b32.xlu0 %v3352_v21, %s6574_s29  ;;  %v8345_v60 = vmul.f32 %v3250_v43, %v8135_v63 }
 0x504   : > { %3819 = vrot.lane.b32.xlu1 %v8234_v1, %s6573_s28 }
 0x505   : > { %v8401_v45 = vsub.f32 %v8345_v60, %v8200_v20 }
 0x507   : > { %4683 = vrot.lane.b32.xlu0 %v3352_v21, %s6575_s26  ;;  %v3167_v21 = vadd.f32 %v8119_v46, %v8126_v29  ;;  %9790 = vst [vmem:[#allocation23_spill] sm:$0xff] %v8401_v45  ;;  %v3435_v49 = vmul.f32 %v8401_v45, %v8401_v45 }
 0x508   : > { %4365 = vrot.lane.b32.xlu1 %v8234_v1, %s9772_s30 }
 0x509   : > { %v8279_v0 = vmul.f32 %v3230_v41, %v3167_v21  ;;  %v8307_v41 = vsub.f32 %v8270_v26, %v8200_v20 }
 0x50b   : > { %3492 = vrot.lane.b32.xlu0 %v3426_v8, %s9775_s20  ;;  %v3164_v8 = vadd.f32 %v8126_v29, %v8116_v10  ;;  %v8321_v21 = vsub.f32 %v8279_v0, %v8200_v20 }
 0x50c   : > { %4461 = vrot.lane.b32.xlu1 %v8234_v1, %s6574_s29 }
 0x50d   : > { %v8291_v46 = vmul.f32 %v3215_v7, %v3164_v8  ;;  %9786 = vst [vmem:[#allocation19_spill] sm:$0xff] %v8321_v21 }
 0x50f   : > { %3488 = vrot.lane.b32.xlu0 %v3424_v22, %s9775_s20  ;;  %v3245_v22 = vpop.permute.xlu1 %3244 }
 0x510   : > { %3494 = vrot.lane.b32.xlu1 %v3427_v61, %s9775_s20  ;;  %v3165_v61 = vadd.f32 %v8126_v29, %v8123_v36  ;;  %v3430_v36 = vmul.f32 %v8307_v41, %v8307_v41  ;;  %v8317_v29 = vsub.f32 %v8291_v46, %v8200_v20  ;;  %v8337_v24 = vmul.f32 %v3245_v22, %v8129_v38 }
 0x512   : > { %v8299_v10 = vmul.f32 %v3220_v50, %v3165_v61  ;;  %9785 = vst [vmem:[#allocation2_spill] sm:$0xff] %v8317_v29  ;;  %v3428_v8 = vmul.f32 %v8317_v29, %v8317_v29  ;;  %v3431_v61 = vmul.f32 %v8321_v21, %v8321_v21 }
 0x513   : > { %3829 = vrot.lane.b32.xlu0 %v8270_v26, %s6573_s28  ;;  %v3235_v59 = vpop.permute.xlu1 %3234 }
 0x514   : > { %3490 = vrot.lane.b32.xlu1 %v3425_v4, %s9775_s20  ;;  %v3240_v4 = vpop.permute.xlu0 %3239  ;;  %v8332_v33 = vsub.f32 %v8299_v10, %v8200_v20 }
 0x515   : > { %v8371_v22 = vmul.f32 %v3240_v4, %v8138_v32 }
 0x516   : > { %9787 = vst [vmem:[#allocation20_spill] sm:$0xff] %v8332_v33  ;;  %v3429_v18 = vmul.f32 %v8332_v33, %v8332_v33 }
 0x517   : > { %4375 = vrot.lane.b32.xlu0 %v8270_v26, %s9772_s30  ;;  %v3265_v7 = vpop.permute.xlu1 %3264  ;;  %v8412_v44 = vsub.f32 %v8371_v22, %v8200_v20 }
 0x518   : > { %3831 = vrot.lane.b32.xlu1 %v8279_v0, %s6573_s28  ;;  %v3270_v50 = vpop.permute.xlu0 %3269 }
 0x519   : > { %9791 = vst [vmem:[#allocation24_spill] sm:$0xff] %v8412_v44  ;;  %v3433_v55 = vmul.f32 %v8412_v44, %v8412_v44 }
 0x51b   : > { %4471 = vrot.lane.b32.xlu0 %v8270_v26, %s6574_s29 }
 0x51c   : > { %4377 = vrot.lane.b32.xlu1 %v8279_v0, %s9772_s30  ;;  %v3260_v14 = vpop.permute.xlu0 %3259 }
 0x51f   : > { %3825 = vrot.lane.b32.xlu0 %v8291_v46, %s6573_s28 }
 0x520   : > { %4473 = vrot.lane.b32.xlu1 %v8279_v0, %s6574_s29 }
 0x523   : > { %4371 = vrot.lane.b32.xlu0 %v8291_v46, %s9772_s30 }
 0x524   : > { %3827 = vrot.lane.b32.xlu1 %v8299_v10, %s6573_s28 }
 0x527   : > { %4467 = vrot.lane.b32.xlu0 %v8291_v46, %s6574_s29 }
 0x528   : > { %4373 = vrot.lane.b32.xlu1 %v8299_v10, %s9772_s30 }
 0x52b   : > { %3500 = vrot.lane.b32.xlu0 %v3430_v36, %s9775_s20  ;;  %v3255_v36 = vpop.permute.xlu1 %3254 }
 0x52c   : > { %4469 = vrot.lane.b32.xlu1 %v8299_v10, %s6574_s29 }
 0x52f   : > { %3496 = vrot.lane.b32.xlu0 %v3428_v8, %s9775_s20  ;;  %v8347_v11 = vpop.permute.xlu1 %3284  ;;  %v8349_v8 = vpop.permute.xlu0 %3289 }
 0x530   : > { %3502 = vrot.lane.b32.xlu1 %v3431_v61, %s9775_s20 }
 0x533   : > { %3837 = vrot.lane.b32.xlu0 %v8337_v24, %s6573_s28  ;;  %v8362_v38 = vpop.permute.xlu1 %3274  ;;  %v8364_v63 = vpop.permute.xlu0 %3279 }
 0x534   : > { %3498 = vrot.lane.b32.xlu1 %v3429_v18, %s9775_s20  ;;  %v8360_v18 = vmul.f32 %v3235_v59, %v8132_v3  ;;  %v8383_v3 = vsub.f32 %v8337_v24, %v8200_v20 }
 0x536   : > { %9788 = vst [vmem:[#allocation21_spill] sm:$0xff] %v8383_v3  ;;  %v3434_v4 = vmul.f32 %v8383_v3, %v8383_v3  ;;  %v8397_v57 = vsub.f32 %v8360_v18, %v8200_v20 }
 0x537   : > { %4383 = vrot.lane.b32.xlu0 %v8337_v24, %s9772_s30  ;;  %v8373_v43 = vpop.permute.xlu1 %3304  ;;  %v8375_v61 = vpop.permute.xlu0 %3309 }
 0x538   : > { %3839 = vrot.lane.b32.xlu1 %v8345_v60, %s6573_s28  ;;  %9789 = vst [vmem:[#allocation22_spill] sm:$0xff] %v8397_v57  ;;  %v3432_v53 = vmul.f32 %v8397_v57, %v8397_v57  ;;  %v8433_v57 = vmul.f32 %v3270_v50, %v8147_v25 }
 0x53a   : > { %v8485_v45 = vsub.f32 %v8433_v57, %v8200_v20 }
 0x53b   : > { %4479 = vrot.lane.b32.xlu0 %v8337_v24, %s6574_s29  ;;  %v8389_v32 = vpop.permute.xlu1 %3294  ;;  %v8391_v59 = vpop.permute.xlu0 %3299 }
 0x53c   : > { %4385 = vrot.lane.b32.xlu1 %v8345_v60, %s9772_s30  ;;  %9796 = vst [vmem:[#allocation29_spill] sm:$0xff] %v8485_v45  ;;  %v3439_v33 = vmul.f32 %v8485_v45, %v8485_v45 }
 0x53f   : > { %3833 = vrot.lane.b32.xlu0 %v8360_v18, %s6573_s28  ;;  %v8414_v48 = vpop.permute.xlu1 %3324  ;;  %v8416_v16 = vpop.permute.xlu0 %3329 }
 0x540   : > { %4481 = vrot.lane.b32.xlu1 %v8345_v60, %s6574_s29 }
 0x543   : > { %4379 = vrot.lane.b32.xlu0 %v8360_v18, %s9772_s30  ;;  %v8428_v35 = vpop.permute.xlu1 %3314  ;;  %v8430_v47 = vpop.permute.xlu0 %3319 }
 0x544   : > { %3835 = vrot.lane.b32.xlu1 %v8371_v22, %s6573_s28 }
 0x547   : > { %4475 = vrot.lane.b32.xlu0 %v8360_v18, %s6574_s29 }
 0x548   : > { %4381 = vrot.lane.b32.xlu1 %v8371_v22, %s9772_s30 }
 0x54b   : > { %3508 = vrot.lane.b32.xlu0 %v3434_v4, %s9775_s20  ;;  %v8421_v4 = vmul.f32 %v3265_v7, %v8141_v30  ;;  %v8459_v7 = vmul.f32 %v3260_v14, %v8150_v62 }
 0x54c   : > { %4477 = vrot.lane.b32.xlu1 %v8371_v22, %s6574_s29 }
 0x54d   : > { %v8499_v29 = vsub.f32 %v8459_v7, %v8200_v20 }
 0x54f   : > { %3504 = vrot.lane.b32.xlu0 %v3432_v53, %s9775_s20  ;;  %v8439_v53 = vpop.permute.xlu1 %3344  ;;  %9798 = vst [vmem:[#allocation31_spill] sm:$0xff] %v8499_v29 }
 0x550   : > { %3510 = vrot.lane.b32.xlu1 %v3435_v49, %s9775_s20  ;;  %v8441_v49 = vpop.permute.xlu0 %3349 }
 0x553   : > { %3845 = vrot.lane.b32.xlu0 %v8421_v4, %s6573_s28  ;;  %v8454_v30 = vpop.permute.xlu1 %3334 }
 0x554   : > { %3506 = vrot.lane.b32.xlu1 %v3433_v55, %s9775_s20  ;;  %v8448_v55 = vmul.f32 %v3255_v36, %v8144_v17  ;;  %v8456_v25 = vpop.permute.xlu0 %3339  ;;  %v8469_v36 = vsub.f32 %v8421_v4, %v8200_v20 }
 0x556   : > { %9793 = vst [vmem:[#allocation26_spill] sm:$0xff] %v8469_v36  ;;  %v3438_v62 = vmul.f32 %v8469_v36, %v8469_v36  ;;  %v8481_v44 = vsub.f32 %v8448_v55, %v8200_v20 }
 0x557   : > { %4391 = vrot.lane.b32.xlu0 %v8421_v4, %s9772_s30 }
 0x558   : > { %3847 = vrot.lane.b32.xlu1 %v8433_v57, %s6573_s28  ;;  %9795 = vst [vmem:[#allocation28_spill] sm:$0xff] %v8481_v44 }
 0x55b   : > { %4487 = vrot.lane.b32.xlu0 %v8421_v4, %s6574_s29 }
 0x55c   : > { %4393 = vrot.lane.b32.xlu1 %v8433_v57, %s9772_s30 }
 0x55f   : > { %3841 = vrot.lane.b32.xlu0 %v8448_v55, %s6573_s28 }
 0x560   : > { %4489 = vrot.lane.b32.xlu1 %v8433_v57, %s6574_s29 }
 0x563   : > { %4387 = vrot.lane.b32.xlu0 %v8448_v55, %s9772_s30 }
 0x564   : > { %3843 = vrot.lane.b32.xlu1 %v8459_v7, %s6573_s28 }
 0x565   : > { %v3822_v17 = vpop.permute.xlu1 %3821  ;;  %v8465_v50 = vpop.permute.xlu0 %4367 }
 0x566   : > { %9792 = vst [vmem:[#allocation25_spill] sm:$0xff] %v8465_v50 }
 0x567   : > { %4483 = vrot.lane.b32.xlu0 %v8448_v55, %s6574_s29 }
 0x568   : > { %4389 = vrot.lane.b32.xlu1 %v8459_v7, %s9772_s30 }
 0x569   : > { %v8475_v14 = vpop.permute.xlu0 %4463 }
 0x56a   : > { %9794 = vst [vmem:[#allocation27_spill] sm:$0xff] %v8475_v14  ;;  %v3824_v50 = vpop.permute.xlu1 %3823  ;;  %v3436_v14 = vmul.f32 %v8481_v44, %v8481_v44 }
 0x56b   : > { %3516 = vrot.lane.b32.xlu0 %v3438_v62, %s9775_s20  ;;  %v8505_v62 = vmul.f32 %v8347_v11, %v8153_v52 }
 0x56c   : > { %4485 = vrot.lane.b32.xlu1 %v8459_v7, %s6574_s29 }
 0x56d   : > { %v3818_v3 = vpop.permute.xlu0 %3817 }
 0x56e   : > { %v8492_v36 = vpop.permute.xlu1 %4369  ;;  %5756 = vmatprep.mubr.msk.f32.mxu0 %vm3881_vm14, %v3818_v3  ;;  %v3437_v3 = vmul.f32 %v8499_v29, %v8499_v29 }
 0x56f   : > { %9797 = vst [vmem:[#allocation30_spill] sm:$0xff] %v8492_v36  ;;  %3512 = vrot.lane.b32.xlu0 %v3436_v14, %s9775_s20 }
 0x570   : > { %3518 = vrot.lane.b32.xlu1 %v3439_v33, %s9775_s20  ;;  %v8520_v33 = vmul.f32 %v8349_v8, %v8159_v56  ;;  %v8539_v56 = vmul.f32 %v8362_v38, %v8156_v28  ;;  %v8563_v38 = vsub.f32 %v8505_v62, %v8200_v20 }
 0x571   : > { %v8507_v44 = vpop.permute.xlu0 %4363 }
 0x572   : > { %9799 = vst [vmem:[#allocation32_spill] sm:$0xff] %v8507_v44  ;;  %v8509_v36 = vpop.permute.xlu1 %4465  ;;  %9805 = vst [vmem:[#allocation38_spill] sm:$0xff] %v8563_v38 }
 0x573   : > { %9800 = vst [vmem:[#allocation33_spill] sm:$0xff] %v8509_v36  ;;  %3853 = vrot.lane.b32.xlu0 %v8505_v62, %s6573_s28  ;;  %v8577_v36 = vsub.f32 %v8539_v56, %v8200_v20 }
 0x574   : > { %3514 = vrot.lane.b32.xlu1 %v3437_v3, %s9775_s20 }
 0x575   : > { %v8516_v45 = vpop.permute.xlu0 %4459  ;;  %9807 = vst [vmem:[#allocation40_spill] sm:$0xff] %v8577_v36 }
 0x576   : > { %9801 = vst [vmem:[#allocation34_spill] sm:$0xff] %v8516_v45  ;;  %v3820_v11 = vpop.permute.xlu1 %3819 }
 0x577   : > { %4399 = vrot.lane.b32.xlu0 %v8505_v62, %s9772_s30  ;;  %5757 = vmatmul.mubr.msk.f32.vlgmr.msra.gmra.mrb[48].mxu0 %vm3881_vm14, %v3820_v11 }
 0x578   : > { %3855 = vrot.lane.b32.xlu1 %v8520_v33, %s6573_s28  ;;  %5759 = vmatprep.mubr.msk.f32.mxu0 %vm3881_vm14, %v3822_v17 }
 0x579   : > { %v8528_v52 = vpop.permute.xlu0 %4683 }
 0x57a   : > { %9802 = vst [vmem:[#allocation35_spill] sm:$0xff] %v8528_v52  ;;  %v8530_v14 = vpop.permute.xlu1 %4365 }
 0x57b   : > { %9803 = vst [vmem:[#allocation36_spill] sm:$0xff] %v8530_v14  ;;  %4495 = vrot.lane.b32.xlu0 %v8505_v62, %s6574_s29  ;;  %5760 = vmatmul.mubr.msk.f32.gmra.mrb[50].mxu0 %vm3881_vm14, %v3824_v50  ;;  %v8553_v50 = vmul.f32 %v8364_v63, %v8162_v13  ;;  %v3442_v63 = vmul.f32 %v8563_v38, %v8563_v38 }
 0x57c   : > { %4401 = vrot.lane.b32.xlu1 %v8520_v33, %s9772_s30 }
 0x57d   : > { %v8541_v8 = vpop.permute.xlu0 %3492  ;;  %v8596_v29 = vsub.f32 %v8553_v50, %v8200_v20 }
 0x57e   : > { %v8543_v3 = vpop.permute.xlu1 %4461 }
 0x57f   : > { %9804 = vst [vmem:[#allocation37_spill] sm:$0xff] %v8543_v3  ;;  %3849 = vrot.lane.b32.xlu0 %v8539_v56, %s6573_s28  ;;  %v8581_v3 = vsub.f32 %v8520_v33, %v8200_v20  ;;  %9811 = vst [vmem:[#allocation44_spill] sm:$0xff] %v8596_v29 }
 0x580   : > { %4497 = vrot.lane.b32.xlu1 %v8520_v33, %s6574_s29 }
 0x581   : > { %v8549_v17 = vpop.permute.xlu0 %3488  ;;  %9808 = vst [vmem:[#allocation41_spill] sm:$0xff] %v8581_v3  ;;  %v3443_v38 = vmul.f32 %v8581_v3, %v8581_v3 }
 0x582   : > { %v8555_v11 = vpop.permute.xlu1 %3494 }
 0x583   : > { %4395 = vrot.lane.b32.xlu0 %v8539_v56, %s9772_s30 }
 0x584   : > { %3851 = vrot.lane.b32.xlu1 %v8553_v50, %s6573_s28 }
 0x585   : > { %v3830_v28 = vpop.permute.xlu0 %3829 }
 0x586   : > { %v8565_v52 = vpop.permute.xlu1 %3490 }
 0x587   : > { %4491 = vrot.lane.b32.xlu0 %v8539_v56, %s6574_s29 }
 0x588   : > { %4397 = vrot.lane.b32.xlu1 %v8553_v50, %s9772_s30 }
 0x589   : > { %v8571_v13 = vpop.permute.xlu0 %4375 }
 0x58a   : > { %9806 = vst [vmem:[#allocation39_spill] sm:$0xff] %v8571_v13  ;;  %v3832_v45 = vpop.permute.xlu1 %3831  ;;  %v3440_v13 = vmul.f32 %v8577_v36, %v8577_v36 }
 0x58b   : > { %3524 = vrot.lane.b32.xlu0 %v3442_v63, %s9775_s20  ;;  %v8602_v63 = vmul.f32 %v8373_v43, %v8165_v40 }
 0x58c   : > { %4493 = vrot.lane.b32.xlu1 %v8553_v50, %s6574_s29 }
 0x58d   : > { %v8586_v44 = vpop.permute.xlu0 %4471 }
 0x58e   : > { %9809 = vst [vmem:[#allocation42_spill] sm:$0xff] %v8586_v44  ;;  %v8590_v14 = vpop.permute.xlu1 %4377 }
 0x58f   : > { %9810 = vst [vmem:[#allocation43_spill] sm:$0xff] %v8590_v14  ;;  %3520 = vrot.lane.b32.xlu0 %v3440_v13, %s9775_s20  ;;  %v3441_v14 = vmul.f32 %v8596_v29, %v8596_v29 }
 0x590   : > { %3526 = vrot.lane.b32.xlu1 %v3443_v38, %s9775_s20  ;;  %v8616_v38 = vmul.f32 %v8375_v61, %v8171_v5  ;;  %v8635_v5 = vmul.f32 %v8389_v32, %v8168_v23  ;;  %v8659_v32 = vsub.f32 %v8602_v63, %v8200_v20 }
 0x591   : > { %v3826_v44 = vpop.permute.xlu0 %3825 }
 0x592   : > { %v8604_v21 = vpop.permute.xlu1 %4473  ;;  %5762 = vmatprep.mubr.msk.f32.mxu0 %vm3881_vm14, %v3826_v44  ;;  %9817 = vst [vmem:[#allocation50_spill] sm:$0xff] %v8659_v32 }
 0x593   : > { %9812 = vst [vmem:[#allocation45_spill] sm:$0xff] %v8604_v21  ;;  %3861 = vrot.lane.b32.xlu0 %v8602_v63, %s6573_s28 }
 0x594   : > { %3522 = vrot.lane.b32.xlu1 %v3441_v14, %s9775_s20 }
 0x595   : > { %v8612_v13 = vpop.permute.xlu0 %4371 }
 0x596   : > { %9813 = vst [vmem:[#allocation46_spill] sm:$0xff] %v8612_v13  ;;  %v3828_v40 = vpop.permute.xlu1 %3827  ;;  %v8677_v13 = vsub.f32 %v8616_v38, %v8200_v20 }
 0x597   : > { %4407 = vrot.lane.b32.xlu0 %v8602_v63, %s9772_s30  ;;  %5763 = vmatmul.mubr.msk.f32.gmra.mrb[52].mxu0 %vm3881_vm14, %v3828_v40 }
 0x598   : > { %3863 = vrot.lane.b32.xlu1 %v8616_v38, %s6573_s28  ;;  %5765 = vmatprep.mubr.msk.f32.mxu0 %vm3881_vm14, %v3830_v28  ;;  %9820 = vst [vmem:[#allocation53_spill] sm:$0xff] %v8677_v13  ;;  %v3447_v29 = vmul.f32 %v8677_v13, %v8677_v13 }
 0x599   : > { %v8624_v44 = vpop.permute.xlu0 %4467 }
 0x59a   : > { %9814 = vst [vmem:[#allocation47_spill] sm:$0xff] %v8624_v44  ;;  %v8626_v43 = vpop.permute.xlu1 %4373  ;;  %v8673_v44 = vsub.f32 %v8635_v5, %v8200_v20 }
 0x59b   : > { %9815 = vst [vmem:[#allocation48_spill] sm:$0xff] %v8626_v43  ;;  %4503 = vrot.lane.b32.xlu0 %v8602_v63, %s6574_s29  ;;  %5766 = vmatmul.mubr.msk.f32.gmra.mrb[54].mxu0 %vm3881_vm14, %v3832_v45  ;;  %v8649_v45 = vmul.f32 %v8391_v59, %v8174_v34  ;;  %v3446_v59 = vmul.f32 %v8659_v32, %v8659_v32 }
 0x59c   : > { %4409 = vrot.lane.b32.xlu1 %v8616_v38, %s9772_s30  ;;  %9819 = vst [vmem:[#allocation52_spill] sm:$0xff] %v8673_v44 }
 0x59d   : > { %v8637_v61 = vpop.permute.xlu0 %3500  ;;  %v8692_v36 = vsub.f32 %v8649_v45, %v8200_v20 }
 0x59e   : > { %v8639_v14 = vpop.permute.xlu1 %4469 }
 0x59f   : > { %9816 = vst [vmem:[#allocation49_spill] sm:$0xff] %v8639_v14  ;;  %3857 = vrot.lane.b32.xlu0 %v8635_v5, %s6573_s28  ;;  %9823 = vst [vmem:[#allocation56_spill] sm:$0xff] %v8692_v36 }
 0x5a0   : > { %4505 = vrot.lane.b32.xlu1 %v8616_v38, %s6574_s29 }
 0x5a1   : > { %v8645_v28 = vpop.permute.xlu0 %3496 }
 0x5a2   : > { %v8651_v40 = vpop.permute.xlu1 %3502 }
 0x5a3   : > { %4403 = vrot.lane.b32.xlu0 %v8635_v5, %s9772_s30 }
 0x5a4   : > { %3859 = vrot.lane.b32.xlu1 %v8649_v45, %s6573_s28 }
 0x5a5   : > { %v3838_v23 = vpop.permute.xlu0 %3837 }
 0x5a6   : > { %v8661_v21 = vpop.permute.xlu1 %3498 }
 0x5a7   : > { %4499 = vrot.lane.b32.xlu0 %v8635_v5, %s6574_s29 }
 0x5a8   : > { %4405 = vrot.lane.b32.xlu1 %v8649_v45, %s9772_s30 }
 0x5a9   : > { %v8667_v34 = vpop.permute.xlu0 %4383 }
 0x5aa   : > { %9818 = vst [vmem:[#allocation51_spill] sm:$0xff] %v8667_v34  ;;  %v3840_v14 = vpop.permute.xlu1 %3839  ;;  %v3444_v34 = vmul.f32 %v8673_v44, %v8673_v44 }
 0x5ab   : > { %3532 = vrot.lane.b32.xlu0 %v3446_v59, %s9775_s20  ;;  %v8698_v59 = vmul.f32 %v8414_v48, %v8177_v51 }
 0x5ac   : > { %4501 = vrot.lane.b32.xlu1 %v8649_v45, %s6574_s29 }
 0x5ad   : > { %v8682_v43 = vpop.permute.xlu0 %4479 }
 0x5ae   : > { %9821 = vst [vmem:[#allocation54_spill] sm:$0xff] %v8682_v43  ;;  %v8686_v32 = vpop.permute.xlu1 %4385 }
 0x5af   : > { %9822 = vst [vmem:[#allocation55_spill] sm:$0xff] %v8686_v32  ;;  %3528 = vrot.lane.b32.xlu0 %v3444_v34, %s9775_s20  ;;  %v3445_v32 = vmul.f32 %v8692_v36, %v8692_v36 }
 0x5b0   : > { %3534 = vrot.lane.b32.xlu1 %v3447_v29, %s9775_s20  ;;  %v8712_v29 = vmul.f32 %v8416_v16, %v8183_v2  ;;  %v8731_v16 = vmul.f32 %v8428_v35, %v8180_v12  ;;  %v8755_v12 = vsub.f32 %v8698_v59, %v8200_v20 }
 0x5b1   : > { %v3834_v43 = vpop.permute.xlu0 %3833 }
 0x5b2   : > { %v8700_v3 = vpop.permute.xlu1 %4481  ;;  %5768 = vmatprep.mubr.msk.f32.mxu0 %vm3881_vm14, %v3834_v43  ;;  %9829 = vst [vmem:[#allocation62_spill] sm:$0xff] %v8755_v12 }
 0x5b3   : > { %9824 = vst [vmem:[#allocation57_spill] sm:$0xff] %v8700_v3  ;;  %3869 = vrot.lane.b32.xlu0 %v8698_v59, %s6573_s28 }
 0x5b4   : > { %3530 = vrot.lane.b32.xlu1 %v3445_v32, %s9775_s20 }
 0x5b5   : > { %v8708_v34 = vpop.permute.xlu0 %4379 }
 0x5b6   : > { %9825 = vst [vmem:[#allocation58_spill] sm:$0xff] %v8708_v34  ;;  %v3836_v48 = vpop.permute.xlu1 %3835 }
 0x5b7   : > { %4415 = vrot.lane.b32.xlu0 %v8698_v59, %s9772_s30  ;;  %5769 = vmatmul.mubr.msk.f32.gmra.mrb[56].mxu0 %vm3881_vm14, %v3836_v48 }
 0x5b8   : > { %3871 = vrot.lane.b32.xlu1 %v8712_v29, %s6573_s28  ;;  %5771 = vmatprep.mubr.msk.f32.mxu0 %vm3881_vm14, %v3838_v23 }
 0x5b9   : > { %v8720_v51 = vpop.permute.xlu0 %4475 }
 0x5ba   : > { %9826 = vst [vmem:[#allocation59_spill] sm:$0xff] %v8720_v51  ;;  %v8722_v43 = vpop.permute.xlu1 %4381  ;;  %v8769_v51 = vsub.f32 %v8731_v16, %v8200_v20 }
 0x5bb   : > { %9827 = vst [vmem:[#allocation60_spill] sm:$0xff] %v8722_v43  ;;  %4511 = vrot.lane.b32.xlu0 %v8698_v59, %s6574_s29  ;;  %5772 = vmatmul.mubr.msk.f32.gmra.mrb[58].mxu0 %vm3881_vm14, %v3840_v14  ;;  %v8745_v14 = vmul.f32 %v8430_v47, %v8186_v39  ;;  %v3450_v39 = vmul.f32 %v8755_v12, %v8755_v12 }
 0x5bc   : > { %4417 = vrot.lane.b32.xlu1 %v8712_v29, %s9772_s30  ;;  %v8773_v43 = vsub.f32 %v8712_v29, %v8200_v20 }
 0x5bd   : > { %v8733_v2 = vpop.permute.xlu0 %3508  ;;  %v8788_v44 = vsub.f32 %v8745_v14, %v8200_v20 }
 0x5be   : > { %v8735_v32 = vpop.permute.xlu1 %4477  ;;  %v3451_v36 = vmul.f32 %v8773_v43, %v8773_v43 }
 0x5bf   : > { %9828 = vst [vmem:[#allocation61_spill] sm:$0xff] %v8735_v32  ;;  %3865 = vrot.lane.b32.xlu0 %v8731_v16, %s6573_s28 }
 0x5c0   : > { %4513 = vrot.lane.b32.xlu1 %v8712_v29, %s6574_s29 }
 0x5c1   : > { %v8741_v23 = vpop.permute.xlu0 %3504 }
 0x5c2   : > { %v8747_v48 = vpop.permute.xlu1 %3510 }
 0x5c3   : > { %4411 = vrot.lane.b32.xlu0 %v8731_v16, %s9772_s30 }
 0x5c4   : > { %3867 = vrot.lane.b32.xlu1 %v8745_v14, %s6573_s28 }
 0x5c5   : > { %v3846_v35 = vpop.permute.xlu0 %3845 }
 0x5c6   : > { %v8757_v32 = vpop.permute.xlu1 %3506 }
 0x5c7   : > { %4507 = vrot.lane.b32.xlu0 %v8731_v16, %s6574_s29 }
 0x5c8   : > { %4413 = vrot.lane.b32.xlu1 %v8745_v14, %s9772_s30 }
 0x5c9   : > { %v8763_v47 = vpop.permute.xlu0 %4391 }
 0x5ca   : > { %9830 = vst [vmem:[#allocation63_spill] sm:$0xff] %v8763_v47  ;;  %v3848_v3 = vpop.permute.xlu1 %3847  ;;  %v3448_v47 = vmul.f32 %v8769_v51, %v8769_v51 }
 0x5cb   : > { %3540 = vrot.lane.b32.xlu0 %v3450_v39, %s9775_s20  ;;  %v8794_v39 = vmul.f32 %v8439_v53, %v8189_v31 }
 0x5cc   : > { %4509 = vrot.lane.b32.xlu1 %v8745_v14, %s6574_s29 }
 0x5cd   : > { %v8778_v34 = vpop.permute.xlu0 %4487 }
 0x5ce   : > { %9831 = vst [vmem:[#allocation64_spill] sm:$0xff] %v8778_v34  ;;  %v8782_v12 = vpop.permute.xlu1 %4393 }
 0x5cf   : > { %9832 = vst [vmem:[#allocation65_spill] sm:$0xff] %v8782_v12  ;;  %3536 = vrot.lane.b32.xlu0 %v3448_v47, %s9775_s20  ;;  %v3449_v12 = vmul.f32 %v8788_v44, %v8788_v44 }
 0x5d0   : > { %3542 = vrot.lane.b32.xlu1 %v3451_v36, %s9775_s20  ;;  %v8808_v36 = vmul.f32 %v8441_v49, %v8195_v6  ;;  %v8827_v6 = vmul.f32 %v8454_v30, %v8192_v58 }
 0x5d1   : > { %v3842_v34 = vpop.permute.xlu0 %3841 }
 0x5d2   : > { %v8796_v13 = vpop.permute.xlu1 %4489  ;;  %5774 = vmatprep.mubr.msk.f32.mxu0 %vm3881_vm14, %v3842_v34 }
 0x5d3   : > { %9833 = vst [vmem:[#allocation66_spill] sm:$0xff] %v8796_v13  ;;  %3877 = vrot.lane.b32.xlu0 %v8794_v39, %s6573_s28 }
 0x5d4   : > { %3538 = vrot.lane.b32.xlu1 %v3449_v12, %s9775_s20 }
 0x5d5   : > { %v8804_v47 = vpop.permute.xlu0 %4387 }
 0x5d6   : > { %v3844_v31 = vpop.permute.xlu1 %3843 }
 0x5d7   : > { %4423 = vrot.lane.b32.xlu0 %v8794_v39, %s9772_s30  ;;  %5775 = vmatmul.mubr.msk.f32.gmra.mrb[60].mxu0 %vm3881_vm14, %v3844_v31 }
 0x5d8   : > { %3879 = vrot.lane.b32.xlu1 %v8808_v36, %s6573_s28  ;;  %5777 = vmatprep.mubr.msk.f32.mxu0 %vm3881_vm14, %v3846_v35 }
 0x5d9   : > { %v8816_v53 = vpop.permute.xlu0 %4483 }
 0x5da   : > { %9834 = vst [vmem:[#allocation67_spill] sm:$0xff] %v8816_v53  ;;  %v8818_v34 = vpop.permute.xlu1 %4389 }
 0x5db   : > { %9835 = vst [vmem:[#allocation68_spill] sm:$0xff] %v8818_v34  ;;  %4519 = vrot.lane.b32.xlu0 %v8794_v39, %s6574_s29  ;;  %5778 = vmatmul.mubr.msk.f32.gmra.mrb[62].mxu0 %vm3881_vm14, %v3848_v3  ;;  %v8841_v3 = vmul.f32 %v8456_v25, %v8198_v54 }
 0x5dc   : > { %4425 = vrot.lane.b32.xlu1 %v8808_v36, %s9772_s30 }
 0x5dd   : > { %v8829_v49 = vpop.permute.xlu0 %3516 }
 0x5de   : > { %v8831_v12 = vpop.permute.xlu1 %4485 }
 0x5df   : > { %9836 = vst [vmem:[#allocation69_spill] sm:$0xff] %v8831_v12  ;;  %3873 = vrot.lane.b32.xlu0 %v8827_v6, %s6573_s28 }
 0x5e0   : > { %4521 = vrot.lane.b32.xlu1 %v8808_v36, %s6574_s29 }
 0x5e1   : > { %v8837_v35 = vpop.permute.xlu0 %3512 }
 0x5e2   : > { %v8843_v31 = vpop.permute.xlu1 %3518 }
 0x5e3   : > { %4419 = vrot.lane.b32.xlu0 %v8827_v6, %s9772_s30 }
 0x5e4   : > { %3875 = vrot.lane.b32.xlu1 %v8841_v3, %s6573_s28 }
 0x5e5   : > { %v3854_v58 = vpop.permute.xlu0 %3853 }
 0x5e6   : > { %v8849_v30 = vpop.permute.xlu1 %3514 }
 0x5e7   : > { %4515 = vrot.lane.b32.xlu0 %v8827_v6, %s6574_s29 }
 0x5e8   : > { %4685 = vrot.lane.b32.xlu1 %v8234_v1, %s6575_s26 }
 0x5e9   : > { %v8855_v12 = vpop.permute.xlu0 %4399 }
 0x5ea   : > { %9837 = vst [vmem:[#allocation70_spill] sm:$0xff] %v8855_v12  ;;  %v3856_v54 = vpop.permute.xlu1 %3855 }
 0x5eb   : > { %4687 = vrot.lane.b32.xlu0 %v8204_v19, %s6575_s26 }
 0x5ec   : > { %4689 = vrot.lane.b32.xlu1 %v8218_v37, %s6575_s26 }
 0x5ed   : > { %v8861_v25 = vpop.permute.xlu0 %4495 }
 0x5ee   : > { %9838 = vst [vmem:[#allocation71_spill] sm:$0xff] %v8861_v25  ;;  %v8863_v53 = vpop.permute.xlu1 %4401 }
 0x5ef   : > { %9839 = vst [vmem:[#allocation72_spill] sm:$0xff] %v8863_v53  ;;  %4691 = vrot.lane.b32.xlu0 %v8291_v46, %s6575_s26 }
 0x5f0   : > { %4693 = vrot.lane.b32.xlu1 %v8299_v10, %s6575_s26 }
 0x5f1   : > { %v3850_v1 = vpop.permute.xlu0 %3849 }
 0x5f2   : > { %v8869_v13 = vpop.permute.xlu1 %4497  ;;  %5780 = vmatprep.mubr.msk.f32.mxu0 %vm3881_vm14, %v3850_v1 }
 0x5f3   : > { %9840 = vst [vmem:[#allocation73_spill] sm:$0xff] %v8869_v13  ;;  %4695 = vrot.lane.b32.xlu0 %v8270_v26, %s6575_s26 }
 0x5f4   : > { %4697 = vrot.lane.b32.xlu1 %v8279_v0, %s6575_s26 }
 0x5f5   : > { %v8876_v19 = vpop.permute.xlu0 %4395 }
 0x5f6   : > { %9841 = vst [vmem:[#allocation74_spill] sm:$0xff] %v8876_v19  ;;  %v3852_v37 = vpop.permute.xlu1 %3851 }
 0x5f7   : > { %4699 = vrot.lane.b32.xlu0 %v8360_v18, %s6575_s26  ;;  %5781 = vmatmul.mubr.msk.f32.gmra.mrb[64].mxu0 %vm3881_vm14, %v3852_v37  ;;  %v8983_v37 = vsub.f32 %v8808_v36, %v8200_v20 }
 0x5f8   : > { %4701 = vrot.lane.b32.xlu1 %v8371_v22, %s6575_s26  ;;  %5783 = vmatprep.mubr.msk.f32.mxu0 %vm3881_vm14, %v3854_v58 }
 0x5f9   : > { %v8884_v46 = vpop.permute.xlu0 %4491 }
 0x5fa   : > { %9842 = vst [vmem:[#allocation75_spill] sm:$0xff] %v8884_v46  ;;  %v8886_v10 = vpop.permute.xlu1 %4397 }
 0x5fb   : > { %9843 = vst [vmem:[#allocation76_spill] sm:$0xff] %v8886_v10  ;;  %4703 = vrot.lane.b32.xlu0 %v8337_v24, %s6575_s26  ;;  %5784 = vmatmul.mubr.msk.f32.gmra.mrb[66].mxu0 %vm3881_vm14, %v3856_v54  ;;  %v8977_v54 = vsub.f32 %v8827_v6, %v8200_v20 }
 0x5fc   : > { %4705 = vrot.lane.b32.xlu1 %v8345_v60, %s6575_s26 }
 0x5fd   : > { %v8893_v26 = vpop.permute.xlu0 %3524 }
 0x5fe   : > { %v8895_v0 = vpop.permute.xlu1 %4493 }
 0x5ff   : > { %9844 = vst [vmem:[#allocation77_spill] sm:$0xff] %v8895_v0  ;;  %4707 = vrot.lane.b32.xlu0 %v8448_v55, %s6575_s26 }
 0x600   : > { %4709 = vrot.lane.b32.xlu1 %v8459_v7, %s6575_s26 }
 0x601   : > { %v8901_v18 = vpop.permute.xlu0 %3520 }
 0x602   : > { %v8903_v22 = vpop.permute.xlu1 %3526 }
 0x603   : > { %4711 = vrot.lane.b32.xlu0 %v8421_v4, %s6575_s26 }
 0x604   : > { %4713 = vrot.lane.b32.xlu1 %v8433_v57, %s6575_s26 }
 0x605   : > { %v3862_v60 = vpop.permute.xlu0 %3861 }
 0x606   : > { %v8909_v24 = vpop.permute.xlu1 %3522 }
 0x607   : > { %4715 = vrot.lane.b32.xlu0 %v8539_v56, %s6575_s26 }
 0x608   : > { %4717 = vrot.lane.b32.xlu1 %v8553_v50, %s6575_s26 }
 0x609   : > { %v8915_v55 = vpop.permute.xlu0 %4407 }
 0x60a   : > { %9845 = vst [vmem:[#allocation78_spill] sm:$0xff] %v8915_v55  ;;  %v3864_v7 = vpop.permute.xlu1 %3863 }
 0x60b   : > { %4719 = vrot.lane.b32.xlu0 %v8505_v62, %s6575_s26 }
 0x60c   : > { %4721 = vrot.lane.b32.xlu1 %v8520_v33, %s6575_s26 }
 0x60d   : > { %v8921_v4 = vpop.permute.xlu0 %4503 }
 0x60e   : > { %9846 = vst [vmem:[#allocation79_spill] sm:$0xff] %v8921_v4  ;;  %v8923_v57 = vpop.permute.xlu1 %4409 }
 0x60f   : > { %9847 = vst [vmem:[#allocation80_spill] sm:$0xff] %v8923_v57  ;;  %4723 = vrot.lane.b32.xlu0 %v8635_v5, %s6575_s26 }
 0x610   : > { %4725 = vrot.lane.b32.xlu1 %v8649_v45, %s6575_s26 }
 0x611   : > { %v3858_v56 = vpop.permute.xlu0 %3857 }
 0x612   : > { %v8929_v50 = vpop.permute.xlu1 %4505  ;;  %5786 = vmatprep.mubr.msk.f32.mxu0 %vm3881_vm14, %v3858_v56  ;;  %v8996_v56 = vsub.f32 %v8841_v3, %v8200_v20 }
 0x613   : > { %9848 = vst [vmem:[#allocation81_spill] sm:$0xff] %v8929_v50  ;;  %4727 = vrot.lane.b32.xlu0 %v8602_v63, %s6575_s26 }
 0x614   : > { %4729 = vrot.lane.b32.xlu1 %v8616_v38, %s6575_s26 }
 0x615   : > { %v8936_v62 = vpop.permute.xlu0 %4403 }
 0x616   : > { %9849 = vst [vmem:[#allocation82_spill] sm:$0xff] %v8936_v62  ;;  %v3860_v33 = vpop.permute.xlu1 %3859 }
 0x617   : > { %4731 = vrot.lane.b32.xlu0 %v8731_v16, %s6575_s26  ;;  %5787 = vmatmul.mubr.msk.f32.gmra.mrb[68].mxu0 %vm3881_vm14, %v3860_v33 }
 0x618   : > { %4733 = vrot.lane.b32.xlu1 %v8745_v14, %s6575_s26  ;;  %5789 = vmatprep.mubr.msk.f32.mxu0 %vm3881_vm14, %v3862_v60  ;;  %v3452_v60 = vmul.f32 %v8977_v54, %v8977_v54 }
 0x619   : > { %v8944_v5 = vpop.permute.xlu0 %4499 }
 0x61a   : > { %9850 = vst [vmem:[#allocation83_spill] sm:$0xff] %v8944_v5  ;;  %v8946_v45 = vpop.permute.xlu1 %4405 }
 0x61b   : > { %9851 = vst [vmem:[#allocation84_spill] sm:$0xff] %v8946_v45  ;;  %4735 = vrot.lane.b32.xlu0 %v8698_v59, %s6575_s26  ;;  %5790 = vmatmul.mubr.msk.f32.gmra.mrb[70].mxu0 %vm3881_vm14, %v3864_v7  ;;  %v8965_v59 = vsub.f32 %v8794_v39, %v8200_v20 }
 0x61c   : > { %4737 = vrot.lane.b32.xlu1 %v8712_v29, %s6575_s26 }
 0x61d   : > { %v8953_v63 = vpop.permute.xlu0 %3532  ;;  %v3454_v58 = vmul.f32 %v8965_v59, %v8965_v59 }
 0x61e   : > { %v8955_v38 = vpop.permute.xlu1 %4501 }
 0x61f   : > { %9852 = vst [vmem:[#allocation85_spill] sm:$0xff] %v8955_v38  ;;  %4739 = vrot.lane.b32.xlu0 %v8827_v6, %s6575_s26  ;;  %v3455_v6 = vmul.f32 %v8983_v37, %v8983_v37  ;;  %v3453_v38 = vmul.f32 %v8996_v56, %v8996_v56 }
 0x620   : > { %4421 = vrot.lane.b32.xlu1 %v8841_v3, %s9772_s30 }
 0x621   : > { %v8961_v16 = vpop.permute.xlu0 %3528 }
 0x622   : > { %v8967_v14 = vpop.permute.xlu1 %3534 }
 0x623   : > { %4743 = vrot.lane.b32.xlu0 %v8794_v39, %s6575_s26 }
 0x624   : > { %4517 = vrot.lane.b32.xlu1 %v8841_v3, %s6574_s29 }
 0x625   : > { %v3870_v29 = vpop.permute.xlu0 %3869 }
 0x626   : > { %v8979_v1 = vpop.permute.xlu1 %3530 }
 0x627   : > { %3548 = vrot.lane.b32.xlu0 %v3454_v58, %s9775_s20 }
 0x628   : > { %4741 = vrot.lane.b32.xlu1 %v8841_v3, %s6575_s26 }
 0x629   : > { %v8988_v39 = vpop.permute.xlu0 %4415 }
 0x62a   : > { %9853 = vst [vmem:[#allocation86_spill] sm:$0xff] %v8988_v39  ;;  %v3872_v7 = vpop.permute.xlu1 %3871 }
 0x62b   : > { %3544 = vrot.lane.b32.xlu0 %v3452_v60, %s9775_s20 }
 0x62c   : > { %3550 = vrot.lane.b32.xlu1 %v3455_v6, %s9775_s20 }
 0x62d   : > { %v9000_v33 = vpop.permute.xlu0 %4511 }
 0x62e   : > { %9854 = vst [vmem:[#allocation87_spill] sm:$0xff] %v9000_v33  ;;  %v9002_v58 = vpop.permute.xlu1 %4417 }
 0x62f   : > { %9855 = vst [vmem:[#allocation88_spill] sm:$0xff] %v9002_v58 }
 0x630   : > { %3546 = vrot.lane.b32.xlu1 %v3453_v38, %s9775_s20 }
 0x631   : > { %v3866_v39 = vpop.permute.xlu0 %3865 }
 0x632   : > { %v9007_v45 = vpop.permute.xlu1 %4513  ;;  %5792 = vmatprep.mubr.msk.f32.mxu0 %vm3881_vm14, %v3866_v39 }
 0x633   : > { %9856 = vst [vmem:[#allocation89_spill] sm:$0xff] %v9007_v45 }
 0x635   : > { %v9010_v20 = vpop.permute.xlu0 %4411 }
 0x636   : > { %9857 = vst [vmem:[#allocation90_spill] sm:$0xff] %v9010_v20  ;;  %v3868_v3 = vpop.permute.xlu1 %3867 }
 0x637   : > { %5793 = vmatmul.mubr.msk.f32.gmra.mrb[72].mxu0 %vm3881_vm14, %v3868_v3 }
 0x638   : > { %5795 = vmatprep.mubr.msk.f32.mxu0 %vm3881_vm14, %v3870_v29  ;;  %v3590_v29 = vsel %vm683_vm0, %v8541_v8, 0.0  ;;  %v3593_v8 = vsel %vm683_vm0, %v8555_v11, 0.0  ;;  %v3605_v11 = vsel %vm683_vm0, %v8651_v40, 0.0  ;;  %v3614_v40 = vsel %vm683_vm0, %v8733_v2, 0.0 }
 0x639   : > { %v9014_v60 = vpop.permute.xlu0 %4507 }
 0x63a   : > { %9858 = vst [vmem:[#allocation91_spill] sm:$0xff] %v9014_v60  ;;  %v9016_v6 = vpop.permute.xlu1 %4413 }
 0x63b   : > { %9859 = vst [vmem:[#allocation92_spill] sm:$0xff] %v9016_v6  ;;  %5796 = vmatmul.mubr.msk.f32.gmra.mrb[74].mxu0 %vm3881_vm14, %v3872_v7 }
 0x63d   : > { %v9019_v58 = vpop.permute.xlu0 %3540 }
 0x63e   : > { %v9021_v38 = vpop.permute.xlu1 %4509 }
 0x63f   : > { %9860 = vst [vmem:[#allocation93_spill] sm:$0xff] %v9021_v38  ;;  %v3584_v38 = vsel %vm683_vm0, %v8549_v17, 0.0 }
 0x641   : > { %v9023_v45 = vpop.permute.xlu0 %3536 }
 0x642   : > { %v9025_v39 = vpop.permute.xlu1 %3542 }
 0x645   : > { %v3878_v20 = vpop.permute.xlu0 %3877 }
 0x646   : > { %v9027_v33 = vpop.permute.xlu1 %3538 }
 0x649   : > { %v9029_v3 = vpop.permute.xlu0 %4423 }
 0x64a   : > { %9861 = vst [vmem:[#allocation94_spill] sm:$0xff] %v9029_v3  ;;  %v3880_v60 = vpop.permute.xlu1 %3879  ;;  %v9033_v6 = vpop.f32.mrb[48].mxu0  ;;  %3591 = vadd.xlane.f32.xlu0 %v3590_v29  ;;  %v3587_v29 = vsel %vm683_vm0, %v8565_v52, 0.0  ;;  %v3596_v52 = vsel %vm683_vm0, %v8645_v28, 0.0  ;;  %v3617_v28 = vsel %vm683_vm0, %v8747_v48, 0.0  ;;  %v3629_v48 = vsel %vm683_vm0, %v8843_v31, 0.0 }
 0x64b   : > { %v9035_v7 = vpop.f32.mrb[49].mxu0  ;;  %v3638_v31 = vsel %vm683_vm0, %v8893_v26, 0.0  ;;  %v3635_v26 = vsel %vm683_vm0, %v8909_v24, 0.0  ;;  %v3647_v24 = vsel %vm683_vm0, %v8979_v1, 0.0  ;;  %v3659_v1 = vsel %vm683_vm0, %v9027_v33, 0.0 }
 0x64d   : > { %v9037_v5 = vpop.permute.xlu0 %4519 }
 0x64e   : > { %9862 = vst [vmem:[#allocation95_spill] sm:$0xff] %v9037_v5  ;;  %v9041_v50 = vpop.permute.xlu1 %4425  ;;  %v9043_v62 = vpop.f32.mrb[50].mxu0  ;;  %3585 = vadd.xlane.f32.xlu0 %v3584_v38  ;;  %v3602_v38 = vsel %vm683_vm0, %v8637_v61, 0.0  ;;  %v3599_v61 = vsel %vm683_vm0, %v8661_v21, 0.0  ;;  %v3611_v21 = vsel %vm683_vm0, %v8757_v32, 0.0 }
 0x64f   : > { %9863 = vst [vmem:[#allocation96_spill] sm:$0xff] %v9041_v50  ;;  %v9045_v3 = vpop.f32.mrb[51].mxu0 }
 0x651   : > { %v3874_v57 = vpop.permute.xlu0 %3873 }
 0x652   : > { %v9049_v4 = vpop.permute.xlu1 %4521  ;;  %3594 = vadd.xlane.f32.xlu0 %v3593_v8  ;;  %5798 = vmatprep.mubr.msk.f32.mxu0 %vm3881_vm14, %v3874_v57 }
 0x653   : > { %9864 = vst [vmem:[#allocation97_spill] sm:$0xff] %v9049_v4 }
 0x654   : > { %3588 = vadd.xlane.f32.xlu1 %v3587_v29 }
 0x655   : > { %v9054_v17 = vpop.permute.xlu0 %4419 }
 0x656   : > { %9865 = vst [vmem:[#allocation98_spill] sm:$0xff] %v9054_v17  ;;  %v3876_v50 = vpop.permute.xlu1 %3875  ;;  %3603 = vadd.xlane.f32.xlu0 %v3602_v38 }
 0x657   : > { %5799 = vmatmul.mubr.msk.f32.gmra.mrb[76].mxu0 %vm3881_vm14, %v3876_v50 }
 0x658   : > { %3606 = vadd.xlane.f32.xlu1 %v3605_v11  ;;  %5801 = vmatprep.mubr.msk.f32.mxu0 %vm3881_vm14, %v3878_v20  ;;  %v3626_v11 = vsel %vm683_vm0, %v8829_v49, 0.0  ;;  %v3623_v49 = vsel %vm683_vm0, %v8849_v30, 0.0  ;;  %v3632_v30 = vsel %vm683_vm0, %v8901_v18, 0.0 }
 0x659   : > { %v9062_v57 = vpop.permute.xlu0 %4515 }
 0x65a   : > { %9866 = vst [vmem:[#allocation99_spill] sm:$0xff] %v9062_v57  ;;  %v9066_v8 = vpop.permute.xlu1 %4685  ;;  %3597 = vadd.xlane.f32.xlu0 %v3596_v52 }
 0x65b   : > { %5802 = vmatmul.mubr.msk.f32.gmra.mrb[78].mxu0 %vm3881_vm14, %v3880_v60  ;;  %v3608_v60 = vsel %vm683_vm0, %v8741_v23, 0.0 }
 0x65c   : > { %3600 = vadd.xlane.f32.xlu1 %v3599_v61  ;;  %v3620_v61 = vsel %vm683_vm0, %v8837_v35, 0.0 }
 0x65d   : > { %v9071_v50 = vpop.permute.xlu0 %4687 }
 0x65e   : > { %v9075_v20 = vpop.permute.xlu1 %4689  ;;  %3615 = vadd.xlane.f32.xlu0 %v3614_v40 }
 0x660   : > { %3618 = vadd.xlane.f32.xlu1 %v3617_v28 }
 0x661   : > { %v9079_v29 = vpop.permute.xlu0 %4691 }
 0x662   : > { %v9083_v38 = vpop.permute.xlu1 %4693  ;;  %3609 = vadd.xlane.f32.xlu0 %v3608_v60 }
 0x664   : > { %3612 = vadd.xlane.f32.xlu1 %v3611_v21 }
 0x665   : > { %v9087_v2 = vpop.permute.xlu0 %4695 }
 0x666   : > { %v9091_v52 = vpop.permute.xlu1 %4697  ;;  %3627 = vadd.xlane.f32.xlu0 %v3626_v11 }
 0x668   : > { %3630 = vadd.xlane.f32.xlu1 %v3629_v48  ;;  %v3641_v48 = vsel %vm683_vm0, %v8903_v22, 0.0  ;;  %v3653_v22 = vsel %vm683_vm0, %v8967_v14, 0.0  ;;  %v3665_v14 = vsel %vm683_vm0, %v9025_v39, 0.0 }
 0x669   : > { %v9095_v23 = vpop.permute.xlu0 %4699 }
 0x66a   : > { %v9099_v40 = vpop.permute.xlu1 %4701  ;;  %v9101_v32 = vpop.f32.mrb[52].mxu0  ;;  %3621 = vadd.xlane.f32.xlu0 %v3620_v61 }
 0x66b   : > { %9867 = vst [vmem:[#allocation100_spill] sm:$0xff] %v9099_v40  ;;  %v9103_v28 = vpop.f32.mrb[53].mxu0  ;;  %v9906_v40 = vld [vmem:[#allocation52_spill] sm:$0xff] }
 0x66c   : > { %3624 = vadd.xlane.f32.xlu1 %v3623_v49 }
 0x66d   : > { %v9107_v60 = vpop.permute.xlu0 %4703 }
 0x66e   : > { %v9111_v21 = vpop.permute.xlu1 %4705  ;;  %v9113_v11 = vpop.f32.mrb[54].mxu0  ;;  %3639 = vadd.xlane.f32.xlu0 %v3638_v31  ;;  %v3650_v31 = vsel %vm683_vm0, %v8953_v63, 0.0 }
 0x66f   : > { %v9115_v35 = vpop.f32.mrb[55].mxu0 }
 0x670   : > { %3642 = vadd.xlane.f32.xlu1 %v3641_v48  ;;  %v3644_v48 = vsel %vm683_vm0, %v8961_v16, 0.0 }
 0x671   : > { %v9119_v61 = vpop.permute.xlu0 %4707 }
 0x672   : > { %9868 = vst [vmem:[#allocation101_spill] sm:$0xff] %v9119_v61  ;;  %v9123_v49 = vpop.permute.xlu1 %4709  ;;  %3633 = vadd.xlane.f32.xlu0 %v3632_v30  ;;  %v9889_v61 = vld [vmem:[#allocation19_spill] sm:$0xff] }
 0x673   : > { %9869 = vst [vmem:[#allocation102_spill] sm:$0xff] %v9123_v49 }
 0x674   : > { %3636 = vadd.xlane.f32.xlu1 %v3635_v26  ;;  %v3662_v26 = vsel %vm683_vm0, %v9019_v58, 0.0 }
 0x675   : > { %v9127_v4 = vpop.permute.xlu0 %4711 }
 0x676   : > { %9870 = vst [vmem:[#allocation103_spill] sm:$0xff] %v9127_v4  ;;  %v9131_v57 = vpop.permute.xlu1 %4713  ;;  %3651 = vadd.xlane.f32.xlu0 %v3650_v31 }
 0x677   : > { %9871 = vst [vmem:[#allocation104_spill] sm:$0xff] %v9131_v57 }
 0x678   : > { %3654 = vadd.xlane.f32.xlu1 %v3653_v22  ;;  %v3656_v22 = vsel %vm683_vm0, %v9023_v45, 0.0 }
 0x679   : > { %v9135_v18 = vpop.permute.xlu0 %4715 }
 0x67a   : > { %9872 = vst [vmem:[#allocation105_spill] sm:$0xff] %v9135_v18  ;;  %v9139_v30 = vpop.permute.xlu1 %4717  ;;  %3645 = vadd.xlane.f32.xlu0 %v3644_v48 }
 0x67b   : > { %9873 = vst [vmem:[#allocation106_spill] sm:$0xff] %v9139_v30 }
 0x67c   : > { %3648 = vadd.xlane.f32.xlu1 %v3647_v24 }
 0x67d   : > { %v9143_v63 = vpop.permute.xlu0 %4719 }
 0x67e   : > { %9874 = vst [vmem:[#allocation107_spill] sm:$0xff] %v9143_v63  ;;  %v9147_v31 = vpop.permute.xlu1 %4721  ;;  %3663 = vadd.xlane.f32.xlu0 %v3662_v26 }
 0x67f   : > { %9875 = vst [vmem:[#allocation108_spill] sm:$0xff] %v9147_v31 }
 0x680   : > { %3666 = vadd.xlane.f32.xlu1 %v3665_v14 }
 0x681   : > { %v9151_v16 = vpop.permute.xlu0 %4723 }
 0x682   : > { %9876 = vst [vmem:[#allocation109_spill] sm:$0xff] %v9151_v16  ;;  %v9155_v48 = vpop.permute.xlu1 %4725  ;;  %3657 = vadd.xlane.f32.xlu0 %v3656_v22 }
 0x683   : > { %9877 = vst [vmem:[#allocation110_spill] sm:$0xff] %v9155_v48 }
 0x684   : > { %3660 = vadd.xlane.f32.xlu1 %v3659_v1 }
 0x685   : > { %v9159_v58 = vpop.permute.xlu0 %4727 }
 0x686   : > { %9878 = vst [vmem:[#allocation111_spill] sm:$0xff] %v9159_v58  ;;  %v9161_v24 = vpop.permute.xlu1 %4729 }
 0x687   : > { %9879 = vst [vmem:[#allocation112_spill] sm:$0xff] %v9161_v24 }
 0x689   : > { %v9163_v26 = vpop.permute.xlu0 %4731 }
 0x68a   : > { %9880 = vst [vmem:[#allocation113_spill] sm:$0xff] %v9163_v26  ;;  %v9165_v39 = vpop.permute.xlu1 %4733  ;;  %v9167_v14 = vpop.f32.mrb[56].mxu0 }
 0x68b   : > { %9881 = vst [vmem:[#allocation114_spill] sm:$0xff] %v9165_v39  ;;  %v9169_v17 = vpop.f32.mrb[57].mxu0 }
 0x68d   : > { %v9171_v45 = vpop.permute.xlu0 %4735 }
 0x68e   : > { %9882 = vst [vmem:[#allocation115_spill] sm:$0xff] %v9171_v45  ;;  %v9173_v5 = vpop.permute.xlu1 %4737  ;;  %v9175_v22 = vpop.f32.mrb[58].mxu0 }
 0x68f   : > { %9883 = vst [vmem:[#allocation116_spill] sm:$0xff] %v9173_v5  ;;  %v9177_v33 = vpop.f32.mrb[59].mxu0 }
 0x691   : > { %v9179_v1 = vpop.permute.xlu0 %4739 }
 0x692   : > { %9884 = vst [vmem:[#allocation117_spill] sm:$0xff] %v9179_v1  ;;  %v9181_v48 = vpop.permute.xlu1 %4421 }
 0x693   : > { %9885 = vst [vmem:[#allocation118_spill] sm:$0xff] %v9181_v48 }
 0x695   : > { %v9183_v16 = vpop.permute.xlu0 %4743 }
 0x696   : > { %9886 = vst [vmem:[#allocation119_spill] sm:$0xff] %v9183_v16  ;;  %v9185_v26 = vpop.permute.xlu1 %4517 }
 0x697   : > { %9887 = vst [vmem:[#allocation120_spill] sm:$0xff] %v9185_v26 }
 0x699   : > { %v3549_v39 = vpop.permute.xlu0 %3548 }
 0x69a   : > { %v3674_v24 = vsel %vm683_vm0, %v3549_v39, 0.0  ;;  %v9188_v58 = vpop.permute.xlu1 %4741 }
 0x69b   : > { %9888 = vst [vmem:[#allocation121_spill] sm:$0xff] %v9188_v58  ;;  %3675 = vadd.xlane.f32.xlu0 %v3674_v24 }
 0x69d   : > { %v3545_v45 = vpop.permute.xlu0 %3544 }
 0x69e   : > { %v3668_v5 = vsel %vm683_vm0, %v3545_v45, 0.0  ;;  %v3551_v30 = vpop.permute.xlu1 %3550 }
 0x69f   : > { %v3677_v0 = vsel %vm683_vm0, %v3551_v30, 0.0  ;;  %3669 = vadd.xlane.f32.xlu0 %v3668_v5 }
 0x6a0   : > { %3678 = vadd.xlane.f32.xlu1 %v3677_v0 }
 0x6a2   : > { %v3547_v1 = vpop.permute.xlu1 %3546 }
 0x6a3   : > { %v3671_v48 = vsel %vm683_vm0, %v3547_v1, 0.0 }
 0x6a4   : > { %3672 = vadd.xlane.f32.xlu1 %v3671_v48 }
 0x6aa   : > { %v9193_v16 = vpop.f32.mrb[60].mxu0 }
 0x6ab   : > { %v9195_v26 = vpop.f32.mrb[61].mxu0 }
 0x6ae   : > { %v9197_v39 = vpop.f32.mrb[62].mxu0 }
 0x6af   : > { %v9199_v58 = vpop.f32.mrb[63].mxu0 }
 0x6ca   : > { %v9201_v24 = vpop.f32.mrb[64].mxu0 }
 0x6cb   : > { %v9203_v45 = vpop.f32.mrb[65].mxu0 }
 0x6ce   : > { %v9205_v18 = vpop.f32.mrb[66].mxu0 }
 0x6cf   : > { %v9207_v5 = vpop.f32.mrb[67].mxu0 }
 0x6d7   : > { %v3592_v0 = vpop.xlane.xlu0 %3591 }
 0x6d8   : > { %v3682_v30 = vadd.f32 1e-12, %v3592_v0 }
 0x6da   : > { %6349 = vrsqrt.f32 %v3682_v30 }
 0x6db   : > { %v3586_v48 = vpop.xlane.xlu0 %3585 }
 0x6dc   : > { %v3680_v1 = vadd.f32 1e-12, %v3586_v48 }
 0x6de   : > { %6351 = vrsqrt.f32 %v3680_v1 }
 0x6df   : > { %v3595_v55 = vpop.xlane.xlu0 %3594 }
 0x6e0   : > { %v3683_v31 = vadd.f32 1e-12, %v3595_v55 }
 0x6e1   : > { %v3589_v10 = vpop.xlane.xlu1 %3588 }
 0x6e2   : > { %6353 = vrsqrt.f32 %v3683_v31  ;;  %v3681_v46 = vadd.f32 1e-12, %v3589_v10 }
 0x6e3   : > { %v3604_v13 = vpop.xlane.xlu0 %3603 }
 0x6e4   : > { %v6350_v63 = vpop.eup %6349  ;;  %6355 = vrsqrt.f32 %v3681_v46  ;;  %v3686_v19 = vadd.f32 1e-12, %v3604_v13 }
 0x6e5   : > { %v3607_v49 = vpop.xlane.xlu1 %3606  ;;  %v3746_v25 = vmul.f32 %v6350_v63, %v8241_v15 }
 0x6e6   : > { %6357 = vrsqrt.f32 %v3686_v19  ;;  %v3687_v53 = vadd.f32 1e-12, %v3607_v49 }
 0x6e7   : > { %4591 = vrot.lane.b32.xlu0 %v3746_v25, %s6575_s26  ;;  %v3598_v0 = vpop.xlane.xlu0 %3597 }
 0x6e8   : > { %v6352_v30 = vpop.eup %6351  ;;  %6359 = vrsqrt.f32 %v3687_v53  ;;  %v3684_v48 = vadd.f32 1e-12, %v3598_v0 }
 0x6e9   : > { %v3601_v1 = vpop.xlane.xlu1 %3600  ;;  %v3744_v55 = vmul.f32 %v6352_v30, %v8249_v42 }
 0x6ea   : > { %6361 = vrsqrt.f32 %v3684_v48  ;;  %v3685_v10 = vadd.f32 1e-12, %v3601_v1  ;;  %v9212_v31 = vpop.f32.mrb[68].mxu0 }
 0x6eb   : > { %v9214_v46 = vpop.f32.mrb[69].mxu0  ;;  %4587 = vrot.lane.b32.xlu0 %v3744_v55, %s6575_s26  ;;  %v3616_v15 = vpop.xlane.xlu0 %3615 }
 0x6ec   : > { %v6354_v13 = vpop.eup %6353  ;;  %6363 = vrsqrt.f32 %v3685_v10  ;;  %v3690_v19 = vadd.f32 1e-12, %v3616_v15 }
 0x6ed   : > { %v3619_v25 = vpop.xlane.xlu1 %3618  ;;  %v3747_v49 = vmul.f32 %v6354_v13, %v8253_v27 }
 0x6ee   : > { %v6356_v53 = vpop.eup %6355  ;;  %6365 = vrsqrt.f32 %v3690_v19  ;;  %v3691_v63 = vadd.f32 1e-12, %v3619_v25  ;;  %v9218_v0 = vpop.f32.mrb[70].mxu0 }
 0x6ef   : > { %v9220_v42 = vpop.f32.mrb[71].mxu0  ;;  %4593 = vrot.lane.b32.xlu1 %v3747_v49, %s6575_s26  ;;  %v3610_v30 = vpop.xlane.xlu0 %3609  ;;  %v3745_v10 = vmul.f32 %v6356_v53, %v8264_v9 }
 0x6f0   : > { %v6358_v48 = vpop.eup %6357  ;;  %v3688_v1 = vadd.f32 1e-12, %v3610_v30  ;;  %6367 = vrsqrt.f32 %v3691_v63  ;;  %v9890_v63 = vld [vmem:[#allocation2_spill] sm:$0xff] }
 0x6f1   : > { %v3613_v55 = vpop.xlane.xlu1 %3612  ;;  %v3750_v15 = vmul.f32 %v6358_v48, %v8307_v41 }
 0x6f2   : > { %v6360_v12 = vpop.eup %6359  ;;  %6369 = vrsqrt.f32 %v3688_v1  ;;  %v3689_v27 = vadd.f32 1e-12, %v3613_v55  ;;  %v9891_v55 = vld [vmem:[#allocation20_spill] sm:$0xff] }
 0x6f3   : > { %4589 = vrot.lane.b32.xlu1 %v3745_v10, %s6575_s26  ;;  %4599 = vrot.lane.b32.xlu0 %v3750_v15, %s6575_s26  ;;  %v3628_v13 = vpop.xlane.xlu0 %3627  ;;  %v3751_v30 = vmul.f32 %v6360_v12, %v9889_v61  ;;  %v9892_v15 = vld [vmem:[#allocation21_spill] sm:$0xff] }
 0x6f4   : > { %v6362_v19 = vpop.eup %6361  ;;  %v3694_v25 = vadd.f32 1e-12, %v3628_v13  ;;  %6371 = vrsqrt.f32 %v3689_v27 }
 0x6f5   : > { %v3631_v49 = vpop.xlane.xlu1 %3630  ;;  %v3748_v57 = vmul.f32 %v6362_v19, %v9890_v63  ;;  %v9894_v63 = vld [vmem:[#allocation22_spill] sm:$0xff] }
 0x6f6   : > { %v6364_v34 = vpop.eup %6363  ;;  %6373 = vrsqrt.f32 %v3694_v25  ;;  %v3695_v9 = vadd.f32 1e-12, %v3631_v49  ;;  %v9893_v49 = vld [vmem:[#allocation23_spill] sm:$0xff] }
 0x6f7   : > { %4601 = vrot.lane.b32.xlu1 %v3751_v30, %s6575_s26  ;;  %4595 = vrot.lane.b32.xlu0 %v3748_v57, %s6575_s26  ;;  %v3622_v41 = vpop.xlane.xlu0 %3621  ;;  %v3749_v10 = vmul.f32 %v6364_v34, %v9891_v55 }
 0x6f8   : > { %v6366_v53 = vpop.eup %6365  ;;  %6375 = vrsqrt.f32 %v3695_v9  ;;  %v3692_v48 = vadd.f32 1e-12, %v3622_v41 }
 0x6f9   : > { %v3625_v1 = vpop.xlane.xlu1 %3624  ;;  %v3754_v27 = vmul.f32 %v6366_v53, %v9892_v15 }
 0x6fa   : > { %6377 = vrsqrt.f32 %v3692_v48  ;;  %v3693_v12 = vadd.f32 1e-12, %v3625_v1  ;;  %v6368_v61 = vpop.eup %6367 }
 0x6fb   : > { %4597 = vrot.lane.b32.xlu1 %v3749_v10, %s6575_s26  ;;  %4607 = vrot.lane.b32.xlu0 %v3754_v27, %s6575_s26  ;;  %v3640_v13 = vpop.xlane.xlu0 %3639  ;;  %v3755_v30 = vmul.f32 %v6368_v61, %v9893_v49  ;;  %v9895_v10 = vld [vmem:[#allocation24_spill] sm:$0xff]  ;;  %v9896_v27 = vld [vmem:[#allocation26_spill] sm:$0xff]  ;;  %v9897_v49 = vld [vmem:[#allocation29_spill] sm:$0xff] }
 0x6fc   : > { %v6370_v19 = vpop.eup %6369  ;;  %v3698_v25 = vadd.f32 1e-12, %v3640_v13  ;;  %6379 = vrsqrt.f32 %v3693_v12 }
 0x6fd   : > { %v3643_v57 = vpop.xlane.xlu1 %3642  ;;  %v3752_v9 = vmul.f32 %v6370_v19, %v9894_v63  ;;  %v9898_v63 = vld [vmem:[#allocation28_spill] sm:$0xff] }
 0x6fe   : > { %v3699_v41 = vadd.f32 1e-12, %v3643_v57  ;;  %v6372_v34 = vpop.eup %6371  ;;  %6381 = vrsqrt.f32 %v3698_v25 }
 0x6ff   : > { %4609 = vrot.lane.b32.xlu1 %v3755_v30, %s6575_s26  ;;  %4603 = vrot.lane.b32.xlu0 %v3752_v9, %s6575_s26  ;;  %v3634_v53 = vpop.xlane.xlu0 %3633  ;;  %v3753_v15 = vmul.f32 %v6372_v34, %v9895_v10  ;;  %v9899_v10 = vld [vmem:[#allocation31_spill] sm:$0xff] }
 0x700   : > { %v6374_v48 = vpop.eup %6373  ;;  %v3696_v1 = vadd.f32 1e-12, %v3634_v53  ;;  %6383 = vrsqrt.f32 %v3699_v41 }
 0x701   : > { %v3637_v55 = vpop.xlane.xlu1 %3636  ;;  %v3758_v13 = vmul.f32 %v6374_v48, %v9896_v27 }
 0x702   : > { %v6376_v4 = vpop.eup %6375  ;;  %v3697_v61 = vadd.f32 1e-12, %v3637_v55  ;;  %6385 = vrsqrt.f32 %v3696_v1 }
 0x703   : > { %4605 = vrot.lane.b32.xlu1 %v3753_v15, %s6575_s26  ;;  %4615 = vrot.lane.b32.xlu0 %v3758_v13, %s6575_s26  ;;  %v3652_v12 = vpop.xlane.xlu0 %3651  ;;  %v3759_v30 = vmul.f32 %v6376_v4, %v9897_v49  ;;  %v9900_v4 = vld [vmem:[#allocation38_spill] sm:$0xff] }
 0x704   : > { %v6378_v19 = vpop.eup %6377  ;;  %6387 = vrsqrt.f32 %v3697_v61  ;;  %v3702_v25 = vadd.f32 1e-12, %v3652_v12 }
 0x705   : > { %v3655_v57 = vpop.xlane.xlu1 %3654  ;;  %v3756_v9 = vmul.f32 %v6378_v19, %v9898_v63  ;;  %v9901_v63 = vld [vmem:[#allocation41_spill] sm:$0xff] }
 0x706   : > { %6389 = vrsqrt.f32 %v3702_v25  ;;  %v3703_v34 = vadd.f32 1e-12, %v3655_v57  ;;  %v6380_v53 = vpop.eup %6379 }
 0x707   : > { %4617 = vrot.lane.b32.xlu1 %v3759_v30, %s6575_s26  ;;  %4611 = vrot.lane.b32.xlu0 %v3756_v9, %s6575_s26  ;;  %v3646_v41 = vpop.xlane.xlu0 %3645  ;;  %v3757_v15 = vmul.f32 %v6380_v53, %v9899_v10 }
 0x708   : > { %6391 = vrsqrt.f32 %v3703_v34  ;;  %v3700_v48 = vadd.f32 1e-12, %v3646_v41  ;;  %v6382_v1 = vpop.eup %6381 }
 0x709   : > { %v3649_v55 = vpop.xlane.xlu1 %3648  ;;  %v3762_v61 = vmul.f32 %v6382_v1, %v9900_v4 }
 0x70a   : > { %6393 = vrsqrt.f32 %v3700_v48  ;;  %v3701_v27 = vadd.f32 1e-12, %v3649_v55  ;;  %v9248_v13 = vpop.f32.mrb[72].mxu0  ;;  %v6384_v25 = vpop.eup %6383  ;;  %v9902_v48 = vld [vmem:[#allocation40_spill] sm:$0xff] }
 0x70b   : > { %v9251_v12 = vpop.f32.mrb[73].mxu0  ;;  %4613 = vrot.lane.b32.xlu1 %v3757_v15, %s6575_s26  ;;  %v3664_v19 = vpop.xlane.xlu0 %3663  ;;  %4623 = vrot.lane.b32.xlu0 %v3762_v61, %s6575_s26  ;;  %v3763_v9 = vmul.f32 %v6384_v25, %v9901_v63  ;;  %v9903_v61 = vld [vmem:[#allocation44_spill] sm:$0xff]  ;;  %v9904_v25 = vld [vmem:[#allocation50_spill] sm:$0xff] }
 0x70c   : > { %6395 = vrsqrt.f32 %v3701_v27  ;;  %v3706_v57 = vadd.f32 1e-12, %v3664_v19  ;;  %v6386_v49 = vpop.eup %6385 }
 0x70d   : > { %v3667_v30 = vpop.xlane.xlu1 %3666  ;;  %v3760_v1 = vmul.f32 %v6386_v49, %v9902_v48 }
 0x70e   : > { %v6388_v34 = vpop.eup %6387  ;;  %6397 = vrsqrt.f32 %v3706_v57  ;;  %v3707_v41 = vadd.f32 1e-12, %v3667_v30  ;;  %v9256_v53 = vpop.f32.mrb[74].mxu0 }
 0x70f   : > { %v9259_v55 = vpop.f32.mrb[75].mxu0  ;;  %4625 = vrot.lane.b32.xlu1 %v3763_v9, %s6575_s26  ;;  %v3658_v10 = vpop.xlane.xlu0 %3657  ;;  %4619 = vrot.lane.b32.xlu0 %v3760_v1, %s6575_s26  ;;  %v3761_v19 = vmul.f32 %v6388_v34, %v9903_v61  ;;  %v9905_v9 = vld [vmem:[#allocation53_spill] sm:$0xff]  ;;  %v9907_v34 = vld [vmem:[#allocation56_spill] sm:$0xff] }
 0x710   : > { %v6390_v15 = vpop.eup %6389  ;;  %v3704_v27 = vadd.f32 1e-12, %v3658_v10  ;;  %6399 = vrsqrt.f32 %v3707_v41 }
 0x711   : > { %v3661_v4 = vpop.xlane.xlu1 %3660  ;;  %v3766_v57 = vmul.f32 %v6390_v15, %v9904_v25 }
 0x712   : > { %v6392_v30 = vpop.eup %6391  ;;  %6401 = vrsqrt.f32 %v3704_v27  ;;  %v3705_v63 = vadd.f32 1e-12, %v3661_v4  ;;  %v9908_v27 = vld [vmem:[#allocation62_spill] sm:$0xff] }
 0x713   : > { %4621 = vrot.lane.b32.xlu1 %v3761_v19, %s6575_s26  ;;  %4631 = vrot.lane.b32.xlu0 %v3766_v57, %s6575_s26  ;;  %v3767_v48 = vmul.f32 %v6392_v30, %v9905_v9 }
 0x714   : > { %v6394_v49 = vpop.eup %6393  ;;  %6403 = vrsqrt.f32 %v3705_v63 }
 0x715   : > { %v3764_v1 = vmul.f32 %v6394_v49, %v9906_v40  ;;  %v9284_v49 = vld [vmem:[%s9708_s12] ss:$0 sm:$0xff] }
 0x716   : > { %v6396_v10 = vpop.eup %6395 }
 0x717   : > { %4633 = vrot.lane.b32.xlu1 %v3767_v48, %s6575_s26  ;;  %4627 = vrot.lane.b32.xlu0 %v3764_v1, %s6575_s26  ;;  %v3765_v15 = vmul.f32 %v6396_v10, %v9907_v34 }
 0x718   : > { %v6398_v41 = vpop.eup %6397 }
 0x719   : > { %v3770_v4 = vmul.f32 %v6398_v41, %v9908_v27  ;;  %v4013_v41 = vadd.f32 %v9284_v49, %v9035_v7  ;;  %v4023_v27 = vadd.f32 %v9284_v49, %v9045_v3  ;;  %v4038_v7 = vadd.f32 %v9101_v32, %v9284_v49 }
 0x71a   : > { %v6400_v61 = vpop.eup %6399  ;;  %v4043_v32 = vadd.f32 %v9284_v49, %v9115_v35 }
 0x71b   : > { %4629 = vrot.lane.b32.xlu1 %v3765_v15, %s6575_s26  ;;  %4639 = vrot.lane.b32.xlu0 %v3770_v4, %s6575_s26  ;;  %v3771_v25 = vmul.f32 %v6400_v61, %v8773_v43  ;;  %v4018_v43 = vadd.f32 %v9033_v6, %v9284_v49 }
 0x71c   : > { %v6402_v19 = vpop.eup %6401 }
 0x71d   : > { %v3768_v40 = vmul.f32 %v6402_v19, %v8769_v51  ;;  %v5342_v61 = vmul.f32 -1.442695, %v4018_v43  ;;  %v4028_v19 = vadd.f32 %v9043_v62, %v9284_v49  ;;  %v4033_v62 = vadd.f32 %v9284_v49, %v9103_v28 }
 0x71e   : > { %v6404_v57 = vpop.eup %6403 }
 0x71f   : > { %4641 = vrot.lane.b32.xlu1 %v3771_v25, %s6575_s26  ;;  %4635 = vrot.lane.b32.xlu0 %v3768_v40, %s6575_s26  ;;  %v3769_v30 = vmul.f32 %v6404_v57, %v8788_v44  ;;  %v5341_v25 = vmul.f32 -1.442695, %v4013_v41  ;;  %v5343_v57 = vmul.f32 -1.442695, %v4023_v27  ;;  %v5347_v27 = vmul.f32 -1.442695, %v4043_v32 }
 0x723   : > { %4637 = vrot.lane.b32.xlu1 %v3769_v30, %s6575_s26  ;;  %v5344_v30 = vmul.f32 -1.442695, %v4028_v19 }
 0x728   : > { %v3676_v63 = vpop.xlane.xlu0 %3675 }
 0x729   : > { %v3710_v9 = vadd.f32 1e-12, %v3676_v63 }
 0x72a   : > { %v9286_v48 = vpop.f32.mrb[76].mxu0 }
 0x72b   : > { %6405 = vrsqrt.f32 %v3710_v9  ;;  %v9288_v51 = vpop.f32.mrb[77].mxu0  ;;  %v5346_v9 = vmul.f32 -1.442695, %v4038_v7 }
 0x72c   : > { %v3670_v1 = vpop.xlane.xlu0 %3669 }
 0x72d   : > { %v3708_v10 = vadd.f32 1e-12, %v3670_v1  ;;  %v3679_v44 = vpop.xlane.xlu1 %3678  ;;  %v5345_v1 = vmul.f32 -1.442695, %v4033_v62 }
 0x72e   : > { %v3711_v34 = vadd.f32 1e-12, %v3679_v44  ;;  %v9294_v15 = vpop.f32.mrb[78].mxu0 }
 0x72f   : > { %v9298_v4 = vpop.f32.mrb[79].mxu0  ;;  %6407 = vrsqrt.f32 %v3708_v10 }
 0x730   : > { %6409 = vrsqrt.f32 %v3711_v34  ;;  %v4048_v34 = vadd.f32 %v9113_v11, %v9284_v49  ;;  %v4063_v11 = vadd.f32 %v9284_v49, %v9177_v33 }
 0x731   : > { %v3673_v6 = vpop.xlane.xlu1 %3672  ;;  %6411 = vpow2.f32 %v5342_v61 }
 0x732   : > { %v3709_v40 = vadd.f32 1e-12, %v3673_v6 }
 0x734   : > { %6413 = vrsqrt.f32 %v3709_v40 }
 0x735   : > { %v6406_v63 = vpop.eup %6405  ;;  %6415 = vpow2.f32 %v5341_v25 }
 0x736   : > { %v3774_v3 = vmul.f32 %v6406_v63, %v8965_v59  ;;  %6417 = vpow2.f32 %v5343_v57 }
 0x737   : > { %6419 = vpow2.f32 %v5344_v30 }
 0x738   : > { %4647 = vrot.lane.b32.xlu0 %v3774_v3, %s6575_s26  ;;  %6421 = vpow2.f32 %v5346_v9  ;;  %v4068_v3 = vadd.f32 %v9175_v22, %v9284_v49  ;;  %v4078_v9 = vadd.f32 %v9193_v16, %v9284_v49  ;;  %v4083_v22 = vadd.f32 %v9284_v49, %v9199_v58 }
 0x739   : > { %v6408_v43 = vpop.eup %6407  ;;  %6423 = vpow2.f32 %v5345_v1 }
 0x73a   : > { %v6410_v10 = vpop.eup %6409  ;;  %v3772_v44 = vmul.f32 %v6408_v43, %v8977_v54  ;;  %v5348_v54 = vmul.f32 -1.442695, %v4048_v34  ;;  %6425 = vpow2.f32 %v5347_v27  ;;  %v5352_v1 = vmul.f32 -1.442695, %v4068_v3  ;;  %v9911_v3 = vld [vmem:[#allocation27_spill] sm:$0xff] }
 0x73b   : > { %v3775_v41 = vmul.f32 %v6410_v10, %v8983_v37  ;;  %v6412_v59 = vpop.eup %6411  ;;  %v4058_v37 = vadd.f32 %v9167_v14, %v9284_v49  ;;  %v5351_v14 = vmul.f32 -1.442695, %v4063_v11  ;;  %v5354_v32 = vmul.f32 -1.442695, %v4078_v9  ;;  %v9912_v9 = vld [vmem:[#allocation32_spill] sm:$0xff] }
 0x73c   : > { %4643 = vrot.lane.b32.xlu0 %v3772_v44, %s6575_s26  ;;  %v4268_v6 = vadd.f32 1.0, %v6412_v59  ;;  %v4088_v44 = vadd.f32 %v9197_v39, %v9284_v49  ;;  %v4108_v27 = vadd.f32 %v9205_v18, %v9284_v49 }
 0x73d   : > { %4649 = vrot.lane.b32.xlu1 %v3775_v41, %s6575_s26  ;;  %v5350_v63 = vmul.f32 -1.442695, %v4058_v37  ;;  %v5355_v41 = vmul.f32 -1.442695, %v4083_v22  ;;  %v9909_v37 = vld [vmem:[#allocation25_spill] sm:$0xff] }
 0x73e   : > { %v6414_v28 = vpop.eup %6413  ;;  %6427 = vrcp.f32 %v4268_v6  ;;  %v5356_v58 = vmul.f32 -1.442695, %v4088_v44 }
 0x73f   : > { %v6416_v61 = vpop.eup %6415  ;;  %v3773_v19 = vmul.f32 %v6414_v28, %v8996_v56  ;;  %v4053_v56 = vadd.f32 %v9284_v49, %v9169_v17  ;;  %6429 = vpow2.f32 %v5348_v54  ;;  %v4073_v17 = vadd.f32 %v9284_v49, %v9195_v26 }
 0x740   : > { %v6418_v35 = vpop.eup %6417  ;;  %v4267_v40 = vadd.f32 1.0, %v6416_v61  ;;  %v4103_v54 = vadd.f32 %v9284_v49, %v9207_v5 }
 0x741   : > { %v6420_v25 = vpop.eup %6419  ;;  %4645 = vrot.lane.b32.xlu1 %v3773_v19, %s6575_s26  ;;  %v4269_v57 = vadd.f32 1.0, %v6418_v35  ;;  %v5349_v43 = vmul.f32 -1.442695, %v4053_v56 }
 0x742   : > { %v6422_v7 = vpop.eup %6421  ;;  %v4270_v30 = vadd.f32 1.0, %v6420_v25  ;;  %6431 = vrcp.f32 %v4267_v40  ;;  %v5360_v25 = vmul.f32 -1.442695, %v4108_v27  ;;  %v4098_v27 = vadd.f32 %v9201_v24, %v9284_v49  ;;  %v9918_v24 = vld [vmem:[#allocation48_spill] sm:$0xff] }
 0x743   : > { %6433 = vrcp.f32 %v4269_v57  ;;  %v4272_v33 = vadd.f32 1.0, %v6422_v7  ;;  %v6424_v62 = vpop.eup %6423  ;;  %v9910_v7 = vld [vmem:[#allocation36_spill] sm:$0xff] }
 0x744   : > { %6435 = vrcp.f32 %v4270_v30  ;;  %v4271_v16 = vadd.f32 1.0, %v6424_v62  ;;  %v6426_v10 = vpop.eup %6425  ;;  %v4093_v62 = vadd.f32 %v9284_v49, %v9203_v45 }
 0x745   : > { %4745 = vrot.lane.b32.xlu1 %v8808_v36, %s6575_s26  ;;  %6437 = vpow2.f32 %v5350_v63  ;;  %v5353_v36 = vmul.f32 -1.442695, %v4073_v17  ;;  %v4273_v34 = vadd.f32 1.0, %v6426_v10 }
 0x746   : > { %6439 = vpow2.f32 %v5351_v14 }
 0x747   : > { %6441 = vrcp.f32 %v4272_v33 }
 0x748   : > { %6443 = vpow2.f32 %v5349_v43  ;;  %v6428_v59 = vpop.eup %6427  ;;  %v5359_v43 = vmul.f32 -1.442695, %v4103_v54 }
 0x749   : > { %6445 = vpow2.f32 %v5352_v1  ;;  %v6430_v26 = vpop.eup %6429  ;;  %v4780_v30 = vsel %vm683_vm0, %v6428_v59, %v9910_v7 }
 0x74a   : > { %6447 = vpow2.f32 %v5354_v32  ;;  %v4274_v35 = vadd.f32 1.0, %v6430_v26  ;;  %v9915_v26 = vld [vmem:[#allocation34_spill] sm:$0xff] }
 0x74b   : > { %6449 = vrcp.f32 %v4271_v16  ;;  %v9913_v16 = vld [vmem:[#allocation30_spill] sm:$0xff] }
 0x74c   : > { %v6432_v28 = vpop.eup %6431  ;;  %6451 = vpow2.f32 %v5353_v36  ;;  %v9914_v36 = vld [vmem:[#allocation37_spill] sm:$0xff] }
 0x74d   : > { %v6434_v61 = vpop.eup %6433  ;;  %6453 = vpow2.f32 %v5355_v41  ;;  %v4779_v5 = vsel %vm683_vm0, %v6432_v28, %v9912_v9  ;;  %v9361_v45 = vsel %vm2098_vm8, %v4780_v30, %v9914_v36  ;;  %v9919_v30 = vld [vmem:[#allocation35_spill] sm:$0xff] }
 0x74e   : > { %v6436_v19 = vpop.eup %6435  ;;  %6455 = vrcp.f32 %v4273_v34  ;;  %v4781_v40 = vsel %vm683_vm0, %v6434_v61, %v9909_v37  ;;  %v4811_v34 = vsel %vm2098_vm8, %v4779_v5, %v9915_v26  ;;  %v9921_v5 = vld [vmem:[#allocation3_spill] sm:$0xff] }
 0x74f   : > { %v6438_v6 = vpop.eup %6437  ;;  %6457 = vpow2.f32 %v5356_v58  ;;  %v4813_v14 = vsel %vm2098_vm8, %v4781_v40, %v9911_v3  ;;  %v4782_v10 = vsel %vm683_vm0, %v6436_v19, %v9913_v16  ;;  %v9916_v19 = vld [vmem:[#allocation4_spill] sm:$0xff]  ;;  %v5358_v3 = vmul.f32 -1.442695, %v4098_v27 }
 0x750   : > { %v6440_v39 = vpop.eup %6439  ;;  %6459 = vrcp.f32 %v4274_v35  ;;  %v4276_v18 = vadd.f32 1.0, %v6438_v6  ;;  %v5357_v35 = vmul.f32 -1.442695, %v4093_v62  ;;  %v4123_v6 = vadd.f32 %v9284_v49, %v9220_v42 }
 0x751   : > { %v6442_v11 = vpop.eup %6441  ;;  %v4277_v63 = vadd.f32 1.0, %v6440_v39  ;;  %6461 = vpow2.f32 %v5360_v25  ;;  %v9917_v39 = vld [vmem:[#allocation33_spill] sm:$0xff] }
 0x752   : > { %v6444_v57 = vpop.eup %6443  ;;  %6463 = vrcp.f32 %v4276_v18  ;;  %v4814_v25 = vsel %vm2098_vm8, %v4782_v10, %v9917_v39  ;;  %v5363_v62 = vmul.f32 -1.442695, %v4123_v6 }
 0x753   : > { %v6446_v56 = vpop.eup %6445  ;;  %v4275_v22 = vadd.f32 1.0, %v6444_v57  ;;  %6465 = vrcp.f32 %v4277_v63  ;;  %v4784_v57 = vsel %vm683_vm0, %v6442_v11, %v9918_v24  ;;  %v4113_v11 = vadd.f32 %v9284_v49, %v9214_v46 }
 0x754   : > { %v6448_v33 = vpop.eup %6447  ;;  %v4278_v41 = vadd.f32 1.0, %v6446_v56  ;;  %6467 = vpow2.f32 %v5359_v43  ;;  %v9920_v56 = vld [vmem:[#allocation46_spill] sm:$0xff]  ;;  %v4118_v46 = vadd.f32 %v9212_v31, %v9284_v49  ;;  %v4143_v31 = vadd.f32 %v9284_v49, %v9259_v55 }
 0x755   : > { %v6450_v1 = vpop.eup %6449  ;;  %v4280_v58 = vadd.f32 1.0, %v6448_v33  ;;  %6469 = vrcp.f32 %v4275_v22  ;;  %v4133_v55 = vadd.f32 %v9284_v49, %v9251_v12 }
 0x756   : > { %v6452_v44 = vpop.eup %6451  ;;  %6471 = vrcp.f32 %v4278_v41  ;;  %v4783_v63 = vsel %vm683_vm0, %v6450_v1, %v9920_v56  ;;  %v5367_v12 = vmul.f32 -1.442695, %v4143_v31 }
 0x757   : > { %v6454_v28 = vpop.eup %6453  ;;  %v4279_v37 = vadd.f32 1.0, %v6452_v44  ;;  %6473 = vrcp.f32 %v4280_v58  ;;  %v9924_v44 = vld [vmem:[#allocation47_spill] sm:$0xff] }
 0x758   : > { %v6456_v54 = vpop.eup %6455  ;;  %v4281_v7 = vadd.f32 1.0, %v6454_v28  ;;  %6475 = vpow2.f32 %v5357_v35  ;;  %v4815_v41 = vsel %vm2098_vm8, %v4783_v63, %v9924_v44  ;;  %v9926_v28 = vld [vmem:[#allocation43_spill] sm:$0xff] }
 0x759   : > { %v4592_v17 = vpop.permute.xlu0 %4591  ;;  %v6458_v18 = vpop.eup %6457  ;;  %6477 = vrcp.f32 %v4279_v37 }
 0x75a   : > { %v4846_v32 = vsel %vm4843_vm15, %v4813_v14, %v4592_v17  ;;  %4974 = vxpose.xlu0.b32.start [1/16] (narrow) %v9916_v19, 16  ;;  %v4128_v14 = vadd.f32 %v9218_v0, %v9284_v49  ;;  %v6460_v33 = vpop.eup %6459  ;;  %v9922_v17 = vld [vmem:[#allocation49_spill] sm:$0xff]  ;;  %v4282_v22 = vadd.f32 1.0, %v6458_v18  ;;  %6479 = vrcp.f32 %v4281_v7  ;;  %v9927_v19 = vld [vmem:[#allocation42_spill] sm:$0xff] }
 0x75b   : > { %v4879_v59 = vsel %vm4876_vm1, %v4846_v32, %v9071_v50  ;;  %v9392_v1 = vsel %vm2098_vm8, %v4784_v57, %v9922_v17  ;;  %v9923_v32 = vld [vmem:[#allocation39_spill] sm:$0xff]  ;;  %v6462_v10 = vpop.eup %6461  ;;  %6481 = vpow2.f32 %v5358_v3  ;;  %v4786_v58 = vsel %vm683_vm0, %v6460_v33, %v9926_v28 }
 0x75c   : > { %v4912_v61 = vsel %vm4909_vm2, %v4879_v59, 0.0  ;;  %v4785_v16 = vsel %vm683_vm0, %v6456_v54, %v9923_v32  ;;  %v5364_v59 = vmul.f32 -1.442695, %v4128_v14  ;;  %v9407_v27 = vpop.eup %6463  ;;  %6483 = vpow2.f32 %v5363_v62  ;;  %v9930_v14 = vld [vmem:[#allocation51_spill] sm:$0xff] }
 0x75d   : > { %4944 = vst [vmem:[%s9354_s23 + $0x10] sm:$0xff] %v4912_v61  ;;  %v4588_v50 = vpop.permute.xlu0 %4587  ;;  %v5361_v61 = vmul.f32 -1.442695, %v4113_v11  ;;  %v4817_v35 = vsel %vm2098_vm8, %v4785_v16, %v9927_v19  ;;  %6485 = vrcp.f32 %v4282_v22  ;;  %v4286_v39 = vadd.f32 1.0, %v6462_v10 }
 0x75e   : > { %v4844_v40 = vsel %vm4843_vm15, %v4811_v34, %v4588_v50  ;;  %4975 = vxpose.xlu0.b32.cont [2/16] (narrow) %v9921_v5, 16  ;;  %v9925_v34 = vld [vmem:[#allocation6_spill] sm:$0xff]  ;;  %v6466_v50 = vpop.eup %6465  ;;  %6487 = vpow2.f32 %v5364_v59  ;;  %v4138_v32 = vadd.f32 %v9248_v13, %v9284_v49 }
 0x75f   : > { %v4877_v42 = vsel %vm4876_vm1, %v4844_v40, %v9919_v30  ;;  %v6468_v37 = vpop.eup %6467  ;;  %v5362_v40 = vmul.f32 -1.442695, %v4118_v46  ;;  %6489 = vpow2.f32 %v5361_v61  ;;  %v9934_v13 = vld [vmem:[#allocation58_spill] sm:$0xff] }
 0x760   : > { %v4910_v9 = vsel %vm4909_vm2, %v4877_v42, 0.0  ;;  %v6470_v18 = vpop.eup %6469  ;;  %v9928_v42 = vld [vmem:[#allocation5_spill] sm:$0xff]  ;;  %6491 = vrcp.f32 %v4286_v39  ;;  %v4285_v5 = vadd.f32 1.0, %v6468_v37 }
 0x761   : > { %4942 = vst [vmem:[%s9354_s23] sm:$0xff] %v4910_v9  ;;  %v4594_v43 = vpop.permute.xlu1 %4593  ;;  %v6472_v56 = vpop.eup %6471  ;;  %v4789_v9 = vsel %vm683_vm0, %v6466_v50, %v9930_v14  ;;  %6493 = vpow2.f32 %v5362_v40  ;;  %v4787_v28 = vsel %vm683_vm0, %v6470_v18, %v9934_v13  ;;  %v9935_v50 = vld [vmem:[#allocation60_spill] sm:$0xff]  ;;  %v9936_v40 = vld [vmem:[#allocation7_spill] sm:$0xff]  ;;  %v9946_v13 = vld [vmem:[#allocation9_spill] sm:$0xff] }
 0x762   : > { %v4847_v0 = vsel %vm4843_vm15, %v4814_v25, %v4594_v43  ;;  %4976 = vxpose.xlu0.b32.cont [3/16] (narrow) %v9925_v34, 16  ;;  %v5365_v43 = vmul.f32 -1.442695, %v4133_v55  ;;  %6495 = vpow2.f32 %v5367_v12  ;;  %v4788_v39 = vsel %vm683_vm0, %v9407_v27, %v9935_v50 }
 0x763   : > { %v4880_v36 = vsel %vm4876_vm1, %v4847_v0, %v9075_v20  ;;  %6497 = vrcp.f32 %v4285_v5 }
 0x764   : > { %v4913_v26 = vsel %vm4909_vm2, %v4880_v36, 0.0  ;;  %v9931_v36 = vld [vmem:[#allocation8_spill] sm:$0xff]  ;;  %6499 = vpow2.f32 %v5365_v43 }
 0x765   : > { %4945 = vst [vmem:[%s9354_s23 + $0x18] sm:$0xff] %v4913_v26  ;;  %v4590_v20 = vpop.permute.xlu1 %4589  ;;  %v4600_v6 = vpop.permute.xlu0 %4599  ;;  %v9933_v26 = vld [vmem:[#allocation55_spill] sm:$0xff] }
 0x766   : > { %v4845_v25 = vsel %vm4843_vm15, %v9361_v45, %v4590_v20  ;;  %v4850_v54 = vsel %vm4843_vm15, %v4817_v35, %v4600_v6  ;;  %v4148_v45 = vadd.f32 %v9256_v53, %v9284_v49  ;;  %4977 = vxpose.xlu0.b32.cont [4/16] (narrow) %v9928_v42, 16  ;;  %v9434_v53 = vpop.eup %6473  ;;  %v4790_v34 = vsel %vm683_vm0, %v6472_v56, %v9933_v26 }
 0x767   : > { %v4878_v24 = vsel %vm4876_vm1, %v4845_v25, %v9066_v8  ;;  %v4883_v57 = vsel %vm4876_vm1, %v4850_v54, %v9087_v2  ;;  %v9929_v8 = vld [vmem:[#allocation45_spill] sm:$0xff]  ;;  %v6476_v62 = vpop.eup %6475  ;;  %v5366_v54 = vmul.f32 -1.442695, %v4138_v32 }
 0x768   : > { %v4911_v7 = vsel %vm4909_vm2, %v4878_v24, 0.0  ;;  %v4916_v30 = vsel %vm4909_vm2, %v4883_v57, 0.0  ;;  %v4818_v63 = vsel %vm2098_vm8, %v4786_v58, %v9929_v8  ;;  %v6478_v0 = vpop.eup %6477  ;;  %v5368_v16 = vmul.f32 -1.442695, %v4148_v45  ;;  %v9938_v57 = vld [vmem:[#allocation59_spill] sm:$0xff] }
 0x769   : > { %4943 = vst [vmem:[%s9354_s23 + $0x8] sm:$0xff] %v4911_v7  ;;  %4948 = vst [vmem:[%s9354_s23 + $0x30] sm:$0xff] %v4916_v30  ;;  %v4602_v2 = vpop.permute.xlu1 %4601  ;;  %v4596_v3 = vpop.permute.xlu0 %4595  ;;  %v4283_v61 = vadd.f32 1.0, %v6476_v62  ;;  %v4819_v18 = vsel %vm2098_vm8, %v4787_v28, %v9938_v57  ;;  %v9939_v45 = vld [vmem:[#allocation63_spill] sm:$0xff]  ;;  %v4791_v62 = vsel %vm683_vm0, %v6478_v0, %v8804_v47  ;;  %v9947_v28 = vld [vmem:[#allocation68_spill] sm:$0xff] }
 0x76a   : > { %v4851_v33 = vsel %vm4843_vm15, %v4818_v63, %v4602_v2  ;;  %v4848_v11 = vsel %vm4843_vm15, %v4815_v41, %v4596_v3  ;;  %4978 = vxpose.xlu0.b32.cont [5/16] (narrow) %v9931_v36, 16  ;;  %v6480_v44 = vpop.eup %6479  ;;  %6501 = vpow2.f32 %v5368_v16  ;;  %v9940_v3 = vld [vmem:[#allocation61_spill] sm:$0xff] }
 0x76b   : > { %v4884_v17 = vsel %vm4876_vm1, %v4851_v33, %v9091_v52  ;;  %v4881_v22 = vsel %vm4876_vm1, %v4848_v11, %v9079_v29  ;;  %v9932_v52 = vld [vmem:[#allocation54_spill] sm:$0xff]  ;;  %v6482_v58 = vpop.eup %6481  ;;  %v4793_v7 = vsel %vm683_vm0, %v6480_v44, %v9939_v45  ;;  %6503 = vrcp.f32 %v4283_v61  ;;  %v9943_v16 = vld [vmem:[#allocation65_spill] sm:$0xff]  ;;  %v9944_v44 = vld [vmem:[#allocation100_spill] sm:$0xff] }
 0x76c   : > { %v4917_v10 = vsel %vm4909_vm2, %v4884_v17, 0.0  ;;  %v4914_v46 = vsel %vm4909_vm2, %v4881_v22, 0.0  ;;  %v4821_v59 = vsel %vm2098_vm8, %v4789_v9, %v9932_v52  ;;  %v6484_v19 = vpop.eup %6483  ;;  %v4284_v55 = vadd.f32 1.0, %v6482_v58  ;;  %v9941_v11 = vld [vmem:[#allocation10_spill] sm:$0xff]  ;;  %v9942_v17 = vld [vmem:[#allocation64_spill] sm:$0xff]  ;;  %v9945_v52 = vld [vmem:[#allocation103_spill] sm:$0xff] }
 0x76d   : > { %4949 = vst [vmem:[%s9354_s23 + $0x38] sm:$0xff] %v4917_v10  ;;  %4946 = vst [vmem:[%s9354_s23 + $0x20] sm:$0xff] %v4914_v46  ;;  %v4598_v41 = vpop.permute.xlu1 %4597  ;;  %v4608_v29 = vpop.permute.xlu0 %4607  ;;  %v4289_v42 = vadd.f32 1.0, %v6484_v19  ;;  %v4820_v14 = vsel %vm2098_vm8, %v4788_v39, %v9940_v3  ;;  %6505 = vpow2.f32 %v5366_v54  ;;  %v4825_v22 = vsel %vm2098_vm8, %v4793_v7, %v9942_v17  ;;  %v9953_v7 = vld [vmem:[#allocation12_spill] sm:$0xff] }
 0x76e   : > { %v4849_v31 = vsel %vm4843_vm15, %v9392_v1, %v4598_v41  ;;  %v4854_v20 = vsel %vm4843_vm15, %v4821_v59, %v4608_v29  ;;  %v6486_v25 = vpop.eup %6485  ;;  %4979 = vxpose.xlu0.b32.cont [6/16] (narrow) %v9936_v40, 16  ;;  %6507 = vrcp.f32 %v4284_v55  ;;  %v4792_v58 = vsel %vm683_vm0, %v9434_v53, %v9947_v28  ;;  %v9951_v55 = vld [vmem:[#allocation101_spill] sm:$0xff] }
 0x76f   : > { %v4882_v35 = vsel %vm4876_vm1, %v4849_v31, %v9083_v38  ;;  %v4887_v6 = vsel %vm4876_vm1, %v4854_v20, %v9107_v60  ;;  %v9937_v38 = vld [vmem:[#allocation57_spill] sm:$0xff]  ;;  %v6488_v30 = vpop.eup %6487  ;;  %v4794_v10 = vsel %vm683_vm0, %v6486_v25, %v9943_v16  ;;  %6509 = vrcp.f32 %v4289_v42  ;;  %v9948_v20 = vld [vmem:[#allocation66_spill] sm:$0xff] }
 0x770   : > { %v4915_v37 = vsel %vm4909_vm2, %v4882_v35, 0.0  ;;  %v4920_v1 = vsel %vm4909_vm2, %v4887_v6, 0.0  ;;  %v4822_v24 = vsel %vm2098_vm8, %v4790_v34, %v9937_v38  ;;  %v6490_v8 = vpop.eup %6489  ;;  %v4826_v19 = vsel %vm2098_vm8, %v4794_v10, %v9948_v20  ;;  %v9949_v6 = vld [vmem:[#allocation67_spill] sm:$0xff]  ;;  %v9954_v42 = vld [vmem:[#allocation69_spill] sm:$0xff] }
 0x771   : > { %4947 = vst [vmem:[%s9354_s23 + $0x28] sm:$0xff] %v4915_v37  ;;  %4952 = vst [vmem:[%s9354_s23 + $0x50] sm:$0xff] %v4920_v1  ;;  %v4610_v60 = vpop.permute.xlu1 %4609  ;;  %v4604_v27 = vpop.permute.xlu0 %4603  ;;  %v4287_v46 = vadd.f32 1.0, %v6490_v8  ;;  %v4823_v50 = vsel %vm2098_vm8, %v4791_v62, %v9949_v6  ;;  %v9950_v1 = vld [vmem:[#allocation104_spill] sm:$0xff]  ;;  %v9957_v62 = vld [vmem:[#allocation102_spill] sm:$0xff] }
 0x772   : > { %v4855_v56 = vsel %vm4843_vm15, %v4822_v24, %v4610_v60  ;;  %v4852_v12 = vsel %vm4843_vm15, %v4819_v18, %v4604_v27  ;;  %v6492_v9 = vpop.eup %6491  ;;  %4980 = vxpose.xlu0.b32.cont [7/16] (narrow) %v9941_v11, 16  ;;  %v9952_v24 = vld [vmem:[#allocation70_spill] sm:$0xff]  ;;  %v9955_v8 = vld [vmem:[#allocation72_spill] sm:$0xff]  ;;  %v9960_v10 = vld [vmem:[#allocation11_spill] sm:$0xff] }
 0x773   : > { %v4888_v63 = vsel %vm4876_vm1, %v4855_v56, %v9111_v21  ;;  %v4885_v2 = vsel %vm4876_vm1, %v4852_v12, %v9095_v23  ;;  %v6494_v43 = vpop.eup %6493  ;;  %v4290_v21 = vadd.f32 1.0, %v6488_v30  ;;  %v4824_v56 = vsel %vm2098_vm8, %v4792_v58, %v9954_v42  ;;  %v9964_v58 = vld [vmem:[#allocation108_spill] sm:$0xff]  ;;  %v9966_v6 = vld [vmem:[#allocation105_spill] sm:$0xff]  ;;  %v9972_v42 = vld [vmem:[#allocation82_spill] sm:$0xff] }
 0x774   : > { %v4921_v5 = vsel %vm4909_vm2, %v4888_v63, 0.0  ;;  %v4918_v33 = vsel %vm4909_vm2, %v4885_v2, 0.0  ;;  %v6496_v0 = vpop.eup %6495  ;;  %v4288_v31 = vadd.f32 1.0, %v6494_v43  ;;  %v4798_v63 = vsel %vm683_vm0, %v6492_v9, %v9955_v8 }
 0x775   : > { %4953 = vst [vmem:[%s9354_s23 + $0x58] sm:$0xff] %v4921_v5  ;;  %4950 = vst [vmem:[%s9354_s23 + $0x40] sm:$0xff] %v4918_v33  ;;  %v4606_v23 = vpop.permute.xlu1 %4605  ;;  %v4616_v32 = vpop.permute.xlu0 %4615  ;;  %6511 = vrcp.f32 %v4290_v21  ;;  %v4293_v54 = vadd.f32 1.0, %v6496_v0  ;;  %v4163_v0 = vadd.f32 %v9284_v49, %v9298_v4 }
 0x776   : > { %v4853_v36 = vsel %vm4843_vm15, %v4820_v14, %v4606_v23  ;;  %v4858_v47 = vsel %vm4843_vm15, %v4825_v22, %v4616_v32  ;;  %v6498_v29 = vpop.eup %6497  ;;  %4981 = vxpose.xlu0.b32.cont [8/16] (narrow) %v9946_v13, 16  ;;  %6513 = vrcp.f32 %v4287_v46  ;;  %v9956_v14 = vld [vmem:[#allocation71_spill] sm:$0xff]  ;;  %v9958_v23 = vld [vmem:[#allocation74_spill] sm:$0xff]  ;;  %v9961_v46 = vld [vmem:[#allocation73_spill] sm:$0xff] }
 0x777   : > { %v4886_v41 = vsel %vm4876_vm1, %v4853_v36, %v9944_v44  ;;  %v4891_v59 = vsel %vm4876_vm1, %v4858_v47, %v9945_v52  ;;  %v6500_v61 = vpop.eup %6499  ;;  %v4797_v60 = vsel %vm683_vm0, %v6498_v29, %v9952_v24  ;;  %6515 = vrcp.f32 %v4288_v31  ;;  %v9959_v32 = vld [vmem:[#allocation107_spill] sm:$0xff]  ;;  %v9965_v31 = vld [vmem:[#allocation78_spill] sm:$0xff] }
 0x778   : > { %v4919_v26 = vsel %vm4909_vm2, %v4886_v41, 0.0  ;;  %v4924_v34 = vsel %vm4909_vm2, %v4891_v59, 0.0  ;;  %v6502_v25 = vpop.eup %6501  ;;  %v4291_v18 = vadd.f32 1.0, %v6500_v61  ;;  %6517 = vrcp.f32 %v4293_v54  ;;  %v9962_v59 = vld [vmem:[#allocation75_spill] sm:$0xff] }
 0x779   : > { %4951 = vst [vmem:[%s9354_s23 + $0x48] sm:$0xff] %v4919_v26  ;;  %4956 = vst [vmem:[%s9354_s23 + $0x70] sm:$0xff] %v4924_v34  ;;  %v4618_v35 = vpop.permute.xlu1 %4617  ;;  %v4612_v39 = vpop.permute.xlu0 %4611  ;;  %v4294_v30 = vadd.f32 1.0, %v6502_v25  ;;  %v4829_v5 = vsel %vm2098_vm8, %v4797_v60, %v9956_v14  ;;  %v4830_v36 = vsel %vm2098_vm8, %v4798_v63, %v9961_v46  ;;  %v9963_v34 = vld [vmem:[#allocation76_spill] sm:$0xff]  ;;  %v5371_v25 = vmul.f32 -1.442695, %v4163_v0 }
 0x77a   : > { %v4859_v53 = vsel %vm4843_vm15, %v4826_v19, %v4618_v35  ;;  %v4856_v37 = vsel %vm4843_vm15, %v4823_v50, %v4612_v39  ;;  %v6504_v57 = vpop.eup %6503  ;;  %4982 = vxpose.xlu0.b32.cont [9/16] (narrow) %v9953_v7, 16  ;;  %6519 = vrcp.f32 %v4291_v18  ;;  %v9967_v39 = vld [vmem:[#allocation14_spill] sm:$0xff]  ;;  %v9970_v60 = vld [vmem:[#allocation80_spill] sm:$0xff]  ;;  %v9973_v63 = vld [vmem:[#allocation111_spill] sm:$0xff]  ;;  %v4158_v0 = vadd.f32 %v9286_v48, %v9284_v49 }
 0x77b   : > { %v4892_v40 = vsel %vm4876_vm1, %v4859_v53, %v9950_v1  ;;  %v4889_v38 = vsel %vm4876_vm1, %v4856_v37, %v9951_v55  ;;  %v6506_v2 = vpop.eup %6505  ;;  %v4795_v17 = vsel %vm683_vm0, %v6504_v57, %v9958_v23  ;;  %6521 = vrcp.f32 %v4294_v30  ;;  %v9968_v53 = vld [vmem:[#allocation77_spill] sm:$0xff]  ;;  %v9969_v55 = vld [vmem:[#allocation79_spill] sm:$0xff] }
 0x77c   : > { %v4925_v27 = vsel %vm4909_vm2, %v4892_v40, 0.0  ;;  %v4922_v45 = vsel %vm4909_vm2, %v4889_v38, 0.0  ;;  %v6508_v11 = vpop.eup %6507  ;;  %v4292_v47 = vadd.f32 1.0, %v6506_v2  ;;  %v4827_v29 = vsel %vm2098_vm8, %v4795_v17, %v9962_v59  ;;  %v9975_v14 = vld [vmem:[#allocation81_spill] sm:$0xff]  ;;  %v9977_v17 = vld [vmem:[#allocation84_spill] sm:$0xff] }
 0x77d   : > { %4957 = vst [vmem:[%s9354_s23 + $0x78] sm:$0xff] %v4925_v27  ;;  %4954 = vst [vmem:[%s9354_s23 + $0x60] sm:$0xff] %v4922_v45  ;;  %v4614_v12 = vpop.permute.xlu1 %4613  ;;  %v4624_v33 = vpop.permute.xlu0 %4623  ;;  %v4796_v13 = vsel %vm683_vm0, %v6508_v11, %v9963_v34  ;;  %v4153_v27 = vadd.f32 %v9284_v49, %v9288_v51  ;;  %v9971_v45 = vld [vmem:[#allocation106_spill] sm:$0xff]  ;;  %v9981_v59 = vld [vmem:[#allocation16_spill] sm:$0xff] }
 0x77e   : > { %v4857_v3 = vsel %vm4843_vm15, %v4824_v56, %v4614_v12  ;;  %v4862_v21 = vsel %vm4843_vm15, %v4829_v5, %v4624_v33  ;;  %v6510_v9 = vpop.eup %6509  ;;  %4983 = vxpose.xlu0.b32.cont [10/16] (narrow) %v9960_v10, 16  ;;  %6523 = vrcp.f32 %v4292_v47  ;;  %v4828_v37 = vsel %vm2098_vm8, %v4796_v13, %v9968_v53 }
 0x77f   : > { %v4890_v43 = vsel %vm4876_vm1, %v4857_v3, %v9957_v62  ;;  %v4895_v16 = vsel %vm4876_vm1, %v4862_v21, %v9959_v32  ;;  %v6512_v28 = vpop.eup %6511  ;;  %v4801_v20 = vsel %vm683_vm0, %v6510_v9, %v9965_v31  ;;  %v9974_v3 = vld [vmem:[#allocation13_spill] sm:$0xff]  ;;  %6525 = vpow2.f32 %v5371_v25 }
 0x780   : > { %v4923_v22 = vsel %vm4909_vm2, %v4890_v43, 0.0  ;;  %v4928_v44 = vsel %vm4909_vm2, %v4895_v16, 0.0  ;;  %v6514_v19 = vpop.eup %6513  ;;  %v4833_v38 = vsel %vm2098_vm8, %v4801_v20, %v9969_v55  ;;  %v4802_v57 = vsel %vm683_vm0, %v6512_v28, %v9970_v60  ;;  %v9976_v43 = vld [vmem:[#allocation83_spill] sm:$0xff]  ;;  %v9978_v16 = vld [vmem:[#allocation112_spill] sm:$0xff]  ;;  %v9985_v20 = vld [vmem:[#allocation90_spill] sm:$0xff] }
 0x781   : > { %4955 = vst [vmem:[%s9354_s23 + $0x68] sm:$0xff] %v4923_v22  ;;  %v4626_v41 = vpop.permute.xlu1 %4625  ;;  %4960 = vst [vmem:[%s9354_s23 + $0x90] sm:$0xff] %v4928_v44  ;;  %v4620_v26 = vpop.permute.xlu0 %4619  ;;  %v4799_v56 = vsel %vm683_vm0, %v6514_v19, %v9972_v42  ;;  %v4834_v5 = vsel %vm2098_vm8, %v4802_v57, %v9975_v14  ;;  %v5369_v32 = vmul.f32 -1.442695, %v4153_v27  ;;  %v9990_v60 = vld [vmem:[#allocation91_spill] sm:$0xff]  ;;  %v9991_v27 = vld [vmem:[#allocation92_spill] sm:$0xff] }
 0x782   : > { %v4863_v52 = vsel %vm4843_vm15, %v4830_v36, %v4626_v41  ;;  %v4860_v61 = vsel %vm4843_vm15, %v4827_v29, %v4620_v26  ;;  %4984 = vxpose.xlu0.b32.cont [11/16] (narrow) %v9967_v39, 16  ;;  %v6516_v18 = vpop.eup %6515  ;;  %v4831_v21 = vsel %vm2098_vm8, %v4799_v56, %v9976_v43  ;;  %v9979_v36 = vld [vmem:[#allocation86_spill] sm:$0xff]  ;;  %v9980_v41 = vld [vmem:[#allocation109_spill] sm:$0xff]  ;;  %v9992_v42 = vld [vmem:[#allocation116_spill] sm:$0xff] }
 0x783   : > { %v4896_v4 = vsel %vm4876_vm1, %v4863_v52, %v9964_v58  ;;  %v4893_v50 = vsel %vm4876_vm1, %v4860_v61, %v9966_v6  ;;  %v6518_v12 = vpop.eup %6517  ;;  %v4800_v9 = vsel %vm683_vm0, %v6516_v18, %v9977_v17  ;;  %v9982_v26 = vld [vmem:[#allocation85_spill] sm:$0xff]  ;;  %v9983_v58 = vld [vmem:[#allocation87_spill] sm:$0xff]  ;;  %v9984_v61 = vld [vmem:[#allocation88_spill] sm:$0xff]  ;;  %6527 = vpow2.f32 %v5369_v32 }
 0x784   : > { %v4929_v35 = vsel %vm4909_vm2, %v4896_v4, 0.0  ;;  %v4926_v54 = vsel %vm4909_vm2, %v4893_v50, 0.0  ;;  %v6520_v11 = vpop.eup %6519  ;;  %v4805_v47 = vsel %vm683_vm0, %v6518_v12, %v9979_v36  ;;  %v4832_v34 = vsel %vm2098_vm8, %v4800_v9, %v9982_v26  ;;  %v9986_v50 = vld [vmem:[#allocation110_spill] sm:$0xff]  ;;  %v9995_v14 = vld [vmem:[#allocation93_spill] sm:$0xff]  ;;  %v10000_v26 = vld [vmem:[#allocation119_spill] sm:$0xff] }
 0x785   : > { %4961 = vst [vmem:[%s9354_s23 + $0x98] sm:$0xff] %v4929_v35  ;;  %v4622_v1 = vpop.permute.xlu1 %4621  ;;  %4958 = vst [vmem:[%s9354_s23 + $0x80] sm:$0xff] %v4926_v54  ;;  %v4632_v24 = vpop.permute.xlu0 %4631  ;;  %v4837_v48 = vsel %vm2098_vm8, %v4805_v47, %v9983_v58  ;;  %v4803_v19 = vsel %vm683_vm0, %v6520_v11, %v9985_v20  ;;  %v4168_v6 = vadd.f32 %v9294_v15, %v9284_v49  ;;  %v5370_v54 = vmul.f32 -1.442695, %v4158_v0  ;;  %v9996_v43 = vld [vmem:[#allocation114_spill] sm:$0xff]  ;;  %v9997_v17 = vld [vmem:[#allocation17_spill] sm:$0xff] }
 0x786   : > { %v4861_v40 = vsel %vm4843_vm15, %v4828_v37, %v4622_v1  ;;  %v4866_v30 = vsel %vm4843_vm15, %v4833_v38, %v4632_v24  ;;  %4985 = vxpose.xlu0.b32.cont [12/16] (narrow) %v9974_v3, 16  ;;  %v6522_v22 = vpop.eup %6521  ;;  %v9987_v37 = vld [vmem:[#allocation115_spill] sm:$0xff]  ;;  %v9989_v38 = vld [vmem:[#allocation89_spill] sm:$0xff]  ;;  %v4835_v57 = vsel %vm2098_vm8, %v4803_v19, %v9990_v60  ;;  %v9994_v3 = vld [vmem:[#allocation18_spill] sm:$0xff] }
 0x787   : > { %v4894_v7 = vsel %vm4876_vm1, %v4861_v40, %v9971_v45  ;;  %v4899_v2 = vsel %vm4876_vm1, %v4866_v30, %v9973_v63  ;;  %v4806_v31 = vsel %vm683_vm0, %v6522_v22, %v9984_v61  ;;  %v9988_v40 = vld [vmem:[#allocation15_spill] sm:$0xff]  ;;  %v5372_v30 = vmul.f32 -1.442695, %v4168_v6  ;;  %v9993_v63 = vld [vmem:[#allocation113_spill] sm:$0xff]  ;;  %v9998_v47 = vld [vmem:[#allocation94_spill] sm:$0xff] }
 0x788   : > { %v4927_v8 = vsel %vm4909_vm2, %v4894_v7, 0.0  ;;  %v4932_v51 = vsel %vm4909_vm2, %v4899_v2, 0.0  ;;  %v6524_v35 = vpop.eup %6523  ;;  %v4838_v49 = vsel %vm2098_vm8, %v4806_v31, %v9989_v38  ;;  %6529 = vpow2.f32 %v5370_v54  ;;  %v10003_v6 = vld [vmem:[#allocation117_spill] sm:$0xff] }
 0x789   : > { %4959 = vst [vmem:[%s9354_s23 + $0x88] sm:$0xff] %v4927_v8  ;;  %v4634_v33 = vpop.permute.xlu1 %4633  ;;  %4964 = vst [vmem:[%s9354_s23 + $0xb0] sm:$0xff] %v4932_v51  ;;  %v4628_v23 = vpop.permute.xlu0 %4627  ;;  %v4804_v45 = vsel %vm683_vm0, %v6524_v35, %v9991_v27  ;;  %6531 = vpow2.f32 %v5372_v30 }
 0x78a   : > { %v4867_v62 = vsel %vm4843_vm15, %v4834_v5, %v4634_v33  ;;  %v4864_v46 = vsel %vm4843_vm15, %v4831_v21, %v4628_v23  ;;  %4986 = vxpose.xlu0.b32.cont [13/16] (narrow) %v9981_v59, 16  ;;  %v6526_v7 = vpop.eup %6525  ;;  %v4836_v5 = vsel %vm2098_vm8, %v4804_v45, %v9995_v14 }
 0x78b   : > { %v4900_v10 = vsel %vm4876_vm1, %v4867_v62, %v9978_v16  ;;  %v4897_v52 = vsel %vm4876_vm1, %v4864_v46, %v9980_v41  ;;  %v4297_v11 = vadd.f32 1.0, %v6526_v7  ;;  %v9999_v41 = vld [vmem:[#allocation95_spill] sm:$0xff] }
 0x78c   : > { %v4933_v44 = vsel %vm4909_vm2, %v4900_v10, 0.0  ;;  %v4930_v29 = vsel %vm4909_vm2, %v4897_v52, 0.0 }
 0x78d   : > { %4965 = vst [vmem:[%s9354_s23 + $0xb8] sm:$0xff] %v4933_v44  ;;  %v4630_v13 = vpop.permute.xlu1 %4629  ;;  %4962 = vst [vmem:[%s9354_s23 + $0xa0] sm:$0xff] %v4930_v29  ;;  %v4640_v4 = vpop.permute.xlu0 %4639  ;;  %6533 = vrcp.f32 %v4297_v11 }
 0x78e   : > { %v4865_v28 = vsel %vm4843_vm15, %v4832_v34, %v4630_v13  ;;  %v4870_v25 = vsel %vm4843_vm15, %v4837_v48, %v4640_v4  ;;  %4987 = vxpose.xlu0.b32.cont [14/16] (narrow) %v9988_v40, 16  ;;  %v6528_v9 = vpop.eup %6527  ;;  %v10002_v4 = vld [vmem:[#allocation99_spill] sm:$0xff] }
 0x78f   : > { %v4898_v39 = vsel %vm4876_vm1, %v4865_v28, %v9986_v50  ;;  %v4903_v1 = vsel %vm4876_vm1, %v4870_v25, %v9987_v37  ;;  %v4295_v22 = vadd.f32 1.0, %v6528_v9  ;;  %v10001_v28 = vld [vmem:[#allocation98_spill] sm:$0xff] }
 0x790   : > { %v4931_v53 = vsel %vm4909_vm2, %v4898_v39, 0.0  ;;  %v4936_v55 = vsel %vm4909_vm2, %v4903_v1, 0.0  ;;  %v10004_v39 = vld [vmem:[#allocation118_spill] sm:$0xff]  ;;  %v10006_v1 = vld [vmem:[#allocation120_spill] sm:$0xff] }
 0x791   : > { %4963 = vst [vmem:[%s9354_s23 + $0xa8] sm:$0xff] %v4931_v53  ;;  %v4642_v15 = vpop.permute.xlu1 %4641  ;;  %4968 = vst [vmem:[%s9354_s23 + $0xd0] sm:$0xff] %v4936_v55  ;;  %v4636_v18 = vpop.permute.xlu0 %4635  ;;  %6535 = vrcp.f32 %v4295_v22  ;;  %v10005_v53 = vld [vmem:[#allocation96_spill] sm:$0xff] }
 0x792   : > { %v4871_v24 = vsel %vm4843_vm15, %v4838_v49, %v4642_v15  ;;  %v4868_v12 = vsel %vm4843_vm15, %v4835_v57, %v4636_v18  ;;  %4988 = vxpose.xlu0.b32.cont [15/16] (narrow) %v9994_v3, 16  ;;  %v6530_v32 = vpop.eup %6529  ;;  %v10007_v49 = vld [vmem:[#allocation121_spill] sm:$0xff] }
 0x793   : > { %v4904_v56 = vsel %vm4876_vm1, %v4871_v24, %v9992_v42  ;;  %v4901_v2 = vsel %vm4876_vm1, %v4868_v12, %v9993_v63  ;;  %v6532_v16 = vpop.eup %6531  ;;  %v4296_v10 = vadd.f32 1.0, %v6530_v32  ;;  %v10008_v24 = vld [vmem:[#allocation97_spill] sm:$0xff] }
 0x794   : > { %v4937_v8 = vsel %vm4909_vm2, %v4904_v56, 0.0  ;;  %v4934_v51 = vsel %vm4909_vm2, %v4901_v2, 0.0  ;;  %v4298_v36 = vadd.f32 1.0, %v6532_v16 }
 0x795   : > { %4969 = vst [vmem:[%s9354_s23 + $0xd8] sm:$0xff] %v4937_v8  ;;  %v4638_v33 = vpop.permute.xlu1 %4637  ;;  %4966 = vst [vmem:[%s9354_s23 + $0xc0] sm:$0xff] %v4934_v51  ;;  %6537 = vrcp.f32 %v4296_v10 }
 0x796   : > { %v4869_v62 = vsel %vm4843_vm15, %v4836_v5, %v4638_v33  ;;  %4989 = vxpose.xlu0.b32.end [16/16] (narrow) %v9997_v17, 16  ;;  %6539 = vrcp.f32 %v4298_v36 }
 0x797   : > { %v4902_v21 = vsel %vm4876_vm1, %v4869_v62, %v9996_v43  ;;  %v6534_v46 = vpop.eup %6533 }
 0x798   : > { %v4935_v23 = vsel %vm4909_vm2, %v4902_v21, 0.0  ;;  %v4809_v0 = vsel %vm683_vm0, %v6534_v46, %v9998_v47 }
 0x799   : > { %4967 = vst [vmem:[%s9354_s23 + $0xc8] sm:$0xff] %v4935_v23  ;;  %v4841_v52 = vsel %vm2098_vm8, %v4809_v0, %v9999_v41 }
 0x79b   : > { %v6536_v44 = vpop.eup %6535 }
 0x79c   : > { %v4807_v58 = vsel %vm683_vm0, %v6536_v44, %v10001_v28 }
 0x79d   : > { %v4839_v61 = vsel %vm2098_vm8, %v4807_v58, %v10002_v4 }
 0x79f   : > { %v6538_v48 = vpop.eup %6537 }
 0x7a0   : > { %v6540_v35 = vpop.eup %6539  ;;  %v4808_v25 = vsel %vm683_vm0, %v6538_v48, %v10004_v39 }
 0x7a1   : > { %v4810_v37 = vsel %vm683_vm0, %v6540_v35, %v10005_v53  ;;  %v4840_v40 = vsel %vm2098_vm8, %v4808_v25, %v10006_v1 }
 0x7a2   : > { %v4842_v60 = vsel %vm2098_vm8, %v4810_v37, %v10008_v24 }
 0x7aa   : > { %v4648_v59 = vpop.permute.xlu0 %4647 }
 0x7ab   : > { %v4874_v29 = vsel %vm4843_vm15, %v4841_v52, %v4648_v59 }
 0x7ac   : > { %v4907_v34 = vsel %vm4876_vm1, %v4874_v29, %v10000_v26 }
 0x7ad   : > { %v4940_v13 = vsel %vm4909_vm2, %v4907_v34, 0.0 }
 0x7ae   : > { %4972 = vst [vmem:[%s9354_s23 + $0xf0] sm:$0xff] %v4940_v13  ;;  %v4644_v31 = vpop.permute.xlu0 %4643 }
 0x7af   : > { %v4872_v20 = vsel %vm4843_vm15, %v4839_v61, %v4644_v31  ;;  %v4650_v19 = vpop.permute.xlu1 %4649 }
 0x7b0   : > { %v4905_v50 = vsel %vm4876_vm1, %v4872_v20, %v10003_v6  ;;  %v4875_v18 = vsel %vm4843_vm15, %v4842_v60, %v4650_v19 }
 0x7b1   : > { %v4938_v54 = vsel %vm4909_vm2, %v4905_v50, 0.0 }
 0x7b2   : > { %4970 = vst [vmem:[%s9354_s23 + $0xe0] sm:$0xff] %v4938_v54 }
 0x7b3   : > { %v4646_v55 = vpop.permute.xlu1 %4645 }
 0x7b4   : > { %v4873_v38 = vsel %vm4843_vm15, %v4840_v40, %v4646_v55 }
 0x7b5   : > { %v4906_v15 = vsel %vm4876_vm1, %v4873_v38, %v10007_v49 }
 0x7b6   : > { %v4939_v57 = vsel %vm4909_vm2, %v4906_v15, 0.0 }
 0x7b7   : > { %4971 = vst [vmem:[%s9354_s23 + $0xe8] sm:$0xff] %v4939_v57  ;;  %v4746_v27 = vpop.permute.xlu1 %4745 }
 0x7b8   : > { %v4908_v45 = vsel %vm4876_vm1, %v4875_v18, %v4746_v27 }
 0x7b9   : > { %v4941_v7 = vsel %vm4909_vm2, %v4908_v45, 0.0 }
 0x7ba   : > { %4973 = vst [vmem:[%s9354_s23 + $0xf8] sm:$0xff] %v4941_v7 }
 0x7da   : > { %v4990_v30 = vpop.trf.xlu0 }
 0x7db   : > { %5006 = vst [vmem:[%s592_s22] sm:$0xff] %v4990_v30 }
 0x7de   : > { %v4991_v42 = vpop.trf.xlu0 }
 0x7df   : > { %5007 = vst [vmem:[%s592_s22 + $0x8] sm:$0xff] %v4991_v42 }
 0x7e0 PF: > { %s26_s18 = sadd.s32 1, %s6563_s18  }
 0x7e1   : > { %p23_p4 = scmp.ge.s32.totalorder %s26_s18, 4  }
 0x7e3   :  { %25 = sbr.rel (!%p23_p4) target bundleno = 1 (0x1), region = 133 }

</bundles_post_ra>
